<compile_context>
chip_gen: v7x
topology: tpu7x:2x2x1
jax: 0.10.0
libtpu: 0.0.40
codegen_flags: <defaults>
</compile_context>

<pallas_src>
import functools

import jax
import jax.numpy as jnp
from jax import lax
from jax.experimental import pallas as pl
from jax.experimental.pallas import tpu as pltpu


# ----------------------------------------------------------------------------
# In-kernel building blocks.  They operate on VMEM-resident *values*, one
# sample at a time, channels-last 2-D (T, C).  Conv weights arrive as
# (K, Cin, Cout) bf16 refs, biases as (1, Cout) f32 refs.
# ----------------------------------------------------------------------------
def _conv1d(x, w_ref, b_ref, *, padding=0, dilation=1, relu_out=False):
    """Stride-1 Conv1d on a (T, Cin) f32 value."""
    T, Cin = x.shape
    K = w_ref.shape[0]
    if padding > 0:
        zpad = jnp.zeros((padding, Cin), x.dtype)
        x = jnp.concatenate([zpad, x, zpad], axis=0)          # sublane-axis concat
    T_out = x.shape[0] - dilation * (K - 1)
    acc = None
    for k in range(K):                                        # static unroll
        s = k * dilation
        tap = x[s:s + T_out, :]                               # static VMEM slice
        y = jnp.dot(tap.astype(jnp.bfloat16), w_ref[k],
                    preferred_element_type=jnp.float32)       # bf16 MXU, f32 acc
        acc = y if acc is None else acc + y
    acc = acc + b_ref[...]                                    # (1, Cout) broadcast
    if relu_out:
        acc = jnp.maximum(acc, 0.0)
    return acc


def _downconv_s2(x, w_ref, b_ref, buf_ref):
    """Conv1d(k=4, stride=2, pad=1) with the decimation folded into the taps.

    The padded activation is staged in a VMEM scratch buffer once; each tap is
    read back as a stride-2 sublane load, so every matmul has M = T/2 rows and
    no selection matmul is needed.
    """
    Tc, Cin = x.shape
    K = w_ref.shape[0]                                        # 4
    T_out = Tc // 2
    assert Cin == buf_ref.shape[1]
    zrow = jnp.zeros((1, Cin), jnp.float32)
    buf_ref[0:1, :] = zrow                                    # top pad
    buf_ref[1:Tc + 1, :] = x
    buf_ref[Tc + 1:Tc + 2, :] = zrow                          # bottom pad
    acc = None
    for k in range(K):
        tap = buf_ref[pl.ds(k, T_out, 2), :]                  # stride-2 sublane load
        y = jnp.dot(tap.astype(jnp.bfloat16), w_ref[k],
                    preferred_element_type=jnp.float32)
        acc = y if acc is None else acc + y
    return acc + b_ref[...]


def _upsample2(x, buf_ref):
    """Nearest x2 upsample along time via two stride-2 sublane stores (no matmul)."""
    Tc, Cin = x.shape
    assert Cin == buf_ref.shape[1]
    buf_ref[pl.ds(0, Tc, 2), :] = x                           # rows 0,2,4,...
    buf_ref[pl.ds(1, Tc, 2), :] = x                           # rows 1,3,5,...
    return buf_ref[0:2 * Tc, :]


def _res_block(x, rb, dilation):
    """ResConv1DBlock: relu -> dilated 3-tap conv -> relu -> 1x1 conv -> +x."""
    h = jnp.maximum(x, 0.0)                                   # f32 VPU
    h = _conv1d(h, rb["w1"], rb["b1"],
                padding=dilation, dilation=dilation, relu_out=True)
    h = _conv1d(h, rb["w2"], rb["b2"], padding=0)
    return x + h


# ----------------------------------------------------------------------------
# Fused per-sample forward kernel: encoder -> quantizer -> decoder.
# ----------------------------------------------------------------------------
def _vqvae_fwd_kernel(x_ref, *refs, treedef, n_params, depth, dgr):
    param_refs = refs[:n_params]
    xout_ref, counts_ref, sqerr_ref, buf_ref = refs[n_params:]
    p = jax.tree_util.tree_unflatten(treedef, param_refs)     # pytree of Refs
    enc, dec = p["encoder"], p["decoder"]
    cb = p["codebook"][...]                                   # (ncode, D) f32
    cb_t = p["codebook_t"][...]                               # (D, ncode) bf16
    c2 = p["codebook_sq"][...]                                # (1, ncode) f32

    x = x_ref[0]                                              # (T, in_width) f32

    # ---------------- encoder ----------------
    h = _conv1d(x, enc["in"]["w"], enc["in"]["b"], padding=1, relu_out=True)
    for blk in enc["downs"]:
        h = _downconv_s2(h, blk["down"]["w"], blk["down"]["b"], buf_ref)
        for j, rb in enumerate(blk["res"]):
            h = _res_block(h, rb, dgr ** j)
    z = _conv1d(h, enc["out"]["w"], enc["out"]["b"], padding=1)

    # ------------ quantizer ('orig', beta=1.0) ------------
    # Cross term on the MXU in bf16 (f32 acc); z2/c2/argmin/z_q stay f32.
    z2 = jnp.sum(z * z, axis=1, keepdims=True)                # (t, 1)
    zc = jnp.dot(z.astype(jnp.bfloat16), cb_t,
                 preferred_element_type=jnp.float32)          # (t, ncode)
    d = z2 + c2 - 2.0 * zc
    idx = jnp.argmin(d, axis=1)
    onehot = (lax.broadcasted_iota(jnp.int32, d.shape, 1)
              == idx[:, None]).astype(jnp.float32)
    zq = jnp.dot(onehot, cb, preferred_element_type=jnp.float32)  # exact code rows
    counts_ref[0] = jnp.sum(onehot, axis=0, keepdims=True)    # (1, ncode)
    e2 = (zq - z) * (zq - z)
    sqerr_ref[0] = jnp.sum(jnp.sum(e2, axis=1, keepdims=True),
                           axis=0, keepdims=True)             # (1, 1)

    # ---------------- decoder (straight-through: decoder consumes zq) -------
    h = _conv1d(zq, dec["in"]["w"], dec["in"]["b"], padding=1, relu_out=True)
    for blk in dec["ups"]:
        for j, rb in enumerate(blk["res"]):                   # reverse_dilation=True
            h = _res_block(h, rb, dgr ** (depth - 1 - j))
        h = _upsample2(h, buf_ref)
        h = _conv1d(h, blk["up"]["w"], blk["up"]["b"], padding=1)
    h = _conv1d(h, dec["mid"]["w"], dec["mid"]["b"], padding=1, relu_out=True)
    y = _conv1d(h, dec["out"]["w"], dec["out"]["b"], padding=1)
    xout_ref[0] = y.astype(xout_ref.dtype)


# ----------------------------------------------------------------------------
# Parameter init (deterministic, synthetic) — stored f32, channels-last.
# ----------------------------------------------------------------------------
def conv_init(key, K, cin, cout, scale=0.1):
    kw, kb = jax.random.split(key)
    return {"w": scale * jax.random.normal(kw, (K, cin, cout), jnp.float32),
            "b": scale * jax.random.normal(kb, (cout,), jnp.float32)}


def res_init(key, width, scale=0.1):
    k1, k2 = jax.random.split(key)
    c1 = conv_init(k1, 3, width, width, scale)   # dilated 3-tap conv
    c2 = conv_init(k2, 1, width, width, scale)   # 1x1 conv
    return {"w1": c1["w"], "b1": c1["b"], "w2": c2["w"], "b2": c2["b"]}


def init_encoder(key, cin, cout, width, down_t, depth):
    keys = jax.random.split(key, 2 + down_t)
    downs = []
    for i in range(down_t):
        ks = jax.random.split(keys[2 + i], 1 + depth)
        downs.append({"down": conv_init(ks[0], 4, width, width),
                      "res": [res_init(ks[1 + j], width) for j in range(depth)]})
    return {"in": conv_init(keys[0], 3, cin, width),
            "downs": downs,
            "out": conv_init(keys[1], 3, width, cout)}


def init_decoder(key, out_emb, code_dim, width, down_t, depth):
    keys = jax.random.split(key, 3 + down_t)
    ups = []
    for i in range(down_t):
        ks = jax.random.split(keys[3 + i], 1 + depth)
        ups.append({"res": [res_init(ks[1 + j], width) for j in range(depth)],
                    "up": conv_init(ks[0], 3, width, width)})
    return {"in": conv_init(keys[0], 3, code_dim, width),
            "ups": ups,
            "mid": conv_init(keys[1], 3, width, width),
            "out": conv_init(keys[2], 3, width, out_emb)}


def init_vqvae(key, *, input_emb_width, code_dim, nb_code, width, down_t, depth):
    ke, kd, kq = jax.random.split(key, 3)
    codebook = jax.random.uniform(kq, (nb_code, code_dim), jnp.float32,
                                  minval=-1.0 / nb_code, maxval=1.0 / nb_code)
    return {"encoder": init_encoder(ke, input_emb_width, code_dim, width, down_t, depth),
            "decoder": init_decoder(kd, input_emb_width, code_dim, width, down_t, depth),
            "codebook": codebook}


# ----------------------------------------------------------------------------
# Wrapper
# ----------------------------------------------------------------------------
def _prepare_params(params):
    """bf16 conv weights, (1, C) f32 biases, codebook f32 + bf16 transpose + ||c||^2."""
    def prep(a):
        if a.ndim == 3:                 # conv weights (K, Cin, Cout)
            return a.astype(jnp.bfloat16)
        if a.ndim == 1:                 # biases
            return a.reshape(1, -1)
        return a                        # codebook (2-D) stays f32
    pp = jax.tree_util.tree_map(prep, params)
    cb = params["codebook"]
    pp["codebook_t"] = cb.T.astype(jnp.bfloat16)               # (D, ncode) bf16 for MXU
    pp["codebook_sq"] = jnp.sum(cb * cb, axis=1).reshape(1, -1)  # hoisted ||c||^2
    return pp


def _flops_estimate(N, T, in_width, width, code_dim, nb_code, down_t, depth):
    f = 2 * T * 3 * in_width * width                              # encoder in conv
    tc = T
    for _ in range(down_t):
        tc //= 2
        f += 2 * tc * 4 * width * width                           # strided down conv
        f += depth * (2 * tc * 3 * width * width + 2 * tc * width * width)
    f += 2 * tc * 3 * width * code_dim                            # encoder out conv
    f += 2 * tc * nb_code * code_dim * 2                          # distances + zq select
    f += 2 * tc * 3 * code_dim * width                            # decoder in conv
    for _ in range(down_t):
        f += depth * (2 * tc * 3 * width * width + 2 * tc * width * width)
        tc *= 2
        f += 2 * tc * 3 * width * width                           # up conv
    f += 2 * tc * 3 * width * width                               # mid conv
    f += 2 * tc * 3 * width * in_width                            # out conv
    return int(N * f)


def vqvae_forward(params, x, *, depth, dgr):
    """x: (N, T, input_emb_width) f32 -> (x_out, loss, perplexity)."""
    N, T, in_width = x.shape
    nb_code, code_dim = params["codebook"].shape
    down_t = len(params["encoder"]["downs"])
    width = params["encoder"]["in"]["w"].shape[-1]
    assert T % (2 ** down_t) == 0, "T must be divisible by 2**down_t"

    pp = _prepare_params(params)
    flat, treedef = jax.tree_util.tree_flatten(pp)

    def full_spec(a):
        # Whole (tiny) array resident in VMEM; constant index map -> fetched once.
        return pl.BlockSpec(a.shape, lambda n, _z=(0,) * a.ndim: _z)

    kernel = functools.partial(_vqvae_fwd_kernel, treedef=treedef,
                               n_params=len(flat), depth=depth, dgr=dgr)

    flops = _flops_estimate(N, T, in_width, width, code_dim, nb_code, down_t, depth)
    bytes_accessed = int(
        x.size * 4
        + sum(int(a.size) * a.dtype.itemsize for a in flat)
        + N * T * in_width * 4 + N * nb_code * 4 + N * 4)

    x_out, counts, sqerr = pl.pallas_call(
        kernel,
        grid=(N,),                                             # one sample per grid step
        in_specs=[pl.BlockSpec((1, T, in_width), lambda n: (n, 0, 0))]
                 + [full_spec(a) for a in flat],
        out_specs=(
            pl.BlockSpec((1, T, in_width), lambda n: (n, 0, 0)),
            pl.BlockSpec((1, 1, nb_code), lambda n: (n, 0, 0)),
            pl.BlockSpec((1, 1, 1), lambda n: (n, 0, 0)),
        ),
        out_shape=(
            jax.ShapeDtypeStruct((N, T, in_width), jnp.float32),   # x_out
            jax.ShapeDtypeStruct((N, 1, nb_code), jnp.float32),    # per-sample code counts
            jax.ShapeDtypeStruct((N, 1, 1), jnp.float32),          # per-sample sum |zq - z|^2
        ),
        scratch_shapes=[pltpu.VMEM((T + 8, width), jnp.float32)],  # pad / interleave buffer
        compiler_params=pltpu.CompilerParams(
            dimension_semantics=("parallel",),                 # v7x: samples across 2 TCs
            vmem_limit_bytes=32 * 1024 * 1024),
        cost_estimate=pl.CostEstimate(flops=flops, transcendentals=0,
                                      bytes_accessed=bytes_accessed),
    )(x, *flat)

    # Tiny scalar epilogue in JAX (per-sample partials reduced here).
    M = N * (T >> down_t)
    beta = 1.0
    mse = jnp.sum(sqerr) / (M * code_dim)
    # loss = mse(sg(zq), z) + beta * mse(zq, sg(z)) — identical values forward.
    loss = mse + beta * mse
    e_mean = jnp.sum(counts, axis=(0, 1)) / M
    perplexity = jnp.exp(-jnp.sum(e_mean * jnp.log(e_mean + 1e-10)))
    return x_out, loss, perplexity


# ----------------------------------------------------------------------------
if __name__ == "__main__":
    # Small config: dataname='stock' -> input_emb_width=6, quantizer='orig'
    cfg = dict(input_emb_width=6, code_dim=32, nb_code=64,
               width=32, down_t=2, depth=2)
    dgr = 3  # dilation_growth_rate

    key = jax.random.PRNGKey(0)
    kp, kx = jax.random.split(key)
    params = init_vqvae(kp, **cfg)

    N, T = 2, 32
    x = jax.random.normal(kx, (N, T, cfg["input_emb_width"]), jnp.float32)

    fwd = jax.jit(functools.partial(vqvae_forward, depth=cfg["depth"], dgr=dgr))
    x_out, loss, perplexity = fwd(params, x)
    jax.block_until_ready((x_out, loss, perplexity))

    assert x_out.shape == (N, T, cfg["input_emb_width"]), x_out.shape
    assert loss.shape == () and perplexity.shape == ()
    assert bool(jnp.all(jnp.isfinite(x_out)))
    assert bool(jnp.isfinite(loss)) and bool(jnp.isfinite(perplexity))
    print("KERNEL_OK")
</pallas_src>

<mosaic_0001>
module attributes {stable_mosaic.version = 11 : i64} {
  func.func @_vqvae_fwd_kernel(%arg0: i32, %arg1: memref<1x32x6xf32, #tpu.memory_space<vmem>>, %arg2: memref<64x32xf32, #tpu.memory_space<vmem>>, %arg3: memref<1x64xf32, #tpu.memory_space<vmem>>, %arg4: memref<32x64xbf16, #tpu.memory_space<vmem>>, %arg5: memref<1x32xf32, #tpu.memory_space<vmem>>, %arg6: memref<3x32x32xbf16, #tpu.memory_space<vmem>>, %arg7: memref<1x32xf32, #tpu.memory_space<vmem>>, %arg8: memref<3x32x32xbf16, #tpu.memory_space<vmem>>, %arg9: memref<1x6xf32, #tpu.memory_space<vmem>>, %arg10: memref<3x32x6xbf16, #tpu.memory_space<vmem>>, %arg11: memref<1x32xf32, #tpu.memory_space<vmem>>, %arg12: memref<1x32xf32, #tpu.memory_space<vmem>>, %arg13: memref<3x32x32xbf16, #tpu.memory_space<vmem>>, %arg14: memref<1x32x32xbf16, #tpu.memory_space<vmem>>, %arg15: memref<1x32xf32, #tpu.memory_space<vmem>>, %arg16: memref<1x32xf32, #tpu.memory_space<vmem>>, %arg17: memref<3x32x32xbf16, #tpu.memory_space<vmem>>, %arg18: memref<1x32x32xbf16, #tpu.memory_space<vmem>>, %arg19: memref<1x32xf32, #tpu.memory_space<vmem>>, %arg20: memref<3x32x32xbf16, #tpu.memory_space<vmem>>, %arg21: memref<1x32xf32, #tpu.memory_space<vmem>>, %arg22: memref<1x32xf32, #tpu.memory_space<vmem>>, %arg23: memref<3x32x32xbf16, #tpu.memory_space<vmem>>, %arg24: memref<1x32x32xbf16, #tpu.memory_space<vmem>>, %arg25: memref<1x32xf32, #tpu.memory_space<vmem>>, %arg26: memref<1x32xf32, #tpu.memory_space<vmem>>, %arg27: memref<3x32x32xbf16, #tpu.memory_space<vmem>>, %arg28: memref<1x32x32xbf16, #tpu.memory_space<vmem>>, %arg29: memref<1x32xf32, #tpu.memory_space<vmem>>, %arg30: memref<3x32x32xbf16, #tpu.memory_space<vmem>>, %arg31: memref<1x32xf32, #tpu.memory_space<vmem>>, %arg32: memref<4x32x32xbf16, #tpu.memory_space<vmem>>, %arg33: memref<1x32xf32, #tpu.memory_space<vmem>>, %arg34: memref<1x32xf32, #tpu.memory_space<vmem>>, %arg35: memref<3x32x32xbf16, #tpu.memory_space<vmem>>, %arg36: memref<1x32x32xbf16, #tpu.memory_space<vmem>>, %arg37: memref<1x32xf32, #tpu.memory_space<vmem>>, %arg38: memref<1x32xf32, #tpu.memory_space<vmem>>, %arg39: memref<3x32x32xbf16, #tpu.memory_space<vmem>>, %arg40: memref<1x32x32xbf16, #tpu.memory_space<vmem>>, %arg41: memref<1x32xf32, #tpu.memory_space<vmem>>, %arg42: memref<4x32x32xbf16, #tpu.memory_space<vmem>>, %arg43: memref<1x32xf32, #tpu.memory_space<vmem>>, %arg44: memref<1x32xf32, #tpu.memory_space<vmem>>, %arg45: memref<3x32x32xbf16, #tpu.memory_space<vmem>>, %arg46: memref<1x32x32xbf16, #tpu.memory_space<vmem>>, %arg47: memref<1x32xf32, #tpu.memory_space<vmem>>, %arg48: memref<1x32xf32, #tpu.memory_space<vmem>>, %arg49: memref<3x32x32xbf16, #tpu.memory_space<vmem>>, %arg50: memref<1x32x32xbf16, #tpu.memory_space<vmem>>, %arg51: memref<1x32xf32, #tpu.memory_space<vmem>>, %arg52: memref<3x6x32xbf16, #tpu.memory_space<vmem>>, %arg53: memref<1x32xf32, #tpu.memory_space<vmem>>, %arg54: memref<3x32x32xbf16, #tpu.memory_space<vmem>>, %arg55: memref<1x32x6xf32, #tpu.memory_space<vmem>>, %arg56: memref<1x1x64xf32, #tpu.memory_space<vmem>>, %arg57: memref<1x1x1xf32, #tpu.memory_space<vmem>>, %arg58: memref<40x32xf32, #tpu.memory_space<vmem>>) attributes {dimension_semantics = [#tpu.dimension_semantics<parallel>], iteration_bounds = array<i64: 2>, scalar_prefetch = 0 : i64, scratch_operands = 1 : i64, tpu.core_type = #tpu.core_type<tc>, window_params = [{transform_indices = @transform_0, window_bounds = array<i64: 1, 32, 6>}, {pipeline_mode = #tpu.pipeline_mode<synchronous>, transform_indices = @transform_1, window_bounds = array<i64: 64, 32>}, {pipeline_mode = #tpu.pipeline_mode<synchronous>, transform_indices = @transform_2, window_bounds = array<i64: 1, 64>}, {pipeline_mode = #tpu.pipeline_mode<synchronous>, transform_indices = @transform_3, window_bounds = array<i64: 32, 64>}, {pipeline_mode = #tpu.pipeline_mode<synchronous>, transform_indices = @transform_4, window_bounds = array<i64: 1, 32>}, {pipeline_mode = #tpu.pipeline_mode<synchronous>, transform_indices = @transform_5, window_bounds = array<i64: 3, 32, 32>}, {pipeline_mode = #tpu.pipeline_mode<synchronous>, transform_indices = @transform_6, window_bounds = array<i64: 1, 32>}, {pipeline_mode = #tpu.pipeline_mode<synchronous>, transform_indices = @transform_7, window_bounds = array<i64: 3, 32, 32>}, {pipeline_mode = #tpu.pipeline_mode<synchronous>, transform_indices = @transform_8, window_bounds = array<i64: 1, 6>}, {pipeline_mode = #tpu.pipeline_mode<synchronous>, transform_indices = @transform_9, window_bounds = array<i64: 3, 32, 6>}, {pipeline_mode = #tpu.pipeline_mode<synchronous>, transform_indices = @transform_10, window_bounds = array<i64: 1, 32>}, {pipeline_mode = #tpu.pipeline_mode<synchronous>, transform_indices = @transform_11, window_bounds = array<i64: 1, 32>}, {pipeline_mode = #tpu.pipeline_mode<synchronous>, transform_indices = @transform_12, window_bounds = array<i64: 3, 32, 32>}, {pipeline_mode = #tpu.pipeline_mode<synchronous>, transform_indices = @transform_13, window_bounds = array<i64: 1, 32, 32>}, {pipeline_mode = #tpu.pipeline_mode<synchronous>, transform_indices = @transform_14, window_bounds = array<i64: 1, 32>}, {pipeline_mode = #tpu.pipeline_mode<synchronous>, transform_indices = @transform_15, window_bounds = array<i64: 1, 32>}, {pipeline_mode = #tpu.pipeline_mode<synchronous>, transform_indices = @transform_16, window_bounds = array<i64: 3, 32, 32>}, {pipeline_mode = #tpu.pipeline_mode<synchronous>, transform_indices = @transform_17, window_bounds = array<i64: 1, 32, 32>}, {pipeline_mode = #tpu.pipeline_mode<synchronous>, transform_indices = @transform_18, window_bounds = array<i64: 1, 32>}, {pipeline_mode = #tpu.pipeline_mode<synchronous>, transform_indices = @transform_19, window_bounds = array<i64: 3, 32, 32>}, {pipeline_mode = #tpu.pipeline_mode<synchronous>, transform_indices = @transform_20, window_bounds = array<i64: 1, 32>}, {pipeline_mode = #tpu.pipeline_mode<synchronous>, transform_indices = @transform_21, window_bounds = array<i64: 1, 32>}, {pipeline_mode = #tpu.pipeline_mode<synchronous>, transform_indices = @transform_22, window_bounds = array<i64: 3, 32, 32>}, {pipeline_mode = #tpu.pipeline_mode<synchronous>, transform_indices = @transform_23, window_bounds = array<i64: 1, 32, 32>}, {pipeline_mode = #tpu.pipeline_mode<synchronous>, transform_indices = @transform_24, window_bounds = array<i64: 1, 32>}, {pipeline_mode = #tpu.pipeline_mode<synchronous>, transform_indices = @transform_25, window_bounds = array<i64: 1, 32>}, {pipeline_mode = #tpu.pipeline_mode<synchronous>, transform_indices = @transform_26, window_bounds = array<i64: 3, 32, 32>}, {pipeline_mode = #tpu.pipeline_mode<synchronous>, transform_indices = @transform_27, window_bounds = array<i64: 1, 32, 32>}, {pipeline_mode = #tpu.pipeline_mode<synchronous>, transform_indices = @transform_28, window_bounds = array<i64: 1, 32>}, {pipeline_mode = #tpu.pipeline_mode<synchronous>, transform_indices = @transform_29, window_bounds = array<i64: 3, 32, 32>}, {pipeline_mode = #tpu.pipeline_mode<synchronous>, transform_indices = @transform_30, window_bounds = array<i64: 1, 32>}, {pipeline_mode = #tpu.pipeline_mode<synchronous>, transform_indices = @transform_31, window_bounds = array<i64: 4, 32, 32>}, {pipeline_mode = #tpu.pipeline_mode<synchronous>, transform_indices = @transform_32, window_bounds = array<i64: 1, 32>}, {pipeline_mode = #tpu.pipeline_mode<synchronous>, transform_indices = @transform_33, window_bounds = array<i64: 1, 32>}, {pipeline_mode = #tpu.pipeline_mode<synchronous>, transform_indices = @transform_34, window_bounds = array<i64: 3, 32, 32>}, {pipeline_mode = #tpu.pipeline_mode<synchronous>, transform_indices = @transform_35, window_bounds = array<i64: 1, 32, 32>}, {pipeline_mode = #tpu.pipeline_mode<synchronous>, transform_indices = @transform_36, window_bounds = array<i64: 1, 32>}, {pipeline_mode = #tpu.pipeline_mode<synchronous>, transform_indices = @transform_37, window_bounds = array<i64: 1, 32>}, {pipeline_mode = #tpu.pipeline_mode<synchronous>, transform_indices = @transform_38, window_bounds = array<i64: 3, 32, 32>}, {pipeline_mode = #tpu.pipeline_mode<synchronous>, transform_indices = @transform_39, window_bounds = array<i64: 1, 32, 32>}, {pipeline_mode = #tpu.pipeline_mode<synchronous>, transform_indices = @transform_40, window_bounds = array<i64: 1, 32>}, {pipeline_mode = #tpu.pipeline_mode<synchronous>, transform_indices = @transform_41, window_bounds = array<i64: 4, 32, 32>}, {pipeline_mode = #tpu.pipeline_mode<synchronous>, transform_indices = @transform_42, window_bounds = array<i64: 1, 32>}, {pipeline_mode = #tpu.pipeline_mode<synchronous>, transform_indices = @transform_43, window_bounds = array<i64: 1, 32>}, {pipeline_mode = #tpu.pipeline_mode<synchronous>, transform_indices = @transform_44, window_bounds = array<i64: 3, 32, 32>}, {pipeline_mode = #tpu.pipeline_mode<synchronous>, transform_indices = @transform_45, window_bounds = array<i64: 1, 32, 32>}, {pipeline_mode = #tpu.pipeline_mode<synchronous>, transform_indices = @transform_46, window_bounds = array<i64: 1, 32>}, {pipeline_mode = #tpu.pipeline_mode<synchronous>, transform_indices = @transform_47, window_bounds = array<i64: 1, 32>}, {pipeline_mode = #tpu.pipeline_mode<synchronous>, transform_indices = @transform_48, window_bounds = array<i64: 3, 32, 32>}, {pipeline_mode = #tpu.pipeline_mode<synchronous>, transform_indices = @transform_49, window_bounds = array<i64: 1, 32, 32>}, {pipeline_mode = #tpu.pipeline_mode<synchronous>, transform_indices = @transform_50, window_bounds = array<i64: 1, 32>}, {pipeline_mode = #tpu.pipeline_mode<synchronous>, transform_indices = @transform_51, window_bounds = array<i64: 3, 6, 32>}, {pipeline_mode = #tpu.pipeline_mode<synchronous>, transform_indices = @transform_52, window_bounds = array<i64: 1, 32>}, {pipeline_mode = #tpu.pipeline_mode<synchronous>, transform_indices = @transform_53, window_bounds = array<i64: 3, 32, 32>}, {transform_indices = @transform_54, window_bounds = array<i64: 1, 32, 6>}, {transform_indices = @transform_55, window_bounds = array<i64: 1, 1, 64>}, {transform_indices = @transform_56, window_bounds = array<i64: 1, 1, 1>}]} {
    %c0 = arith.constant 0 : index
    %c0_0 = arith.constant 0 : index
    %0 = vector.load %arg2[%c0, %c0_0] : memref<64x32xf32, #tpu.memory_space<vmem>>, vector<64x32xf32>
    %c0_1 = arith.constant 0 : index
    %c0_2 = arith.constant 0 : index
    %1 = vector.load %arg4[%c0_1, %c0_2] : memref<32x64xbf16, #tpu.memory_space<vmem>>, vector<32x64xbf16>
    %c0_3 = arith.constant 0 : index
    %c0_4 = arith.constant 0 : index
    %2 = vector.load %arg3[%c0_3, %c0_4] : memref<1x64xf32, #tpu.memory_space<vmem>>, vector<1x64xf32>
    %c0_5 = arith.constant 0 : index
    %c0_6 = arith.constant 0 : index
    %c0_7 = arith.constant 0 : index
    %3 = vector.load %arg1[%c0_5, %c0_6, %c0_7] : memref<1x32x6xf32, #tpu.memory_space<vmem>>, vector<1x32x6xf32>
    %4 = vector.shape_cast %3 : vector<1x32x6xf32> to vector<32x6xf32>
    %cst = arith.constant 0.000000e+00 : f32
    %5 = vector.broadcast %cst : f32 to vector<1x6xf32>
    %6 = tpu.concatenate %5, %4, %5 in 0 : vector<1x6xf32>, vector<32x6xf32>, vector<1x6xf32> -> vector<34x6xf32>
    %7 = vector.extract_strided_slice %6 {offsets = [0, 0], sizes = [32, 6], strides = [1, 1]} : vector<34x6xf32> to vector<32x6xf32>
    %8 = arith.truncf %7 : vector<32x6xf32> to vector<32x6xbf16>
    %c0_8 = arith.constant 0 : index
    %c0_9 = arith.constant 0 : index
    %c0_10 = arith.constant 0 : index
    %9 = vector.load %arg52[%c0_8, %c0_9, %c0_10] : memref<3x6x32xbf16, #tpu.memory_space<vmem>>, vector<1x6x32xbf16>
    %10 = vector.shape_cast %9 : vector<1x6x32xbf16> to vector<6x32xbf16>
    %cst_11 = arith.constant dense<0.000000e+00> : vector<32x32xf32>
    %11 = tpu.matmul %8, %10, %cst_11 {dimension_numbers = #tpu.dot_dimension_numbers<[1], [0], [0], [1], [0, 0, 1, 1], [], []>} : vector<32x6xbf16>, vector<6x32xbf16>, vector<32x32xf32> -> vector<32x32xf32>
    %12 = vector.extract_strided_slice %6 {offsets = [1, 0], sizes = [32, 6], strides = [1, 1]} : vector<34x6xf32> to vector<32x6xf32>
    %13 = arith.truncf %12 : vector<32x6xf32> to vector<32x6xbf16>
    %c1 = arith.constant 1 : index
    %c0_12 = arith.constant 0 : index
    %c0_13 = arith.constant 0 : index
    %14 = vector.load %arg52[%c1, %c0_12, %c0_13] : memref<3x6x32xbf16, #tpu.memory_space<vmem>>, vector<1x6x32xbf16>
    %15 = vector.shape_cast %14 : vector<1x6x32xbf16> to vector<6x32xbf16>
    %cst_14 = arith.constant dense<0.000000e+00> : vector<32x32xf32>
    %16 = tpu.matmul %13, %15, %cst_14 {dimension_numbers = #tpu.dot_dimension_numbers<[1], [0], [0], [1], [0, 0, 1, 1], [], []>} : vector<32x6xbf16>, vector<6x32xbf16>, vector<32x32xf32> -> vector<32x32xf32>
    %17 = arith.addf %11, %16 : vector<32x32xf32>
    %18 = vector.extract_strided_slice %6 {offsets = [2, 0], sizes = [32, 6], strides = [1, 1]} : vector<34x6xf32> to vector<32x6xf32>
    %19 = arith.truncf %18 : vector<32x6xf32> to vector<32x6xbf16>
    %c2 = arith.constant 2 : index
    %c0_15 = arith.constant 0 : index
    %c0_16 = arith.constant 0 : index
    %20 = vector.load %arg52[%c2, %c0_15, %c0_16] : memref<3x6x32xbf16, #tpu.memory_space<vmem>>, vector<1x6x32xbf16>
    %21 = vector.shape_cast %20 : vector<1x6x32xbf16> to vector<6x32xbf16>
    %cst_17 = arith.constant dense<0.000000e+00> : vector<32x32xf32>
    %22 = tpu.matmul %19, %21, %cst_17 {dimension_numbers = #tpu.dot_dimension_numbers<[1], [0], [0], [1], [0, 0, 1, 1], [], []>} : vector<32x6xbf16>, vector<6x32xbf16>, vector<32x32xf32> -> vector<32x32xf32>
    %23 = arith.addf %17, %22 : vector<32x32xf32>
    %c0_18 = arith.constant 0 : index
    %c0_19 = arith.constant 0 : index
    %24 = vector.load %arg51[%c0_18, %c0_19] : memref<1x32xf32, #tpu.memory_space<vmem>>, vector<1x32xf32>
    %25 = vector.broadcast %24 : vector<1x32xf32> to vector<32x32xf32>
    %26 = arith.addf %23, %25 : vector<32x32xf32>
    %cst_20 = arith.constant 0.000000e+00 : f32
    %27 = vector.broadcast %cst_20 : f32 to vector<32x32xf32>
    %28 = arith.maximumf %26, %27 : vector<32x32xf32>
    %cst_21 = arith.constant 0.000000e+00 : f32
    %29 = vector.broadcast %cst_21 : f32 to vector<1x32xf32>
    %c0_22 = arith.constant 0 : index
    %c0_23 = arith.constant 0 : index
    %30 = vector.load %arg58[%c0_22, %c0_23] : memref<40x32xf32, #tpu.memory_space<vmem>>, vector<1x32xf32>
    tpu.vector_store %arg58[%c0_22, %c0_23], %29 {strides = array<i32>} : memref<40x32xf32, #tpu.memory_space<vmem>>, vector<1x32xf32>,
    %c1_24 = arith.constant 1 : index
    %c0_25 = arith.constant 0 : index
    %31 = vector.load %arg58[%c1_24, %c0_25] : memref<40x32xf32, #tpu.memory_space<vmem>>, vector<32x32xf32>
    tpu.vector_store %arg58[%c1_24, %c0_25], %28 {strides = array<i32>} : memref<40x32xf32, #tpu.memory_space<vmem>>, vector<32x32xf32>,
    %c33 = arith.constant 33 : index
    %c0_26 = arith.constant 0 : index
    %32 = vector.load %arg58[%c33, %c0_26] : memref<40x32xf32, #tpu.memory_space<vmem>>, vector<1x32xf32>
    tpu.vector_store %arg58[%c33, %c0_26], %29 {strides = array<i32>} : memref<40x32xf32, #tpu.memory_space<vmem>>, vector<1x32xf32>,
    %c0_27 = arith.constant 0 : index
    %c0_28 = arith.constant 0 : index
    %33 = tpu.strided_load %arg58[%c0_27, %c0_28] {strides = array<i32: 2, 1>} : memref<40x32xf32, #tpu.memory_space<vmem>>, vector<16x32xf32>
    %34 = arith.truncf %33 : vector<16x32xf32> to vector<16x32xbf16>
    %c0_29 = arith.constant 0 : index
    %c0_30 = arith.constant 0 : index
    %c0_31 = arith.constant 0 : index
    %35 = vector.load %arg32[%c0_29, %c0_30, %c0_31] : memref<4x32x32xbf16, #tpu.memory_space<vmem>>, vector<1x32x32xbf16>
    %36 = vector.shape_cast %35 : vector<1x32x32xbf16> to vector<32x32xbf16>
    %cst_32 = arith.constant dense<0.000000e+00> : vector<16x32xf32>
    %37 = tpu.matmul %34, %36, %cst_32 {dimension_numbers = #tpu.dot_dimension_numbers<[1], [0], [0], [1], [0, 0, 1, 1], [], []>} : vector<16x32xbf16>, vector<32x32xbf16>, vector<16x32xf32> -> vector<16x32xf32>
    %c1_33 = arith.constant 1 : index
    %c0_34 = arith.constant 0 : index
    %38 = tpu.strided_load %arg58[%c1_33, %c0_34] {strides = array<i32: 2, 1>} : memref<40x32xf32, #tpu.memory_space<vmem>>, vector<16x32xf32>
    %39 = arith.truncf %38 : vector<16x32xf32> to vector<16x32xbf16>
    %c1_35 = arith.constant 1 : index
    %c0_36 = arith.constant 0 : index
    %c0_37 = arith.constant 0 : index
    %40 = vector.load %arg32[%c1_35, %c0_36, %c0_37] : memref<4x32x32xbf16, #tpu.memory_space<vmem>>, vector<1x32x32xbf16>
    %41 = vector.shape_cast %40 : vector<1x32x32xbf16> to vector<32x32xbf16>
    %cst_38 = arith.constant dense<0.000000e+00> : vector<16x32xf32>
    %42 = tpu.matmul %39, %41, %cst_38 {dimension_numbers = #tpu.dot_dimension_numbers<[1], [0], [0], [1], [0, 0, 1, 1], [], []>} : vector<16x32xbf16>, vector<32x32xbf16>, vector<16x32xf32> -> vector<16x32xf32>
    %43 = arith.addf %37, %42 : vector<16x32xf32>
    %c2_39 = arith.constant 2 : index
    %c0_40 = arith.constant 0 : index
    %44 = tpu.strided_load %arg58[%c2_39, %c0_40] {strides = array<i32: 2, 1>} : memref<40x32xf32, #tpu.memory_space<vmem>>, vector<16x32xf32>
    %45 = arith.truncf %44 : vector<16x32xf32> to vector<16x32xbf16>
    %c2_41 = arith.constant 2 : index
    %c0_42 = arith.constant 0 : index
    %c0_43 = arith.constant 0 : index
    %46 = vector.load %arg32[%c2_41, %c0_42, %c0_43] : memref<4x32x32xbf16, #tpu.memory_space<vmem>>, vector<1x32x32xbf16>
    %47 = vector.shape_cast %46 : vector<1x32x32xbf16> to vector<32x32xbf16>
    %cst_44 = arith.constant dense<0.000000e+00> : vector<16x32xf32>
    %48 = tpu.matmul %45, %47, %cst_44 {dimension_numbers = #tpu.dot_dimension_numbers<[1], [0], [0], [1], [0, 0, 1, 1], [], []>} : vector<16x32xbf16>, vector<32x32xbf16>, vector<16x32xf32> -> vector<16x32xf32>
    %49 = arith.addf %43, %48 : vector<16x32xf32>
    %c3 = arith.constant 3 : index
    %c0_45 = arith.constant 0 : index
    %50 = tpu.strided_load %arg58[%c3, %c0_45] {strides = array<i32: 2, 1>} : memref<40x32xf32, #tpu.memory_space<vmem>>, vector<16x32xf32>
    %51 = arith.truncf %50 : vector<16x32xf32> to vector<16x32xbf16>
    %c3_46 = arith.constant 3 : index
    %c0_47 = arith.constant 0 : index
    %c0_48 = arith.constant 0 : index
    %52 = vector.load %arg32[%c3_46, %c0_47, %c0_48] : memref<4x32x32xbf16, #tpu.memory_space<vmem>>, vector<1x32x32xbf16>
    %53 = vector.shape_cast %52 : vector<1x32x32xbf16> to vector<32x32xbf16>
    %cst_49 = arith.constant dense<0.000000e+00> : vector<16x32xf32>
    %54 = tpu.matmul %51, %53, %cst_49 {dimension_numbers = #tpu.dot_dimension_numbers<[1], [0], [0], [1], [0, 0, 1, 1], [], []>} : vector<16x32xbf16>, vector<32x32xbf16>, vector<16x32xf32> -> vector<16x32xf32>
    %55 = arith.addf %49, %54 : vector<16x32xf32>
    %c0_50 = arith.constant 0 : index
    %c0_51 = arith.constant 0 : index
    %56 = vector.load %arg31[%c0_50, %c0_51] : memref<1x32xf32, #tpu.memory_space<vmem>>, vector<1x32xf32>
    %57 = vector.broadcast %56 : vector<1x32xf32> to vector<16x32xf32>
    %58 = arith.addf %55, %57 : vector<16x32xf32>
    %cst_52 = arith.constant 0.000000e+00 : f32
    %59 = vector.broadcast %cst_52 : f32 to vector<16x32xf32>
    %60 = arith.maximumf %58, %59 : vector<16x32xf32>
    %cst_53 = arith.constant 0.000000e+00 : f32
    %61 = vector.broadcast %cst_53 : f32 to vector<1x32xf32>
    %62 = tpu.concatenate %61, %60, %61 in 0 : vector<1x32xf32>, vector<16x32xf32>, vector<1x32xf32> -> vector<18x32xf32>
    %63 = vector.extract_strided_slice %62 {offsets = [0, 0], sizes = [16, 32], strides = [1, 1]} : vector<18x32xf32> to vector<16x32xf32>
    %64 = arith.truncf %63 : vector<16x32xf32> to vector<16x32xbf16>
    %c0_54 = arith.constant 0 : index
    %c0_55 = arith.constant 0 : index
    %c0_56 = arith.constant 0 : index
    %65 = vector.load %arg35[%c0_54, %c0_55, %c0_56] : memref<3x32x32xbf16, #tpu.memory_space<vmem>>, vector<1x32x32xbf16>
    %66 = vector.shape_cast %65 : vector<1x32x32xbf16> to vector<32x32xbf16>
    %cst_57 = arith.constant dense<0.000000e+00> : vector<16x32xf32>
    %67 = tpu.matmul %64, %66, %cst_57 {dimension_numbers = #tpu.dot_dimension_numbers<[1], [0], [0], [1], [0, 0, 1, 1], [], []>} : vector<16x32xbf16>, vector<32x32xbf16>, vector<16x32xf32> -> vector<16x32xf32>
    %68 = vector.extract_strided_slice %62 {offsets = [1, 0], sizes = [16, 32], strides = [1, 1]} : vector<18x32xf32> to vector<16x32xf32>
    %69 = arith.truncf %68 : vector<16x32xf32> to vector<16x32xbf16>
    %c1_58 = arith.constant 1 : index
    %c0_59 = arith.constant 0 : index
    %c0_60 = arith.constant 0 : index
    %70 = vector.load %arg35[%c1_58, %c0_59, %c0_60] : memref<3x32x32xbf16, #tpu.memory_space<vmem>>, vector<1x32x32xbf16>
    %71 = vector.shape_cast %70 : vector<1x32x32xbf16> to vector<32x32xbf16>
    %cst_61 = arith.constant dense<0.000000e+00> : vector<16x32xf32>
    %72 = tpu.matmul %69, %71, %cst_61 {dimension_numbers = #tpu.dot_dimension_numbers<[1], [0], [0], [1], [0, 0, 1, 1], [], []>} : vector<16x32xbf16>, vector<32x32xbf16>, vector<16x32xf32> -> vector<16x32xf32>
    %73 = arith.addf %67, %72 : vector<16x32xf32>
    %74 = vector.extract_strided_slice %62 {offsets = [2, 0], sizes = [16, 32], strides = [1, 1]} : vector<18x32xf32> to vector<16x32xf32>
    %75 = arith.truncf %74 : vector<16x32xf32> to vector<16x32xbf16>
    %c2_62 = arith.constant 2 : index
    %c0_63 = arith.constant 0 : index
    %c0_64 = arith.constant 0 : index
    %76 = vector.load %arg35[%c2_62, %c0_63, %c0_64] : memref<3x32x32xbf16, #tpu.memory_space<vmem>>, vector<1x32x32xbf16>
    %77 = vector.shape_cast %76 : vector<1x32x32xbf16> to vector<32x32xbf16>
    %cst_65 = arith.constant dense<0.000000e+00> : vector<16x32xf32>
    %78 = tpu.matmul %75, %77, %cst_65 {dimension_numbers = #tpu.dot_dimension_numbers<[1], [0], [0], [1], [0, 0, 1, 1], [], []>} : vector<16x32xbf16>, vector<32x32xbf16>, vector<16x32xf32> -> vector<16x32xf32>
    %79 = arith.addf %73, %78 : vector<16x32xf32>
    %c0_66 = arith.constant 0 : index
    %c0_67 = arith.constant 0 : index
    %80 = vector.load %arg33[%c0_66, %c0_67] : memref<1x32xf32, #tpu.memory_space<vmem>>, vector<1x32xf32>
    %81 = vector.broadcast %80 : vector<1x32xf32> to vector<16x32xf32>
    %82 = arith.addf %79, %81 : vector<16x32xf32>
    %cst_68 = arith.constant 0.000000e+00 : f32
    %83 = vector.broadcast %cst_68 : f32 to vector<16x32xf32>
    %84 = arith.maximumf %82, %83 : vector<16x32xf32>
    %85 = arith.truncf %84 : vector<16x32xf32> to vector<16x32xbf16>
    %c0_69 = arith.constant 0 : index
    %c0_70 = arith.constant 0 : index
    %c0_71 = arith.constant 0 : index
    %86 = vector.load %arg36[%c0_69, %c0_70, %c0_71] : memref<1x32x32xbf16, #tpu.memory_space<vmem>>, vector<1x32x32xbf16>
    %87 = vector.shape_cast %86 : vector<1x32x32xbf16> to vector<32x32xbf16>
    %cst_72 = arith.constant dense<0.000000e+00> : vector<16x32xf32>
    %88 = tpu.matmul %85, %87, %cst_72 {dimension_numbers = #tpu.dot_dimension_numbers<[1], [0], [0], [1], [0, 0, 1, 1], [], []>} : vector<16x32xbf16>, vector<32x32xbf16>, vector<16x32xf32> -> vector<16x32xf32>
    %c0_73 = arith.constant 0 : index
    %c0_74 = arith.constant 0 : index
    %89 = vector.load %arg34[%c0_73, %c0_74] : memref<1x32xf32, #tpu.memory_space<vmem>>, vector<1x32xf32>
    %90 = vector.broadcast %89 : vector<1x32xf32> to vector<16x32xf32>
    %91 = arith.addf %88, %90 : vector<16x32xf32>
    %92 = arith.addf %58, %91 : vector<16x32xf32>
    %cst_75 = arith.constant 0.000000e+00 : f32
    %93 = vector.broadcast %cst_75 : f32 to vector<16x32xf32>
    %94 = arith.maximumf %92, %93 : vector<16x32xf32>
    %cst_76 = arith.constant 0.000000e+00 : f32
    %95 = vector.broadcast %cst_76 : f32 to vector<3x32xf32>
    %96 = tpu.concatenate %95, %94, %95 in 0 : vector<3x32xf32>, vector<16x32xf32>, vector<3x32xf32> -> vector<22x32xf32>
    %97 = vector.extract_strided_slice %96 {offsets = [0, 0], sizes = [16, 32], strides = [1, 1]} : vector<22x32xf32> to vector<16x32xf32>
    %98 = arith.truncf %97 : vector<16x32xf32> to vector<16x32xbf16>
    %c0_77 = arith.constant 0 : index
    %c0_78 = arith.constant 0 : index
    %c0_79 = arith.constant 0 : index
    %99 = vector.load %arg39[%c0_77, %c0_78, %c0_79] : memref<3x32x32xbf16, #tpu.memory_space<vmem>>, vector<1x32x32xbf16>
    %100 = vector.shape_cast %99 : vector<1x32x32xbf16> to vector<32x32xbf16>
    %cst_80 = arith.constant dense<0.000000e+00> : vector<16x32xf32>
    %101 = tpu.matmul %98, %100, %cst_80 {dimension_numbers = #tpu.dot_dimension_numbers<[1], [0], [0], [1], [0, 0, 1, 1], [], []>} : vector<16x32xbf16>, vector<32x32xbf16>, vector<16x32xf32> -> vector<16x32xf32>
    %102 = vector.extract_strided_slice %96 {offsets = [3, 0], sizes = [16, 32], strides = [1, 1]} : vector<22x32xf32> to vector<16x32xf32>
    %103 = arith.truncf %102 : vector<16x32xf32> to vector<16x32xbf16>
    %c1_81 = arith.constant 1 : index
    %c0_82 = arith.constant 0 : index
    %c0_83 = arith.constant 0 : index
    %104 = vector.load %arg39[%c1_81, %c0_82, %c0_83] : memref<3x32x32xbf16, #tpu.memory_space<vmem>>, vector<1x32x32xbf16>
    %105 = vector.shape_cast %104 : vector<1x32x32xbf16> to vector<32x32xbf16>
    %cst_84 = arith.constant dense<0.000000e+00> : vector<16x32xf32>
    %106 = tpu.matmul %103, %105, %cst_84 {dimension_numbers = #tpu.dot_dimension_numbers<[1], [0], [0], [1], [0, 0, 1, 1], [], []>} : vector<16x32xbf16>, vector<32x32xbf16>, vector<16x32xf32> -> vector<16x32xf32>
    %107 = arith.addf %101, %106 : vector<16x32xf32>
    %108 = vector.extract_strided_slice %96 {offsets = [6, 0], sizes = [16, 32], strides = [1, 1]} : vector<22x32xf32> to vector<16x32xf32>
    %109 = arith.truncf %108 : vector<16x32xf32> to vector<16x32xbf16>
    %c2_85 = arith.constant 2 : index
    %c0_86 = arith.constant 0 : index
    %c0_87 = arith.constant 0 : index
    %110 = vector.load %arg39[%c2_85, %c0_86, %c0_87] : memref<3x32x32xbf16, #tpu.memory_space<vmem>>, vector<1x32x32xbf16>
    %111 = vector.shape_cast %110 : vector<1x32x32xbf16> to vector<32x32xbf16>
    %cst_88 = arith.constant dense<0.000000e+00> : vector<16x32xf32>
    %112 = tpu.matmul %109, %111, %cst_88 {dimension_numbers = #tpu.dot_dimension_numbers<[1], [0], [0], [1], [0, 0, 1, 1], [], []>} : vector<16x32xbf16>, vector<32x32xbf16>, vector<16x32xf32> -> vector<16x32xf32>
    %113 = arith.addf %107, %112 : vector<16x32xf32>
    %c0_89 = arith.constant 0 : index
    %c0_90 = arith.constant 0 : index
    %114 = vector.load %arg37[%c0_89, %c0_90] : memref<1x32xf32, #tpu.memory_space<vmem>>, vector<1x32xf32>
    %115 = vector.broadcast %114 : vector<1x32xf32> to vector<16x32xf32>
    %116 = arith.addf %113, %115 : vector<16x32xf32>
    %cst_91 = arith.constant 0.000000e+00 : f32
    %117 = vector.broadcast %cst_91 : f32 to vector<16x32xf32>
    %118 = arith.maximumf %116, %117 : vector<16x32xf32>
    %119 = arith.truncf %118 : vector<16x32xf32> to vector<16x32xbf16>
    %c0_92 = arith.constant 0 : index
    %c0_93 = arith.constant 0 : index
    %c0_94 = arith.constant 0 : index
    %120 = vector.load %arg40[%c0_92, %c0_93, %c0_94] : memref<1x32x32xbf16, #tpu.memory_space<vmem>>, vector<1x32x32xbf16>
    %121 = vector.shape_cast %120 : vector<1x32x32xbf16> to vector<32x32xbf16>
    %cst_95 = arith.constant dense<0.000000e+00> : vector<16x32xf32>
    %122 = tpu.matmul %119, %121, %cst_95 {dimension_numbers = #tpu.dot_dimension_numbers<[1], [0], [0], [1], [0, 0, 1, 1], [], []>} : vector<16x32xbf16>, vector<32x32xbf16>, vector<16x32xf32> -> vector<16x32xf32>
    %c0_96 = arith.constant 0 : index
    %c0_97 = arith.constant 0 : index
    %123 = vector.load %arg38[%c0_96, %c0_97] : memref<1x32xf32, #tpu.memory_space<vmem>>, vector<1x32xf32>
    %124 = vector.broadcast %123 : vector<1x32xf32> to vector<16x32xf32>
    %125 = arith.addf %122, %124 : vector<16x32xf32>
    %126 = arith.addf %92, %125 : vector<16x32xf32>
    %cst_98 = arith.constant 0.000000e+00 : f32
    %127 = vector.broadcast %cst_98 : f32 to vector<1x32xf32>
    %c0_99 = arith.constant 0 : index
    %c0_100 = arith.constant 0 : index
    %128 = vector.load %arg58[%c0_99, %c0_100] : memref<40x32xf32, #tpu.memory_space<vmem>>, vector<1x32xf32>
    tpu.vector_store %arg58[%c0_99, %c0_100], %127 {strides = array<i32>} : memref<40x32xf32, #tpu.memory_space<vmem>>, vector<1x32xf32>,
    %c1_101 = arith.constant 1 : index
    %c0_102 = arith.constant 0 : index
    %129 = vector.load %arg58[%c1_101, %c0_102] : memref<40x32xf32, #tpu.memory_space<vmem>>, vector<16x32xf32>
    tpu.vector_store %arg58[%c1_101, %c0_102], %126 {strides = array<i32>} : memref<40x32xf32, #tpu.memory_space<vmem>>, vector<16x32xf32>,
    %c17 = arith.constant 17 : index
    %c0_103 = arith.constant 0 : index
    %130 = vector.load %arg58[%c17, %c0_103] : memref<40x32xf32, #tpu.memory_space<vmem>>, vector<1x32xf32>
    tpu.vector_store %arg58[%c17, %c0_103], %127 {strides = array<i32>} : memref<40x32xf32, #tpu.memory_space<vmem>>, vector<1x32xf32>,
    %c0_104 = arith.constant 0 : index
    %c0_105 = arith.constant 0 : index
    %131 = tpu.strided_load %arg58[%c0_104, %c0_105] {strides = array<i32: 2, 1>} : memref<40x32xf32, #tpu.memory_space<vmem>>, vector<8x32xf32>
    %132 = arith.truncf %131 : vector<8x32xf32> to vector<8x32xbf16>
    %c0_106 = arith.constant 0 : index
    %c0_107 = arith.constant 0 : index
    %c0_108 = arith.constant 0 : index
    %133 = vector.load %arg42[%c0_106, %c0_107, %c0_108] : memref<4x32x32xbf16, #tpu.memory_space<vmem>>, vector<1x32x32xbf16>
    %134 = vector.shape_cast %133 : vector<1x32x32xbf16> to vector<32x32xbf16>
    %cst_109 = arith.constant dense<0.000000e+00> : vector<8x32xf32>
    %135 = tpu.matmul %132, %134, %cst_109 {dimension_numbers = #tpu.dot_dimension_numbers<[1], [0], [0], [1], [0, 0, 1, 1], [], []>} : vector<8x32xbf16>, vector<32x32xbf16>, vector<8x32xf32> -> vector<8x32xf32>
    %c1_110 = arith.constant 1 : index
    %c0_111 = arith.constant 0 : index
    %136 = tpu.strided_load %arg58[%c1_110, %c0_111] {strides = array<i32: 2, 1>} : memref<40x32xf32, #tpu.memory_space<vmem>>, vector<8x32xf32>
    %137 = arith.truncf %136 : vector<8x32xf32> to vector<8x32xbf16>
    %c1_112 = arith.constant 1 : index
    %c0_113 = arith.constant 0 : index
    %c0_114 = arith.constant 0 : index
    %138 = vector.load %arg42[%c1_112, %c0_113, %c0_114] : memref<4x32x32xbf16, #tpu.memory_space<vmem>>, vector<1x32x32xbf16>
    %139 = vector.shape_cast %138 : vector<1x32x32xbf16> to vector<32x32xbf16>
    %cst_115 = arith.constant dense<0.000000e+00> : vector<8x32xf32>
    %140 = tpu.matmul %137, %139, %cst_115 {dimension_numbers = #tpu.dot_dimension_numbers<[1], [0], [0], [1], [0, 0, 1, 1], [], []>} : vector<8x32xbf16>, vector<32x32xbf16>, vector<8x32xf32> -> vector<8x32xf32>
    %141 = arith.addf %135, %140 : vector<8x32xf32>
    %c2_116 = arith.constant 2 : index
    %c0_117 = arith.constant 0 : index
    %142 = tpu.strided_load %arg58[%c2_116, %c0_117] {strides = array<i32: 2, 1>} : memref<40x32xf32, #tpu.memory_space<vmem>>, vector<8x32xf32>
    %143 = arith.truncf %142 : vector<8x32xf32> to vector<8x32xbf16>
    %c2_118 = arith.constant 2 : index
    %c0_119 = arith.constant 0 : index
    %c0_120 = arith.constant 0 : index
    %144 = vector.load %arg42[%c2_118, %c0_119, %c0_120] : memref<4x32x32xbf16, #tpu.memory_space<vmem>>, vector<1x32x32xbf16>
    %145 = vector.shape_cast %144 : vector<1x32x32xbf16> to vector<32x32xbf16>
    %cst_121 = arith.constant dense<0.000000e+00> : vector<8x32xf32>
    %146 = tpu.matmul %143, %145, %cst_121 {dimension_numbers = #tpu.dot_dimension_numbers<[1], [0], [0], [1], [0, 0, 1, 1], [], []>} : vector<8x32xbf16>, vector<32x32xbf16>, vector<8x32xf32> -> vector<8x32xf32>
    %147 = arith.addf %141, %146 : vector<8x32xf32>
    %c3_122 = arith.constant 3 : index
    %c0_123 = arith.constant 0 : index
    %148 = tpu.strided_load %arg58[%c3_122, %c0_123] {strides = array<i32: 2, 1>} : memref<40x32xf32, #tpu.memory_space<vmem>>, vector<8x32xf32>
    %149 = arith.truncf %148 : vector<8x32xf32> to vector<8x32xbf16>
    %c3_124 = arith.constant 3 : index
    %c0_125 = arith.constant 0 : index
    %c0_126 = arith.constant 0 : index
    %150 = vector.load %arg42[%c3_124, %c0_125, %c0_126] : memref<4x32x32xbf16, #tpu.memory_space<vmem>>, vector<1x32x32xbf16>
    %151 = vector.shape_cast %150 : vector<1x32x32xbf16> to vector<32x32xbf16>
    %cst_127 = arith.constant dense<0.000000e+00> : vector<8x32xf32>
    %152 = tpu.matmul %149, %151, %cst_127 {dimension_numbers = #tpu.dot_dimension_numbers<[1], [0], [0], [1], [0, 0, 1, 1], [], []>} : vector<8x32xbf16>, vector<32x32xbf16>, vector<8x32xf32> -> vector<8x32xf32>
    %153 = arith.addf %147, %152 : vector<8x32xf32>
    %c0_128 = arith.constant 0 : index
    %c0_129 = arith.constant 0 : index
    %154 = vector.load %arg41[%c0_128, %c0_129] : memref<1x32xf32, #tpu.memory_space<vmem>>, vector<1x32xf32>
    %155 = vector.broadcast %154 : vector<1x32xf32> to vector<8x32xf32>
    %156 = arith.addf %153, %155 : vector<8x32xf32>
    %cst_130 = arith.constant 0.000000e+00 : f32
    %157 = vector.broadcast %cst_130 : f32 to vector<8x32xf32>
    %158 = arith.maximumf %156, %157 : vector<8x32xf32>
    %cst_131 = arith.constant 0.000000e+00 : f32
    %159 = vector.broadcast %cst_131 : f32 to vector<1x32xf32>
    %160 = tpu.concatenate %159, %158, %159 in 0 : vector<1x32xf32>, vector<8x32xf32>, vector<1x32xf32> -> vector<10x32xf32>
    %161 = vector.extract_strided_slice %160 {offsets = [0, 0], sizes = [8, 32], strides = [1, 1]} : vector<10x32xf32> to vector<8x32xf32>
    %162 = arith.truncf %161 : vector<8x32xf32> to vector<8x32xbf16>
    %c0_132 = arith.constant 0 : index
    %c0_133 = arith.constant 0 : index
    %c0_134 = arith.constant 0 : index
    %163 = vector.load %arg45[%c0_132, %c0_133, %c0_134] : memref<3x32x32xbf16, #tpu.memory_space<vmem>>, vector<1x32x32xbf16>
    %164 = vector.shape_cast %163 : vector<1x32x32xbf16> to vector<32x32xbf16>
    %cst_135 = arith.constant dense<0.000000e+00> : vector<8x32xf32>
    %165 = tpu.matmul %162, %164, %cst_135 {dimension_numbers = #tpu.dot_dimension_numbers<[1], [0], [0], [1], [0, 0, 1, 1], [], []>} : vector<8x32xbf16>, vector<32x32xbf16>, vector<8x32xf32> -> vector<8x32xf32>
    %166 = vector.extract_strided_slice %160 {offsets = [1, 0], sizes = [8, 32], strides = [1, 1]} : vector<10x32xf32> to vector<8x32xf32>
    %167 = arith.truncf %166 : vector<8x32xf32> to vector<8x32xbf16>
    %c1_136 = arith.constant 1 : index
    %c0_137 = arith.constant 0 : index
    %c0_138 = arith.constant 0 : index
    %168 = vector.load %arg45[%c1_136, %c0_137, %c0_138] : memref<3x32x32xbf16, #tpu.memory_space<vmem>>, vector<1x32x32xbf16>
    %169 = vector.shape_cast %168 : vector<1x32x32xbf16> to vector<32x32xbf16>
    %cst_139 = arith.constant dense<0.000000e+00> : vector<8x32xf32>
    %170 = tpu.matmul %167, %169, %cst_139 {dimension_numbers = #tpu.dot_dimension_numbers<[1], [0], [0], [1], [0, 0, 1, 1], [], []>} : vector<8x32xbf16>, vector<32x32xbf16>, vector<8x32xf32> -> vector<8x32xf32>
    %171 = arith.addf %165, %170 : vector<8x32xf32>
    %172 = vector.extract_strided_slice %160 {offsets = [2, 0], sizes = [8, 32], strides = [1, 1]} : vector<10x32xf32> to vector<8x32xf32>
    %173 = arith.truncf %172 : vector<8x32xf32> to vector<8x32xbf16>
    %c2_140 = arith.constant 2 : index
    %c0_141 = arith.constant 0 : index
    %c0_142 = arith.constant 0 : index
    %174 = vector.load %arg45[%c2_140, %c0_141, %c0_142] : memref<3x32x32xbf16, #tpu.memory_space<vmem>>, vector<1x32x32xbf16>
    %175 = vector.shape_cast %174 : vector<1x32x32xbf16> to vector<32x32xbf16>
    %cst_143 = arith.constant dense<0.000000e+00> : vector<8x32xf32>
    %176 = tpu.matmul %173, %175, %cst_143 {dimension_numbers = #tpu.dot_dimension_numbers<[1], [0], [0], [1], [0, 0, 1, 1], [], []>} : vector<8x32xbf16>, vector<32x32xbf16>, vector<8x32xf32> -> vector<8x32xf32>
    %177 = arith.addf %171, %176 : vector<8x32xf32>
    %c0_144 = arith.constant 0 : index
    %c0_145 = arith.constant 0 : index
    %178 = vector.load %arg43[%c0_144, %c0_145] : memref<1x32xf32, #tpu.memory_space<vmem>>, vector<1x32xf32>
    %179 = vector.broadcast %178 : vector<1x32xf32> to vector<8x32xf32>
    %180 = arith.addf %177, %179 : vector<8x32xf32>
    %cst_146 = arith.constant 0.000000e+00 : f32
    %181 = vector.broadcast %cst_146 : f32 to vector<8x32xf32>
    %182 = arith.maximumf %180, %181 : vector<8x32xf32>
    %183 = arith.truncf %182 : vector<8x32xf32> to vector<8x32xbf16>
    %c0_147 = arith.constant 0 : index
    %c0_148 = arith.constant 0 : index
    %c0_149 = arith.constant 0 : index
    %184 = vector.load %arg46[%c0_147, %c0_148, %c0_149] : memref<1x32x32xbf16, #tpu.memory_space<vmem>>, vector<1x32x32xbf16>
    %185 = vector.shape_cast %184 : vector<1x32x32xbf16> to vector<32x32xbf16>
    %cst_150 = arith.constant dense<0.000000e+00> : vector<8x32xf32>
    %186 = tpu.matmul %183, %185, %cst_150 {dimension_numbers = #tpu.dot_dimension_numbers<[1], [0], [0], [1], [0, 0, 1, 1], [], []>} : vector<8x32xbf16>, vector<32x32xbf16>, vector<8x32xf32> -> vector<8x32xf32>
    %c0_151 = arith.constant 0 : index
    %c0_152 = arith.constant 0 : index
    %187 = vector.load %arg44[%c0_151, %c0_152] : memref<1x32xf32, #tpu.memory_space<vmem>>, vector<1x32xf32>
    %188 = vector.broadcast %187 : vector<1x32xf32> to vector<8x32xf32>
    %189 = arith.addf %186, %188 : vector<8x32xf32>
    %190 = arith.addf %156, %189 : vector<8x32xf32>
    %cst_153 = arith.constant 0.000000e+00 : f32
    %191 = vector.broadcast %cst_153 : f32 to vector<8x32xf32>
    %192 = arith.maximumf %190, %191 : vector<8x32xf32>
    %cst_154 = arith.constant 0.000000e+00 : f32
    %193 = vector.broadcast %cst_154 : f32 to vector<3x32xf32>
    %194 = tpu.concatenate %193, %192, %193 in 0 : vector<3x32xf32>, vector<8x32xf32>, vector<3x32xf32> -> vector<14x32xf32>
    %195 = vector.extract_strided_slice %194 {offsets = [0, 0], sizes = [8, 32], strides = [1, 1]} : vector<14x32xf32> to vector<8x32xf32>
    %196 = arith.truncf %195 : vector<8x32xf32> to vector<8x32xbf16>
    %c0_155 = arith.constant 0 : index
    %c0_156 = arith.constant 0 : index
    %c0_157 = arith.constant 0 : index
    %197 = vector.load %arg49[%c0_155, %c0_156, %c0_157] : memref<3x32x32xbf16, #tpu.memory_space<vmem>>, vector<1x32x32xbf16>
    %198 = vector.shape_cast %197 : vector<1x32x32xbf16> to vector<32x32xbf16>
    %cst_158 = arith.constant dense<0.000000e+00> : vector<8x32xf32>
    %199 = tpu.matmul %196, %198, %cst_158 {dimension_numbers = #tpu.dot_dimension_numbers<[1], [0], [0], [1], [0, 0, 1, 1], [], []>} : vector<8x32xbf16>, vector<32x32xbf16>, vector<8x32xf32> -> vector<8x32xf32>
    %200 = vector.extract_strided_slice %194 {offsets = [3, 0], sizes = [8, 32], strides = [1, 1]} : vector<14x32xf32> to vector<8x32xf32>
    %201 = arith.truncf %200 : vector<8x32xf32> to vector<8x32xbf16>
    %c1_159 = arith.constant 1 : index
    %c0_160 = arith.constant 0 : index
    %c0_161 = arith.constant 0 : index
    %202 = vector.load %arg49[%c1_159, %c0_160, %c0_161] : memref<3x32x32xbf16, #tpu.memory_space<vmem>>, vector<1x32x32xbf16>
    %203 = vector.shape_cast %202 : vector<1x32x32xbf16> to vector<32x32xbf16>
    %cst_162 = arith.constant dense<0.000000e+00> : vector<8x32xf32>
    %204 = tpu.matmul %201, %203, %cst_162 {dimension_numbers = #tpu.dot_dimension_numbers<[1], [0], [0], [1], [0, 0, 1, 1], [], []>} : vector<8x32xbf16>, vector<32x32xbf16>, vector<8x32xf32> -> vector<8x32xf32>
    %205 = arith.addf %199, %204 : vector<8x32xf32>
    %206 = vector.extract_strided_slice %194 {offsets = [6, 0], sizes = [8, 32], strides = [1, 1]} : vector<14x32xf32> to vector<8x32xf32>
    %207 = arith.truncf %206 : vector<8x32xf32> to vector<8x32xbf16>
    %c2_163 = arith.constant 2 : index
    %c0_164 = arith.constant 0 : index
    %c0_165 = arith.constant 0 : index
    %208 = vector.load %arg49[%c2_163, %c0_164, %c0_165] : memref<3x32x32xbf16, #tpu.memory_space<vmem>>, vector<1x32x32xbf16>
    %209 = vector.shape_cast %208 : vector<1x32x32xbf16> to vector<32x32xbf16>
    %cst_166 = arith.constant dense<0.000000e+00> : vector<8x32xf32>
    %210 = tpu.matmul %207, %209, %cst_166 {dimension_numbers = #tpu.dot_dimension_numbers<[1], [0], [0], [1], [0, 0, 1, 1], [], []>} : vector<8x32xbf16>, vector<32x32xbf16>, vector<8x32xf32> -> vector<8x32xf32>
    %211 = arith.addf %205, %210 : vector<8x32xf32>
    %c0_167 = arith.constant 0 : index
    %c0_168 = arith.constant 0 : index
    %212 = vector.load %arg47[%c0_167, %c0_168] : memref<1x32xf32, #tpu.memory_space<vmem>>, vector<1x32xf32>
    %213 = vector.broadcast %212 : vector<1x32xf32> to vector<8x32xf32>
    %214 = arith.addf %211, %213 : vector<8x32xf32>
    %cst_169 = arith.constant 0.000000e+00 : f32
    %215 = vector.broadcast %cst_169 : f32 to vector<8x32xf32>
    %216 = arith.maximumf %214, %215 : vector<8x32xf32>
    %217 = arith.truncf %216 : vector<8x32xf32> to vector<8x32xbf16>
    %c0_170 = arith.constant 0 : index
    %c0_171 = arith.constant 0 : index
    %c0_172 = arith.constant 0 : index
    %218 = vector.load %arg50[%c0_170, %c0_171, %c0_172] : memref<1x32x32xbf16, #tpu.memory_space<vmem>>, vector<1x32x32xbf16>
    %219 = vector.shape_cast %218 : vector<1x32x32xbf16> to vector<32x32xbf16>
    %cst_173 = arith.constant dense<0.000000e+00> : vector<8x32xf32>
    %220 = tpu.matmul %217, %219, %cst_173 {dimension_numbers = #tpu.dot_dimension_numbers<[1], [0], [0], [1], [0, 0, 1, 1], [], []>} : vector<8x32xbf16>, vector<32x32xbf16>, vector<8x32xf32> -> vector<8x32xf32>
    %c0_174 = arith.constant 0 : index
    %c0_175 = arith.constant 0 : index
    %221 = vector.load %arg48[%c0_174, %c0_175] : memref<1x32xf32, #tpu.memory_space<vmem>>, vector<1x32xf32>
    %222 = vector.broadcast %221 : vector<1x32xf32> to vector<8x32xf32>
    %223 = arith.addf %220, %222 : vector<8x32xf32>
    %224 = arith.addf %190, %223 : vector<8x32xf32>
    %cst_176 = arith.constant 0.000000e+00 : f32
    %225 = vector.broadcast %cst_176 : f32 to vector<1x32xf32>
    %226 = tpu.concatenate %225, %224, %225 in 0 : vector<1x32xf32>, vector<8x32xf32>, vector<1x32xf32> -> vector<10x32xf32>
    %227 = vector.extract_strided_slice %226 {offsets = [0, 0], sizes = [8, 32], strides = [1, 1]} : vector<10x32xf32> to vector<8x32xf32>
    %228 = arith.truncf %227 : vector<8x32xf32> to vector<8x32xbf16>
    %c0_177 = arith.constant 0 : index
    %c0_178 = arith.constant 0 : index
    %c0_179 = arith.constant 0 : index
    %229 = vector.load %arg54[%c0_177, %c0_178, %c0_179] : memref<3x32x32xbf16, #tpu.memory_space<vmem>>, vector<1x32x32xbf16>
    %230 = vector.shape_cast %229 : vector<1x32x32xbf16> to vector<32x32xbf16>
    %cst_180 = arith.constant dense<0.000000e+00> : vector<8x32xf32>
    %231 = tpu.matmul %228, %230, %cst_180 {dimension_numbers = #tpu.dot_dimension_numbers<[1], [0], [0], [1], [0, 0, 1, 1], [], []>} : vector<8x32xbf16>, vector<32x32xbf16>, vector<8x32xf32> -> vector<8x32xf32>
    %232 = vector.extract_strided_slice %226 {offsets = [1, 0], sizes = [8, 32], strides = [1, 1]} : vector<10x32xf32> to vector<8x32xf32>
    %233 = arith.truncf %232 : vector<8x32xf32> to vector<8x32xbf16>
    %c1_181 = arith.constant 1 : index
    %c0_182 = arith.constant 0 : index
    %c0_183 = arith.constant 0 : index
    %234 = vector.load %arg54[%c1_181, %c0_182, %c0_183] : memref<3x32x32xbf16, #tpu.memory_space<vmem>>, vector<1x32x32xbf16>
    %235 = vector.shape_cast %234 : vector<1x32x32xbf16> to vector<32x32xbf16>
    %cst_184 = arith.constant dense<0.000000e+00> : vector<8x32xf32>
    %236 = tpu.matmul %233, %235, %cst_184 {dimension_numbers = #tpu.dot_dimension_numbers<[1], [0], [0], [1], [0, 0, 1, 1], [], []>} : vector<8x32xbf16>, vector<32x32xbf16>, vector<8x32xf32> -> vector<8x32xf32>
    %237 = arith.addf %231, %236 : vector<8x32xf32>
    %238 = vector.extract_strided_slice %226 {offsets = [2, 0], sizes = [8, 32], strides = [1, 1]} : vector<10x32xf32> to vector<8x32xf32>
    %239 = arith.truncf %238 : vector<8x32xf32> to vector<8x32xbf16>
    %c2_185 = arith.constant 2 : index
    %c0_186 = arith.constant 0 : index
    %c0_187 = arith.constant 0 : index
    %240 = vector.load %arg54[%c2_185, %c0_186, %c0_187] : memref<3x32x32xbf16, #tpu.memory_space<vmem>>, vector<1x32x32xbf16>
    %241 = vector.shape_cast %240 : vector<1x32x32xbf16> to vector<32x32xbf16>
    %cst_188 = arith.constant dense<0.000000e+00> : vector<8x32xf32>
    %242 = tpu.matmul %239, %241, %cst_188 {dimension_numbers = #tpu.dot_dimension_numbers<[1], [0], [0], [1], [0, 0, 1, 1], [], []>} : vector<8x32xbf16>, vector<32x32xbf16>, vector<8x32xf32> -> vector<8x32xf32>
    %243 = arith.addf %237, %242 : vector<8x32xf32>
    %c0_189 = arith.constant 0 : index
    %c0_190 = arith.constant 0 : index
    %244 = vector.load %arg53[%c0_189, %c0_190] : memref<1x32xf32, #tpu.memory_space<vmem>>, vector<1x32xf32>
    %245 = vector.broadcast %244 : vector<1x32xf32> to vector<8x32xf32>
    %246 = arith.addf %243, %245 : vector<8x32xf32>
    %247 = arith.mulf %246, %246 : vector<8x32xf32>
    %cst_191 = arith.constant dense<0.000000e+00> : vector<8xf32>
    %248 = vector.multi_reduction <add>, %247, %cst_191 [1] : vector<8x32xf32> to vector<8xf32>
    %249 = vector.shape_cast %248 : vector<8xf32> to vector<8x1xf32>
    %250 = arith.truncf %246 : vector<8x32xf32> to vector<8x32xbf16>
    %cst_192 = arith.constant dense<0.000000e+00> : vector<8x64xf32>
    %251 = tpu.matmul %250, %1, %cst_192 {dimension_numbers = #tpu.dot_dimension_numbers<[1], [0], [0], [1], [0, 0, 1, 1], [], []>} : vector<8x32xbf16>, vector<32x64xbf16>, vector<8x64xf32> -> vector<8x64xf32>
    %252 = vector.broadcast %249 : vector<8x1xf32> to vector<8x64xf32>
    %253 = vector.broadcast %2 : vector<1x64xf32> to vector<8x64xf32>
    %254 = arith.addf %252, %253 : vector<8x64xf32>
    %cst_193 = arith.constant 2.000000e+00 : f32
    %255 = vector.broadcast %cst_193 : f32 to vector<8x64xf32>
    %256 = arith.mulf %255, %251 : vector<8x64xf32>
    %257 = arith.subf %254, %256 : vector<8x64xf32>
    %258 = tpu.reduce_index %257 {axis = 1 : i32, kind = #tpu.reduction_kind<arg_min>} : vector<8x64xf32> -> vector<8xi32>
    %259 = tpu.iota {dimensions = array<i32: 1>} : vector<8x64xi32>
    %260 = vector.shape_cast %258 : vector<8xi32> to vector<8x1xi32>
    %261 = vector.broadcast %260 : vector<8x1xi32> to vector<8x64xi32>
    %262 = arith.cmpi eq, %259, %261 : vector<8x64xi32>
    %263 = arith.extui %262 : vector<8x64xi1> to vector<8x64xi32>
    %264 = arith.sitofp %263 : vector<8x64xi32> to vector<8x64xf32>
    %cst_194 = arith.constant dense<0.000000e+00> : vector<8x32xf32>
    %265 = tpu.matmul %264, %0, %cst_194 {dimension_numbers = #tpu.dot_dimension_numbers<[1], [0], [0], [1], [0, 0, 1, 1], [], []>} : vector<8x64xf32>, vector<64x32xf32>, vector<8x32xf32> -> vector<8x32xf32>
    %cst_195 = arith.constant dense<0.000000e+00> : vector<64xf32>
    %266 = vector.multi_reduction <add>, %264, %cst_195 [0] : vector<8x64xf32> to vector<64xf32>
    %267 = vector.shape_cast %266 : vector<64xf32> to vector<1x64xf32>
    %c0_196 = arith.constant 0 : index
    %c0_197 = arith.constant 0 : index
    %c0_198 = arith.constant 0 : index
    %268 = vector.load %arg56[%c0_196, %c0_197, %c0_198] : memref<1x1x64xf32, #tpu.memory_space<vmem>>, vector<1x1x64xf32>
    %269 = vector.shape_cast %268 : vector<1x1x64xf32> to vector<1x64xf32>
    %270 = vector.shape_cast %267 : vector<1x64xf32> to vector<1x1x64xf32>
    tpu.vector_store %arg56[%c0_196, %c0_197, %c0_198], %270 {strides = array<i32>} : memref<1x1x64xf32, #tpu.memory_space<vmem>>, vector<1x1x64xf32>,
    %271 = arith.subf %265, %246 : vector<8x32xf32>
    %272 = arith.subf %265, %246 : vector<8x32xf32>
    %273 = arith.mulf %271, %272 : vector<8x32xf32>
    %cst_199 = arith.constant dense<0.000000e+00> : vector<8xf32>
    %274 = vector.multi_reduction <add>, %273, %cst_199 [1] : vector<8x32xf32> to vector<8xf32>
    %275 = vector.shape_cast %274 : vector<8xf32> to vector<8x1xf32>
    %cst_200 = arith.constant dense<0.000000e+00> : vector<1xf32>
    %276 = vector.multi_reduction <add>, %275, %cst_200 [0] : vector<8x1xf32> to vector<1xf32>
    %277 = vector.shape_cast %276 : vector<1xf32> to vector<1x1xf32>
    %c0_201 = arith.constant 0 : index
    %c0_202 = arith.constant 0 : index
    %c0_203 = arith.constant 0 : index
    %278 = vector.load %arg57[%c0_201, %c0_202, %c0_203] : memref<1x1x1xf32, #tpu.memory_space<vmem>>, vector<1x1x1xf32>
    %279 = vector.shape_cast %278 : vector<1x1x1xf32> to vector<1x1xf32>
    %280 = vector.shape_cast %277 : vector<1x1xf32> to vector<1x1x1xf32>
    tpu.vector_store %arg57[%c0_201, %c0_202, %c0_203], %280 {strides = array<i32>} : memref<1x1x1xf32, #tpu.memory_space<vmem>>, vector<1x1x1xf32>,
    %cst_204 = arith.constant 0.000000e+00 : f32
    %281 = vector.broadcast %cst_204 : f32 to vector<1x32xf32>
    %282 = tpu.concatenate %281, %265, %281 in 0 : vector<1x32xf32>, vector<8x32xf32>, vector<1x32xf32> -> vector<10x32xf32>
    %283 = vector.extract_strided_slice %282 {offsets = [0, 0], sizes = [8, 32], strides = [1, 1]} : vector<10x32xf32> to vector<8x32xf32>
    %284 = arith.truncf %283 : vector<8x32xf32> to vector<8x32xbf16>
    %c0_205 = arith.constant 0 : index
    %c0_206 = arith.constant 0 : index
    %c0_207 = arith.constant 0 : index
    %285 = vector.load %arg6[%c0_205, %c0_206, %c0_207] : memref<3x32x32xbf16, #tpu.memory_space<vmem>>, vector<1x32x32xbf16>
    %286 = vector.shape_cast %285 : vector<1x32x32xbf16> to vector<32x32xbf16>
    %cst_208 = arith.constant dense<0.000000e+00> : vector<8x32xf32>
    %287 = tpu.matmul %284, %286, %cst_208 {dimension_numbers = #tpu.dot_dimension_numbers<[1], [0], [0], [1], [0, 0, 1, 1], [], []>} : vector<8x32xbf16>, vector<32x32xbf16>, vector<8x32xf32> -> vector<8x32xf32>
    %288 = vector.extract_strided_slice %282 {offsets = [1, 0], sizes = [8, 32], strides = [1, 1]} : vector<10x32xf32> to vector<8x32xf32>
    %289 = arith.truncf %288 : vector<8x32xf32> to vector<8x32xbf16>
    %c1_209 = arith.constant 1 : index
    %c0_210 = arith.constant 0 : index
    %c0_211 = arith.constant 0 : index
    %290 = vector.load %arg6[%c1_209, %c0_210, %c0_211] : memref<3x32x32xbf16, #tpu.memory_space<vmem>>, vector<1x32x32xbf16>
    %291 = vector.shape_cast %290 : vector<1x32x32xbf16> to vector<32x32xbf16>
    %cst_212 = arith.constant dense<0.000000e+00> : vector<8x32xf32>
    %292 = tpu.matmul %289, %291, %cst_212 {dimension_numbers = #tpu.dot_dimension_numbers<[1], [0], [0], [1], [0, 0, 1, 1], [], []>} : vector<8x32xbf16>, vector<32x32xbf16>, vector<8x32xf32> -> vector<8x32xf32>
    %293 = arith.addf %287, %292 : vector<8x32xf32>
    %294 = vector.extract_strided_slice %282 {offsets = [2, 0], sizes = [8, 32], strides = [1, 1]} : vector<10x32xf32> to vector<8x32xf32>
    %295 = arith.truncf %294 : vector<8x32xf32> to vector<8x32xbf16>
    %c2_213 = arith.constant 2 : index
    %c0_214 = arith.constant 0 : index
    %c0_215 = arith.constant 0 : index
    %296 = vector.load %arg6[%c2_213, %c0_214, %c0_215] : memref<3x32x32xbf16, #tpu.memory_space<vmem>>, vector<1x32x32xbf16>
    %297 = vector.shape_cast %296 : vector<1x32x32xbf16> to vector<32x32xbf16>
    %cst_216 = arith.constant dense<0.000000e+00> : vector<8x32xf32>
    %298 = tpu.matmul %295, %297, %cst_216 {dimension_numbers = #tpu.dot_dimension_numbers<[1], [0], [0], [1], [0, 0, 1, 1], [], []>} : vector<8x32xbf16>, vector<32x32xbf16>, vector<8x32xf32> -> vector<8x32xf32>
    %299 = arith.addf %293, %298 : vector<8x32xf32>
    %c0_217 = arith.constant 0 : index
    %c0_218 = arith.constant 0 : index
    %300 = vector.load %arg5[%c0_217, %c0_218] : memref<1x32xf32, #tpu.memory_space<vmem>>, vector<1x32xf32>
    %301 = vector.broadcast %300 : vector<1x32xf32> to vector<8x32xf32>
    %302 = arith.addf %299, %301 : vector<8x32xf32>
    %cst_219 = arith.constant 0.000000e+00 : f32
    %303 = vector.broadcast %cst_219 : f32 to vector<8x32xf32>
    %304 = arith.maximumf %302, %303 : vector<8x32xf32>
    %cst_220 = arith.constant 0.000000e+00 : f32
    %305 = vector.broadcast %cst_220 : f32 to vector<8x32xf32>
    %306 = arith.maximumf %304, %305 : vector<8x32xf32>
    %cst_221 = arith.constant 0.000000e+00 : f32
    %307 = vector.broadcast %cst_221 : f32 to vector<3x32xf32>
    %308 = tpu.concatenate %307, %306, %307 in 0 : vector<3x32xf32>, vector<8x32xf32>, vector<3x32xf32> -> vector<14x32xf32>
    %309 = vector.extract_strided_slice %308 {offsets = [0, 0], sizes = [8, 32], strides = [1, 1]} : vector<14x32xf32> to vector<8x32xf32>
    %310 = arith.truncf %309 : vector<8x32xf32> to vector<8x32xbf16>
    %c0_222 = arith.constant 0 : index
    %c0_223 = arith.constant 0 : index
    %c0_224 = arith.constant 0 : index
    %311 = vector.load %arg13[%c0_222, %c0_223, %c0_224] : memref<3x32x32xbf16, #tpu.memory_space<vmem>>, vector<1x32x32xbf16>
    %312 = vector.shape_cast %311 : vector<1x32x32xbf16> to vector<32x32xbf16>
    %cst_225 = arith.constant dense<0.000000e+00> : vector<8x32xf32>
    %313 = tpu.matmul %310, %312, %cst_225 {dimension_numbers = #tpu.dot_dimension_numbers<[1], [0], [0], [1], [0, 0, 1, 1], [], []>} : vector<8x32xbf16>, vector<32x32xbf16>, vector<8x32xf32> -> vector<8x32xf32>
    %314 = vector.extract_strided_slice %308 {offsets = [3, 0], sizes = [8, 32], strides = [1, 1]} : vector<14x32xf32> to vector<8x32xf32>
    %315 = arith.truncf %314 : vector<8x32xf32> to vector<8x32xbf16>
    %c1_226 = arith.constant 1 : index
    %c0_227 = arith.constant 0 : index
    %c0_228 = arith.constant 0 : index
    %316 = vector.load %arg13[%c1_226, %c0_227, %c0_228] : memref<3x32x32xbf16, #tpu.memory_space<vmem>>, vector<1x32x32xbf16>
    %317 = vector.shape_cast %316 : vector<1x32x32xbf16> to vector<32x32xbf16>
    %cst_229 = arith.constant dense<0.000000e+00> : vector<8x32xf32>
    %318 = tpu.matmul %315, %317, %cst_229 {dimension_numbers = #tpu.dot_dimension_numbers<[1], [0], [0], [1], [0, 0, 1, 1], [], []>} : vector<8x32xbf16>, vector<32x32xbf16>, vector<8x32xf32> -> vector<8x32xf32>
    %319 = arith.addf %313, %318 : vector<8x32xf32>
    %320 = vector.extract_strided_slice %308 {offsets = [6, 0], sizes = [8, 32], strides = [1, 1]} : vector<14x32xf32> to vector<8x32xf32>
    %321 = arith.truncf %320 : vector<8x32xf32> to vector<8x32xbf16>
    %c2_230 = arith.constant 2 : index
    %c0_231 = arith.constant 0 : index
    %c0_232 = arith.constant 0 : index
    %322 = vector.load %arg13[%c2_230, %c0_231, %c0_232] : memref<3x32x32xbf16, #tpu.memory_space<vmem>>, vector<1x32x32xbf16>
    %323 = vector.shape_cast %322 : vector<1x32x32xbf16> to vector<32x32xbf16>
    %cst_233 = arith.constant dense<0.000000e+00> : vector<8x32xf32>
    %324 = tpu.matmul %321, %323, %cst_233 {dimension_numbers = #tpu.dot_dimension_numbers<[1], [0], [0], [1], [0, 0, 1, 1], [], []>} : vector<8x32xbf16>, vector<32x32xbf16>, vector<8x32xf32> -> vector<8x32xf32>
    %325 = arith.addf %319, %324 : vector<8x32xf32>
    %c0_234 = arith.constant 0 : index
    %c0_235 = arith.constant 0 : index
    %326 = vector.load %arg11[%c0_234, %c0_235] : memref<1x32xf32, #tpu.memory_space<vmem>>, vector<1x32xf32>
    %327 = vector.broadcast %326 : vector<1x32xf32> to vector<8x32xf32>
    %328 = arith.addf %325, %327 : vector<8x32xf32>
    %cst_236 = arith.constant 0.000000e+00 : f32
    %329 = vector.broadcast %cst_236 : f32 to vector<8x32xf32>
    %330 = arith.maximumf %328, %329 : vector<8x32xf32>
    %331 = arith.truncf %330 : vector<8x32xf32> to vector<8x32xbf16>
    %c0_237 = arith.constant 0 : index
    %c0_238 = arith.constant 0 : index
    %c0_239 = arith.constant 0 : index
    %332 = vector.load %arg14[%c0_237, %c0_238, %c0_239] : memref<1x32x32xbf16, #tpu.memory_space<vmem>>, vector<1x32x32xbf16>
    %333 = vector.shape_cast %332 : vector<1x32x32xbf16> to vector<32x32xbf16>
    %cst_240 = arith.constant dense<0.000000e+00> : vector<8x32xf32>
    %334 = tpu.matmul %331, %333, %cst_240 {dimension_numbers = #tpu.dot_dimension_numbers<[1], [0], [0], [1], [0, 0, 1, 1], [], []>} : vector<8x32xbf16>, vector<32x32xbf16>, vector<8x32xf32> -> vector<8x32xf32>
    %c0_241 = arith.constant 0 : index
    %c0_242 = arith.constant 0 : index
    %335 = vector.load %arg12[%c0_241, %c0_242] : memref<1x32xf32, #tpu.memory_space<vmem>>, vector<1x32xf32>
    %336 = vector.broadcast %335 : vector<1x32xf32> to vector<8x32xf32>
    %337 = arith.addf %334, %336 : vector<8x32xf32>
    %338 = arith.addf %304, %337 : vector<8x32xf32>
    %cst_243 = arith.constant 0.000000e+00 : f32
    %339 = vector.broadcast %cst_243 : f32 to vector<8x32xf32>
    %340 = arith.maximumf %338, %339 : vector<8x32xf32>
    %cst_244 = arith.constant 0.000000e+00 : f32
    %341 = vector.broadcast %cst_244 : f32 to vector<1x32xf32>
    %342 = tpu.concatenate %341, %340, %341 in 0 : vector<1x32xf32>, vector<8x32xf32>, vector<1x32xf32> -> vector<10x32xf32>
    %343 = vector.extract_strided_slice %342 {offsets = [0, 0], sizes = [8, 32], strides = [1, 1]} : vector<10x32xf32> to vector<8x32xf32>
    %344 = arith.truncf %343 : vector<8x32xf32> to vector<8x32xbf16>
    %c0_245 = arith.constant 0 : index
    %c0_246 = arith.constant 0 : index
    %c0_247 = arith.constant 0 : index
    %345 = vector.load %arg17[%c0_245, %c0_246, %c0_247] : memref<3x32x32xbf16, #tpu.memory_space<vmem>>, vector<1x32x32xbf16>
    %346 = vector.shape_cast %345 : vector<1x32x32xbf16> to vector<32x32xbf16>
    %cst_248 = arith.constant dense<0.000000e+00> : vector<8x32xf32>
    %347 = tpu.matmul %344, %346, %cst_248 {dimension_numbers = #tpu.dot_dimension_numbers<[1], [0], [0], [1], [0, 0, 1, 1], [], []>} : vector<8x32xbf16>, vector<32x32xbf16>, vector<8x32xf32> -> vector<8x32xf32>
    %348 = vector.extract_strided_slice %342 {offsets = [1, 0], sizes = [8, 32], strides = [1, 1]} : vector<10x32xf32> to vector<8x32xf32>
    %349 = arith.truncf %348 : vector<8x32xf32> to vector<8x32xbf16>
    %c1_249 = arith.constant 1 : index
    %c0_250 = arith.constant 0 : index
    %c0_251 = arith.constant 0 : index
    %350 = vector.load %arg17[%c1_249, %c0_250, %c0_251] : memref<3x32x32xbf16, #tpu.memory_space<vmem>>, vector<1x32x32xbf16>
    %351 = vector.shape_cast %350 : vector<1x32x32xbf16> to vector<32x32xbf16>
    %cst_252 = arith.constant dense<0.000000e+00> : vector<8x32xf32>
    %352 = tpu.matmul %349, %351, %cst_252 {dimension_numbers = #tpu.dot_dimension_numbers<[1], [0], [0], [1], [0, 0, 1, 1], [], []>} : vector<8x32xbf16>, vector<32x32xbf16>, vector<8x32xf32> -> vector<8x32xf32>
    %353 = arith.addf %347, %352 : vector<8x32xf32>
    %354 = vector.extract_strided_slice %342 {offsets = [2, 0], sizes = [8, 32], strides = [1, 1]} : vector<10x32xf32> to vector<8x32xf32>
    %355 = arith.truncf %354 : vector<8x32xf32> to vector<8x32xbf16>
    %c2_253 = arith.constant 2 : index
    %c0_254 = arith.constant 0 : index
    %c0_255 = arith.constant 0 : index
    %356 = vector.load %arg17[%c2_253, %c0_254, %c0_255] : memref<3x32x32xbf16, #tpu.memory_space<vmem>>, vector<1x32x32xbf16>
    %357 = vector.shape_cast %356 : vector<1x32x32xbf16> to vector<32x32xbf16>
    %cst_256 = arith.constant dense<0.000000e+00> : vector<8x32xf32>
    %358 = tpu.matmul %355, %357, %cst_256 {dimension_numbers = #tpu.dot_dimension_numbers<[1], [0], [0], [1], [0, 0, 1, 1], [], []>} : vector<8x32xbf16>, vector<32x32xbf16>, vector<8x32xf32> -> vector<8x32xf32>
    %359 = arith.addf %353, %358 : vector<8x32xf32>
    %c0_257 = arith.constant 0 : index
    %c0_258 = arith.constant 0 : index
    %360 = vector.load %arg15[%c0_257, %c0_258] : memref<1x32xf32, #tpu.memory_space<vmem>>, vector<1x32xf32>
    %361 = vector.broadcast %360 : vector<1x32xf32> to vector<8x32xf32>
    %362 = arith.addf %359, %361 : vector<8x32xf32>
    %cst_259 = arith.constant 0.000000e+00 : f32
    %363 = vector.broadcast %cst_259 : f32 to vector<8x32xf32>
    %364 = arith.maximumf %362, %363 : vector<8x32xf32>
    %365 = arith.truncf %364 : vector<8x32xf32> to vector<8x32xbf16>
    %c0_260 = arith.constant 0 : index
    %c0_261 = arith.constant 0 : index
    %c0_262 = arith.constant 0 : index
    %366 = vector.load %arg18[%c0_260, %c0_261, %c0_262] : memref<1x32x32xbf16, #tpu.memory_space<vmem>>, vector<1x32x32xbf16>
    %367 = vector.shape_cast %366 : vector<1x32x32xbf16> to vector<32x32xbf16>
    %cst_263 = arith.constant dense<0.000000e+00> : vector<8x32xf32>
    %368 = tpu.matmul %365, %367, %cst_263 {dimension_numbers = #tpu.dot_dimension_numbers<[1], [0], [0], [1], [0, 0, 1, 1], [], []>} : vector<8x32xbf16>, vector<32x32xbf16>, vector<8x32xf32> -> vector<8x32xf32>
    %c0_264 = arith.constant 0 : index
    %c0_265 = arith.constant 0 : index
    %369 = vector.load %arg16[%c0_264, %c0_265] : memref<1x32xf32, #tpu.memory_space<vmem>>, vector<1x32xf32>
    %370 = vector.broadcast %369 : vector<1x32xf32> to vector<8x32xf32>
    %371 = arith.addf %368, %370 : vector<8x32xf32>
    %372 = arith.addf %338, %371 : vector<8x32xf32>
    %c0_266 = arith.constant 0 : index
    %c0_267 = arith.constant 0 : index
    %373 = tpu.strided_load %arg58[%c0_266, %c0_267] {strides = array<i32: 2, 1>} : memref<40x32xf32, #tpu.memory_space<vmem>>, vector<8x32xf32>
    tpu.strided_store %arg58[%c0_266, %c0_267], %372 {strides = array<i32: 2, 1>} : memref<40x32xf32, #tpu.memory_space<vmem>>, vector<8x32xf32>
    %c1_268 = arith.constant 1 : index
    %c0_269 = arith.constant 0 : index
    %374 = tpu.strided_load %arg58[%c1_268, %c0_269] {strides = array<i32: 2, 1>} : memref<40x32xf32, #tpu.memory_space<vmem>>, vector<8x32xf32>
    tpu.strided_store %arg58[%c1_268, %c0_269], %372 {strides = array<i32: 2, 1>} : memref<40x32xf32, #tpu.memory_space<vmem>>, vector<8x32xf32>
    %c0_270 = arith.constant 0 : index
    %c0_271 = arith.constant 0 : index
    %375 = vector.load %arg58[%c0_270, %c0_271] : memref<40x32xf32, #tpu.memory_space<vmem>>, vector<16x32xf32>
    %cst_272 = arith.constant 0.000000e+00 : f32
    %376 = vector.broadcast %cst_272 : f32 to vector<1x32xf32>
    %377 = tpu.concatenate %376, %375, %376 in 0 : vector<1x32xf32>, vector<16x32xf32>, vector<1x32xf32> -> vector<18x32xf32>
    %378 = vector.extract_strided_slice %377 {offsets = [0, 0], sizes = [16, 32], strides = [1, 1]} : vector<18x32xf32> to vector<16x32xf32>
    %379 = arith.truncf %378 : vector<16x32xf32> to vector<16x32xbf16>
    %c0_273 = arith.constant 0 : index
    %c0_274 = arith.constant 0 : index
    %c0_275 = arith.constant 0 : index
    %380 = vector.load %arg20[%c0_273, %c0_274, %c0_275] : memref<3x32x32xbf16, #tpu.memory_space<vmem>>, vector<1x32x32xbf16>
    %381 = vector.shape_cast %380 : vector<1x32x32xbf16> to vector<32x32xbf16>
    %cst_276 = arith.constant dense<0.000000e+00> : vector<16x32xf32>
    %382 = tpu.matmul %379, %381, %cst_276 {dimension_numbers = #tpu.dot_dimension_numbers<[1], [0], [0], [1], [0, 0, 1, 1], [], []>} : vector<16x32xbf16>, vector<32x32xbf16>, vector<16x32xf32> -> vector<16x32xf32>
    %383 = vector.extract_strided_slice %377 {offsets = [1, 0], sizes = [16, 32], strides = [1, 1]} : vector<18x32xf32> to vector<16x32xf32>
    %384 = arith.truncf %383 : vector<16x32xf32> to vector<16x32xbf16>
    %c1_277 = arith.constant 1 : index
    %c0_278 = arith.constant 0 : index
    %c0_279 = arith.constant 0 : index
    %385 = vector.load %arg20[%c1_277, %c0_278, %c0_279] : memref<3x32x32xbf16, #tpu.memory_space<vmem>>, vector<1x32x32xbf16>
    %386 = vector.shape_cast %385 : vector<1x32x32xbf16> to vector<32x32xbf16>
    %cst_280 = arith.constant dense<0.000000e+00> : vector<16x32xf32>
    %387 = tpu.matmul %384, %386, %cst_280 {dimension_numbers = #tpu.dot_dimension_numbers<[1], [0], [0], [1], [0, 0, 1, 1], [], []>} : vector<16x32xbf16>, vector<32x32xbf16>, vector<16x32xf32> -> vector<16x32xf32>
    %388 = arith.addf %382, %387 : vector<16x32xf32>
    %389 = vector.extract_strided_slice %377 {offsets = [2, 0], sizes = [16, 32], strides = [1, 1]} : vector<18x32xf32> to vector<16x32xf32>
    %390 = arith.truncf %389 : vector<16x32xf32> to vector<16x32xbf16>
    %c2_281 = arith.constant 2 : index
    %c0_282 = arith.constant 0 : index
    %c0_283 = arith.constant 0 : index
    %391 = vector.load %arg20[%c2_281, %c0_282, %c0_283] : memref<3x32x32xbf16, #tpu.memory_space<vmem>>, vector<1x32x32xbf16>
    %392 = vector.shape_cast %391 : vector<1x32x32xbf16> to vector<32x32xbf16>
    %cst_284 = arith.constant dense<0.000000e+00> : vector<16x32xf32>
    %393 = tpu.matmul %390, %392, %cst_284 {dimension_numbers = #tpu.dot_dimension_numbers<[1], [0], [0], [1], [0, 0, 1, 1], [], []>} : vector<16x32xbf16>, vector<32x32xbf16>, vector<16x32xf32> -> vector<16x32xf32>
    %394 = arith.addf %388, %393 : vector<16x32xf32>
    %c0_285 = arith.constant 0 : index
    %c0_286 = arith.constant 0 : index
    %395 = vector.load %arg19[%c0_285, %c0_286] : memref<1x32xf32, #tpu.memory_space<vmem>>, vector<1x32xf32>
    %396 = vector.broadcast %395 : vector<1x32xf32> to vector<16x32xf32>
    %397 = arith.addf %394, %396 : vector<16x32xf32>
    %cst_287 = arith.constant 0.000000e+00 : f32
    %398 = vector.broadcast %cst_287 : f32 to vector<16x32xf32>
    %399 = arith.maximumf %397, %398 : vector<16x32xf32>
    %cst_288 = arith.constant 0.000000e+00 : f32
    %400 = vector.broadcast %cst_288 : f32 to vector<3x32xf32>
    %401 = tpu.concatenate %400, %399, %400 in 0 : vector<3x32xf32>, vector<16x32xf32>, vector<3x32xf32> -> vector<22x32xf32>
    %402 = vector.extract_strided_slice %401 {offsets = [0, 0], sizes = [16, 32], strides = [1, 1]} : vector<22x32xf32> to vector<16x32xf32>
    %403 = arith.truncf %402 : vector<16x32xf32> to vector<16x32xbf16>
    %c0_289 = arith.constant 0 : index
    %c0_290 = arith.constant 0 : index
    %c0_291 = arith.constant 0 : index
    %404 = vector.load %arg23[%c0_289, %c0_290, %c0_291] : memref<3x32x32xbf16, #tpu.memory_space<vmem>>, vector<1x32x32xbf16>
    %405 = vector.shape_cast %404 : vector<1x32x32xbf16> to vector<32x32xbf16>
    %cst_292 = arith.constant dense<0.000000e+00> : vector<16x32xf32>
    %406 = tpu.matmul %403, %405, %cst_292 {dimension_numbers = #tpu.dot_dimension_numbers<[1], [0], [0], [1], [0, 0, 1, 1], [], []>} : vector<16x32xbf16>, vector<32x32xbf16>, vector<16x32xf32> -> vector<16x32xf32>
    %407 = vector.extract_strided_slice %401 {offsets = [3, 0], sizes = [16, 32], strides = [1, 1]} : vector<22x32xf32> to vector<16x32xf32>
    %408 = arith.truncf %407 : vector<16x32xf32> to vector<16x32xbf16>
    %c1_293 = arith.constant 1 : index
    %c0_294 = arith.constant 0 : index
    %c0_295 = arith.constant 0 : index
    %409 = vector.load %arg23[%c1_293, %c0_294, %c0_295] : memref<3x32x32xbf16, #tpu.memory_space<vmem>>, vector<1x32x32xbf16>
    %410 = vector.shape_cast %409 : vector<1x32x32xbf16> to vector<32x32xbf16>
    %cst_296 = arith.constant dense<0.000000e+00> : vector<16x32xf32>
    %411 = tpu.matmul %408, %410, %cst_296 {dimension_numbers = #tpu.dot_dimension_numbers<[1], [0], [0], [1], [0, 0, 1, 1], [], []>} : vector<16x32xbf16>, vector<32x32xbf16>, vector<16x32xf32> -> vector<16x32xf32>
    %412 = arith.addf %406, %411 : vector<16x32xf32>
    %413 = vector.extract_strided_slice %401 {offsets = [6, 0], sizes = [16, 32], strides = [1, 1]} : vector<22x32xf32> to vector<16x32xf32>
    %414 = arith.truncf %413 : vector<16x32xf32> to vector<16x32xbf16>
    %c2_297 = arith.constant 2 : index
    %c0_298 = arith.constant 0 : index
    %c0_299 = arith.constant 0 : index
    %415 = vector.load %arg23[%c2_297, %c0_298, %c0_299] : memref<3x32x32xbf16, #tpu.memory_space<vmem>>, vector<1x32x32xbf16>
    %416 = vector.shape_cast %415 : vector<1x32x32xbf16> to vector<32x32xbf16>
    %cst_300 = arith.constant dense<0.000000e+00> : vector<16x32xf32>
    %417 = tpu.matmul %414, %416, %cst_300 {dimension_numbers = #tpu.dot_dimension_numbers<[1], [0], [0], [1], [0, 0, 1, 1], [], []>} : vector<16x32xbf16>, vector<32x32xbf16>, vector<16x32xf32> -> vector<16x32xf32>
    %418 = arith.addf %412, %417 : vector<16x32xf32>
    %c0_301 = arith.constant 0 : index
    %c0_302 = arith.constant 0 : index
    %419 = vector.load %arg21[%c0_301, %c0_302] : memref<1x32xf32, #tpu.memory_space<vmem>>, vector<1x32xf32>
    %420 = vector.broadcast %419 : vector<1x32xf32> to vector<16x32xf32>
    %421 = arith.addf %418, %420 : vector<16x32xf32>
    %cst_303 = arith.constant 0.000000e+00 : f32
    %422 = vector.broadcast %cst_303 : f32 to vector<16x32xf32>
    %423 = arith.maximumf %421, %422 : vector<16x32xf32>
    %424 = arith.truncf %423 : vector<16x32xf32> to vector<16x32xbf16>
    %c0_304 = arith.constant 0 : index
    %c0_305 = arith.constant 0 : index
    %c0_306 = arith.constant 0 : index
    %425 = vector.load %arg24[%c0_304, %c0_305, %c0_306] : memref<1x32x32xbf16, #tpu.memory_space<vmem>>, vector<1x32x32xbf16>
    %426 = vector.shape_cast %425 : vector<1x32x32xbf16> to vector<32x32xbf16>
    %cst_307 = arith.constant dense<0.000000e+00> : vector<16x32xf32>
    %427 = tpu.matmul %424, %426, %cst_307 {dimension_numbers = #tpu.dot_dimension_numbers<[1], [0], [0], [1], [0, 0, 1, 1], [], []>} : vector<16x32xbf16>, vector<32x32xbf16>, vector<16x32xf32> -> vector<16x32xf32>
    %c0_308 = arith.constant 0 : index
    %c0_309 = arith.constant 0 : index
    %428 = vector.load %arg22[%c0_308, %c0_309] : memref<1x32xf32, #tpu.memory_space<vmem>>, vector<1x32xf32>
    %429 = vector.broadcast %428 : vector<1x32xf32> to vector<16x32xf32>
    %430 = arith.addf %427, %429 : vector<16x32xf32>
    %431 = arith.addf %397, %430 : vector<16x32xf32>
    %cst_310 = arith.constant 0.000000e+00 : f32
    %432 = vector.broadcast %cst_310 : f32 to vector<16x32xf32>
    %433 = arith.maximumf %431, %432 : vector<16x32xf32>
    %cst_311 = arith.constant 0.000000e+00 : f32
    %434 = vector.broadcast %cst_311 : f32 to vector<1x32xf32>
    %435 = tpu.concatenate %434, %433, %434 in 0 : vector<1x32xf32>, vector<16x32xf32>, vector<1x32xf32> -> vector<18x32xf32>
    %436 = vector.extract_strided_slice %435 {offsets = [0, 0], sizes = [16, 32], strides = [1, 1]} : vector<18x32xf32> to vector<16x32xf32>
    %437 = arith.truncf %436 : vector<16x32xf32> to vector<16x32xbf16>
    %c0_312 = arith.constant 0 : index
    %c0_313 = arith.constant 0 : index
    %c0_314 = arith.constant 0 : index
    %438 = vector.load %arg27[%c0_312, %c0_313, %c0_314] : memref<3x32x32xbf16, #tpu.memory_space<vmem>>, vector<1x32x32xbf16>
    %439 = vector.shape_cast %438 : vector<1x32x32xbf16> to vector<32x32xbf16>
    %cst_315 = arith.constant dense<0.000000e+00> : vector<16x32xf32>
    %440 = tpu.matmul %437, %439, %cst_315 {dimension_numbers = #tpu.dot_dimension_numbers<[1], [0], [0], [1], [0, 0, 1, 1], [], []>} : vector<16x32xbf16>, vector<32x32xbf16>, vector<16x32xf32> -> vector<16x32xf32>
    %441 = vector.extract_strided_slice %435 {offsets = [1, 0], sizes = [16, 32], strides = [1, 1]} : vector<18x32xf32> to vector<16x32xf32>
    %442 = arith.truncf %441 : vector<16x32xf32> to vector<16x32xbf16>
    %c1_316 = arith.constant 1 : index
    %c0_317 = arith.constant 0 : index
    %c0_318 = arith.constant 0 : index
    %443 = vector.load %arg27[%c1_316, %c0_317, %c0_318] : memref<3x32x32xbf16, #tpu.memory_space<vmem>>, vector<1x32x32xbf16>
    %444 = vector.shape_cast %443 : vector<1x32x32xbf16> to vector<32x32xbf16>
    %cst_319 = arith.constant dense<0.000000e+00> : vector<16x32xf32>
    %445 = tpu.matmul %442, %444, %cst_319 {dimension_numbers = #tpu.dot_dimension_numbers<[1], [0], [0], [1], [0, 0, 1, 1], [], []>} : vector<16x32xbf16>, vector<32x32xbf16>, vector<16x32xf32> -> vector<16x32xf32>
    %446 = arith.addf %440, %445 : vector<16x32xf32>
    %447 = vector.extract_strided_slice %435 {offsets = [2, 0], sizes = [16, 32], strides = [1, 1]} : vector<18x32xf32> to vector<16x32xf32>
    %448 = arith.truncf %447 : vector<16x32xf32> to vector<16x32xbf16>
    %c2_320 = arith.constant 2 : index
    %c0_321 = arith.constant 0 : index
    %c0_322 = arith.constant 0 : index
    %449 = vector.load %arg27[%c2_320, %c0_321, %c0_322] : memref<3x32x32xbf16, #tpu.memory_space<vmem>>, vector<1x32x32xbf16>
    %450 = vector.shape_cast %449 : vector<1x32x32xbf16> to vector<32x32xbf16>
    %cst_323 = arith.constant dense<0.000000e+00> : vector<16x32xf32>
    %451 = tpu.matmul %448, %450, %cst_323 {dimension_numbers = #tpu.dot_dimension_numbers<[1], [0], [0], [1], [0, 0, 1, 1], [], []>} : vector<16x32xbf16>, vector<32x32xbf16>, vector<16x32xf32> -> vector<16x32xf32>
    %452 = arith.addf %446, %451 : vector<16x32xf32>
    %c0_324 = arith.constant 0 : index
    %c0_325 = arith.constant 0 : index
    %453 = vector.load %arg25[%c0_324, %c0_325] : memref<1x32xf32, #tpu.memory_space<vmem>>, vector<1x32xf32>
    %454 = vector.broadcast %453 : vector<1x32xf32> to vector<16x32xf32>
    %455 = arith.addf %452, %454 : vector<16x32xf32>
    %cst_326 = arith.constant 0.000000e+00 : f32
    %456 = vector.broadcast %cst_326 : f32 to vector<16x32xf32>
    %457 = arith.maximumf %455, %456 : vector<16x32xf32>
    %458 = arith.truncf %457 : vector<16x32xf32> to vector<16x32xbf16>
    %c0_327 = arith.constant 0 : index
    %c0_328 = arith.constant 0 : index
    %c0_329 = arith.constant 0 : index
    %459 = vector.load %arg28[%c0_327, %c0_328, %c0_329] : memref<1x32x32xbf16, #tpu.memory_space<vmem>>, vector<1x32x32xbf16>
    %460 = vector.shape_cast %459 : vector<1x32x32xbf16> to vector<32x32xbf16>
    %cst_330 = arith.constant dense<0.000000e+00> : vector<16x32xf32>
    %461 = tpu.matmul %458, %460, %cst_330 {dimension_numbers = #tpu.dot_dimension_numbers<[1], [0], [0], [1], [0, 0, 1, 1], [], []>} : vector<16x32xbf16>, vector<32x32xbf16>, vector<16x32xf32> -> vector<16x32xf32>
    %c0_331 = arith.constant 0 : index
    %c0_332 = arith.constant 0 : index
    %462 = vector.load %arg26[%c0_331, %c0_332] : memref<1x32xf32, #tpu.memory_space<vmem>>, vector<1x32xf32>
    %463 = vector.broadcast %462 : vector<1x32xf32> to vector<16x32xf32>
    %464 = arith.addf %461, %463 : vector<16x32xf32>
    %465 = arith.addf %431, %464 : vector<16x32xf32>
    %c0_333 = arith.constant 0 : index
    %c0_334 = arith.constant 0 : index
    %466 = tpu.strided_load %arg58[%c0_333, %c0_334] {strides = array<i32: 2, 1>} : memref<40x32xf32, #tpu.memory_space<vmem>>, vector<16x32xf32>
    tpu.strided_store %arg58[%c0_333, %c0_334], %465 {strides = array<i32: 2, 1>} : memref<40x32xf32, #tpu.memory_space<vmem>>, vector<16x32xf32>
    %c1_335 = arith.constant 1 : index
    %c0_336 = arith.constant 0 : index
    %467 = tpu.strided_load %arg58[%c1_335, %c0_336] {strides = array<i32: 2, 1>} : memref<40x32xf32, #tpu.memory_space<vmem>>, vector<16x32xf32>
    tpu.strided_store %arg58[%c1_335, %c0_336], %465 {strides = array<i32: 2, 1>} : memref<40x32xf32, #tpu.memory_space<vmem>>, vector<16x32xf32>
    %c0_337 = arith.constant 0 : index
    %c0_338 = arith.constant 0 : index
    %468 = vector.load %arg58[%c0_337, %c0_338] : memref<40x32xf32, #tpu.memory_space<vmem>>, vector<32x32xf32>
    %cst_339 = arith.constant 0.000000e+00 : f32
    %469 = vector.broadcast %cst_339 : f32 to vector<1x32xf32>
    %470 = tpu.concatenate %469, %468, %469 in 0 : vector<1x32xf32>, vector<32x32xf32>, vector<1x32xf32> -> vector<34x32xf32>
    %471 = vector.extract_strided_slice %470 {offsets = [0, 0], sizes = [32, 32], strides = [1, 1]} : vector<34x32xf32> to vector<32x32xf32>
    %472 = arith.truncf %471 : vector<32x32xf32> to vector<32x32xbf16>
    %c0_340 = arith.constant 0 : index
    %c0_341 = arith.constant 0 : index
    %c0_342 = arith.constant 0 : index
    %473 = vector.load %arg30[%c0_340, %c0_341, %c0_342] : memref<3x32x32xbf16, #tpu.memory_space<vmem>>, vector<1x32x32xbf16>
    %474 = vector.shape_cast %473 : vector<1x32x32xbf16> to vector<32x32xbf16>
    %cst_343 = arith.constant dense<0.000000e+00> : vector<32x32xf32>
    %475 = tpu.matmul %472, %474, %cst_343 {dimension_numbers = #tpu.dot_dimension_numbers<[1], [0], [0], [1], [0, 0, 1, 1], [], []>} : vector<32x32xbf16>, vector<32x32xbf16>, vector<32x32xf32> -> vector<32x32xf32>
    %476 = vector.extract_strided_slice %470 {offsets = [1, 0], sizes = [32, 32], strides = [1, 1]} : vector<34x32xf32> to vector<32x32xf32>
    %477 = arith.truncf %476 : vector<32x32xf32> to vector<32x32xbf16>
    %c1_344 = arith.constant 1 : index
    %c0_345 = arith.constant 0 : index
    %c0_346 = arith.constant 0 : index
    %478 = vector.load %arg30[%c1_344, %c0_345, %c0_346] : memref<3x32x32xbf16, #tpu.memory_space<vmem>>, vector<1x32x32xbf16>
    %479 = vector.shape_cast %478 : vector<1x32x32xbf16> to vector<32x32xbf16>
    %cst_347 = arith.constant dense<0.000000e+00> : vector<32x32xf32>
    %480 = tpu.matmul %477, %479, %cst_347 {dimension_numbers = #tpu.dot_dimension_numbers<[1], [0], [0], [1], [0, 0, 1, 1], [], []>} : vector<32x32xbf16>, vector<32x32xbf16>, vector<32x32xf32> -> vector<32x32xf32>
    %481 = arith.addf %475, %480 : vector<32x32xf32>
    %482 = vector.extract_strided_slice %470 {offsets = [2, 0], sizes = [32, 32], strides = [1, 1]} : vector<34x32xf32> to vector<32x32xf32>
    %483 = arith.truncf %482 : vector<32x32xf32> to vector<32x32xbf16>
    %c2_348 = arith.constant 2 : index
    %c0_349 = arith.constant 0 : index
    %c0_350 = arith.constant 0 : index
    %484 = vector.load %arg30[%c2_348, %c0_349, %c0_350] : memref<3x32x32xbf16, #tpu.memory_space<vmem>>, vector<1x32x32xbf16>
    %485 = vector.shape_cast %484 : vector<1x32x32xbf16> to vector<32x32xbf16>
    %cst_351 = arith.constant dense<0.000000e+00> : vector<32x32xf32>
    %486 = tpu.matmul %483, %485, %cst_351 {dimension_numbers = #tpu.dot_dimension_numbers<[1], [0], [0], [1], [0, 0, 1, 1], [], []>} : vector<32x32xbf16>, vector<32x32xbf16>, vector<32x32xf32> -> vector<32x32xf32>
    %487 = arith.addf %481, %486 : vector<32x32xf32>
    %c0_352 = arith.constant 0 : index
    %c0_353 = arith.constant 0 : index
    %488 = vector.load %arg29[%c0_352, %c0_353] : memref<1x32xf32, #tpu.memory_space<vmem>>, vector<1x32xf32>
    %489 = vector.broadcast %488 : vector<1x32xf32> to vector<32x32xf32>
    %490 = arith.addf %487, %489 : vector<32x32xf32>
    %cst_354 = arith.constant 0.000000e+00 : f32
    %491 = vector.broadcast %cst_354 : f32 to vector<1x32xf32>
    %492 = tpu.concatenate %491, %490, %491 in 0 : vector<1x32xf32>, vector<32x32xf32>, vector<1x32xf32> -> vector<34x32xf32>
    %493 = vector.extract_strided_slice %492 {offsets = [0, 0], sizes = [32, 32], strides = [1, 1]} : vector<34x32xf32> to vector<32x32xf32>
    %494 = arith.truncf %493 : vector<32x32xf32> to vector<32x32xbf16>
    %c0_355 = arith.constant 0 : index
    %c0_356 = arith.constant 0 : index
    %c0_357 = arith.constant 0 : index
    %495 = vector.load %arg8[%c0_355, %c0_356, %c0_357] : memref<3x32x32xbf16, #tpu.memory_space<vmem>>, vector<1x32x32xbf16>
    %496 = vector.shape_cast %495 : vector<1x32x32xbf16> to vector<32x32xbf16>
    %cst_358 = arith.constant dense<0.000000e+00> : vector<32x32xf32>
    %497 = tpu.matmul %494, %496, %cst_358 {dimension_numbers = #tpu.dot_dimension_numbers<[1], [0], [0], [1], [0, 0, 1, 1], [], []>} : vector<32x32xbf16>, vector<32x32xbf16>, vector<32x32xf32> -> vector<32x32xf32>
    %498 = vector.extract_strided_slice %492 {offsets = [1, 0], sizes = [32, 32], strides = [1, 1]} : vector<34x32xf32> to vector<32x32xf32>
    %499 = arith.truncf %498 : vector<32x32xf32> to vector<32x32xbf16>
    %c1_359 = arith.constant 1 : index
    %c0_360 = arith.constant 0 : index
    %c0_361 = arith.constant 0 : index
    %500 = vector.load %arg8[%c1_359, %c0_360, %c0_361] : memref<3x32x32xbf16, #tpu.memory_space<vmem>>, vector<1x32x32xbf16>
    %501 = vector.shape_cast %500 : vector<1x32x32xbf16> to vector<32x32xbf16>
    %cst_362 = arith.constant dense<0.000000e+00> : vector<32x32xf32>
    %502 = tpu.matmul %499, %501, %cst_362 {dimension_numbers = #tpu.dot_dimension_numbers<[1], [0], [0], [1], [0, 0, 1, 1], [], []>} : vector<32x32xbf16>, vector<32x32xbf16>, vector<32x32xf32> -> vector<32x32xf32>
    %503 = arith.addf %497, %502 : vector<32x32xf32>
    %504 = vector.extract_strided_slice %492 {offsets = [2, 0], sizes = [32, 32], strides = [1, 1]} : vector<34x32xf32> to vector<32x32xf32>
    %505 = arith.truncf %504 : vector<32x32xf32> to vector<32x32xbf16>
    %c2_363 = arith.constant 2 : index
    %c0_364 = arith.constant 0 : index
    %c0_365 = arith.constant 0 : index
    %506 = vector.load %arg8[%c2_363, %c0_364, %c0_365] : memref<3x32x32xbf16, #tpu.memory_space<vmem>>, vector<1x32x32xbf16>
    %507 = vector.shape_cast %506 : vector<1x32x32xbf16> to vector<32x32xbf16>
    %cst_366 = arith.constant dense<0.000000e+00> : vector<32x32xf32>
    %508 = tpu.matmul %505, %507, %cst_366 {dimension_numbers = #tpu.dot_dimension_numbers<[1], [0], [0], [1], [0, 0, 1, 1], [], []>} : vector<32x32xbf16>, vector<32x32xbf16>, vector<32x32xf32> -> vector<32x32xf32>
    %509 = arith.addf %503, %508 : vector<32x32xf32>
    %c0_367 = arith.constant 0 : index
    %c0_368 = arith.constant 0 : index
    %510 = vector.load %arg7[%c0_367, %c0_368] : memref<1x32xf32, #tpu.memory_space<vmem>>, vector<1x32xf32>
    %511 = vector.broadcast %510 : vector<1x32xf32> to vector<32x32xf32>
    %512 = arith.addf %509, %511 : vector<32x32xf32>
    %cst_369 = arith.constant 0.000000e+00 : f32
    %513 = vector.broadcast %cst_369 : f32 to vector<32x32xf32>
    %514 = arith.maximumf %512, %513 : vector<32x32xf32>
    %cst_370 = arith.constant 0.000000e+00 : f32
    %515 = vector.broadcast %cst_370 : f32 to vector<1x32xf32>
    %516 = tpu.concatenate %515, %514, %515 in 0 : vector<1x32xf32>, vector<32x32xf32>, vector<1x32xf32> -> vector<34x32xf32>
    %517 = vector.extract_strided_slice %516 {offsets = [0, 0], sizes = [32, 32], strides = [1, 1]} : vector<34x32xf32> to vector<32x32xf32>
    %518 = arith.truncf %517 : vector<32x32xf32> to vector<32x32xbf16>
    %c0_371 = arith.constant 0 : index
    %c0_372 = arith.constant 0 : index
    %c0_373 = arith.constant 0 : index
    %519 = vector.load %arg10[%c0_371, %c0_372, %c0_373] : memref<3x32x6xbf16, #tpu.memory_space<vmem>>, vector<1x32x6xbf16>
    %520 = vector.shape_cast %519 : vector<1x32x6xbf16> to vector<32x6xbf16>
    %cst_374 = arith.constant dense<0.000000e+00> : vector<32x6xf32>
    %521 = tpu.matmul %518, %520, %cst_374 {dimension_numbers = #tpu.dot_dimension_numbers<[1], [0], [0], [1], [0, 0, 1, 1], [], []>} : vector<32x32xbf16>, vector<32x6xbf16>, vector<32x6xf32> -> vector<32x6xf32>
    %522 = vector.extract_strided_slice %516 {offsets = [1, 0], sizes = [32, 32], strides = [1, 1]} : vector<34x32xf32> to vector<32x32xf32>
    %523 = arith.truncf %522 : vector<32x32xf32> to vector<32x32xbf16>
    %c1_375 = arith.constant 1 : index
    %c0_376 = arith.constant 0 : index
    %c0_377 = arith.constant 0 : index
    %524 = vector.load %arg10[%c1_375, %c0_376, %c0_377] : memref<3x32x6xbf16, #tpu.memory_space<vmem>>, vector<1x32x6xbf16>
    %525 = vector.shape_cast %524 : vector<1x32x6xbf16> to vector<32x6xbf16>
    %cst_378 = arith.constant dense<0.000000e+00> : vector<32x6xf32>
    %526 = tpu.matmul %523, %525, %cst_378 {dimension_numbers = #tpu.dot_dimension_numbers<[1], [0], [0], [1], [0, 0, 1, 1], [], []>} : vector<32x32xbf16>, vector<32x6xbf16>, vector<32x6xf32> -> vector<32x6xf32>
    %527 = arith.addf %521, %526 : vector<32x6xf32>
    %528 = vector.extract_strided_slice %516 {offsets = [2, 0], sizes = [32, 32], strides = [1, 1]} : vector<34x32xf32> to vector<32x32xf32>
    %529 = arith.truncf %528 : vector<32x32xf32> to vector<32x32xbf16>
    %c2_379 = arith.constant 2 : index
    %c0_380 = arith.constant 0 : index
    %c0_381 = arith.constant 0 : index
    %530 = vector.load %arg10[%c2_379, %c0_380, %c0_381] : memref<3x32x6xbf16, #tpu.memory_space<vmem>>, vector<1x32x6xbf16>
    %531 = vector.shape_cast %530 : vector<1x32x6xbf16> to vector<32x6xbf16>
    %cst_382 = arith.constant dense<0.000000e+00> : vector<32x6xf32>
    %532 = tpu.matmul %529, %531, %cst_382 {dimension_numbers = #tpu.dot_dimension_numbers<[1], [0], [0], [1], [0, 0, 1, 1], [], []>} : vector<32x32xbf16>, vector<32x6xbf16>, vector<32x6xf32> -> vector<32x6xf32>
    %533 = arith.addf %527, %532 : vector<32x6xf32>
    %c0_383 = arith.constant 0 : index
    %c0_384 = arith.constant 0 : index
    %534 = vector.load %arg9[%c0_383, %c0_384] : memref<1x6xf32, #tpu.memory_space<vmem>>, vector<1x6xf32>
    %535 = vector.broadcast %534 : vector<1x6xf32> to vector<32x6xf32>
    %536 = arith.addf %533, %535 : vector<32x6xf32>
    %c0_385 = arith.constant 0 : index
    %c0_386 = arith.constant 0 : index
    %c0_387 = arith.constant 0 : index
    %537 = vector.load %arg55[%c0_385, %c0_386, %c0_387] : memref<1x32x6xf32, #tpu.memory_space<vmem>>, vector<1x32x6xf32>
    %538 = vector.shape_cast %537 : vector<1x32x6xf32> to vector<32x6xf32>
    %539 = vector.shape_cast %536 : vector<32x6xf32> to vector<1x32x6xf32>
    tpu.vector_store %arg55[%c0_385, %c0_386, %c0_387], %539 {strides = array<i32>} : memref<1x32x6xf32, #tpu.memory_space<vmem>>, vector<1x32x6xf32>,
    return
  }
  func.func @transform_0(%arg0: i32) -> (i32, i32, i32) {
    %c0_i32 = arith.constant 0 : i32
    %c0_i32_0 = arith.constant 0 : i32
    %c0_i32_1 = arith.constant 0 : i32
    return %arg0, %c0_i32, %c0_i32_0 : i32, i32, i32
  }
  func.func @transform_1(%arg0: i32) -> (i32, i32) {
    %c0_i32 = arith.constant 0 : i32
    %c0_i32_0 = arith.constant 0 : i32
    %c0_i32_1 = arith.constant 0 : i32
    return %c0_i32, %c0_i32_0 : i32, i32
  }
  func.func @transform_2(%arg0: i32) -> (i32, i32) {
    %c0_i32 = arith.constant 0 : i32
    %c0_i32_0 = arith.constant 0 : i32
    %c0_i32_1 = arith.constant 0 : i32
    return %c0_i32, %c0_i32_0 : i32, i32
  }
  func.func @transform_3(%arg0: i32) -> (i32, i32) {
    %c0_i32 = arith.constant 0 : i32
    %c0_i32_0 = arith.constant 0 : i32
    %c0_i32_1 = arith.constant 0 : i32
    return %c0_i32, %c0_i32_0 : i32, i32
  }
  func.func @transform_4(%arg0: i32) -> (i32, i32) {
    %c0_i32 = arith.constant 0 : i32
    %c0_i32_0 = arith.constant 0 : i32
    %c0_i32_1 = arith.constant 0 : i32
    return %c0_i32, %c0_i32_0 : i32, i32
  }
  func.func @transform_5(%arg0: i32) -> (i32, i32, i32) {
    %c0_i32 = arith.constant 0 : i32
    %c0_i32_0 = arith.constant 0 : i32
    %c0_i32_1 = arith.constant 0 : i32
    %c0_i32_2 = arith.constant 0 : i32
    return %c0_i32, %c0_i32_0, %c0_i32_1 : i32, i32, i32
  }
  func.func @transform_6(%arg0: i32) -> (i32, i32) {
    %c0_i32 = arith.constant 0 : i32
    %c0_i32_0 = arith.constant 0 : i32
    %c0_i32_1 = arith.constant 0 : i32
    return %c0_i32, %c0_i32_0 : i32, i32
  }
  func.func @transform_7(%arg0: i32) -> (i32, i32, i32) {
    %c0_i32 = arith.constant 0 : i32
    %c0_i32_0 = arith.constant 0 : i32
    %c0_i32_1 = arith.constant 0 : i32
    %c0_i32_2 = arith.constant 0 : i32
    return %c0_i32, %c0_i32_0, %c0_i32_1 : i32, i32, i32
  }
  func.func @transform_8(%arg0: i32) -> (i32, i32) {
    %c0_i32 = arith.constant 0 : i32
    %c0_i32_0 = arith.constant 0 : i32
    %c0_i32_1 = arith.constant 0 : i32
    return %c0_i32, %c0_i32_0 : i32, i32
  }
  func.func @transform_9(%arg0: i32) -> (i32, i32, i32) {
    %c0_i32 = arith.constant 0 : i32
    %c0_i32_0 = arith.constant 0 : i32
    %c0_i32_1 = arith.constant 0 : i32
    %c0_i32_2 = arith.constant 0 : i32
    return %c0_i32, %c0_i32_0, %c0_i32_1 : i32, i32, i32
  }
  func.func @transform_10(%arg0: i32) -> (i32, i32) {
    %c0_i32 = arith.constant 0 : i32
    %c0_i32_0 = arith.constant 0 : i32
    %c0_i32_1 = arith.constant 0 : i32
    return %c0_i32, %c0_i32_0 : i32, i32
  }
  func.func @transform_11(%arg0: i32) -> (i32, i32) {
    %c0_i32 = arith.constant 0 : i32
    %c0_i32_0 = arith.constant 0 : i32
    %c0_i32_1 = arith.constant 0 : i32
    return %c0_i32, %c0_i32_0 : i32, i32
  }
  func.func @transform_12(%arg0: i32) -> (i32, i32, i32) {
    %c0_i32 = arith.constant 0 : i32
    %c0_i32_0 = arith.constant 0 : i32
    %c0_i32_1 = arith.constant 0 : i32
    %c0_i32_2 = arith.constant 0 : i32
    return %c0_i32, %c0_i32_0, %c0_i32_1 : i32, i32, i32
  }
  func.func @transform_13(%arg0: i32) -> (i32, i32, i32) {
    %c0_i32 = arith.constant 0 : i32
    %c0_i32_0 = arith.constant 0 : i32
    %c0_i32_1 = arith.constant 0 : i32
    %c0_i32_2 = arith.constant 0 : i32
    return %c0_i32, %c0_i32_0, %c0_i32_1 : i32, i32, i32
  }
  func.func @transform_14(%arg0: i32) -> (i32, i32) {
    %c0_i32 = arith.constant 0 : i32
    %c0_i32_0 = arith.constant 0 : i32
    %c0_i32_1 = arith.constant 0 : i32
    return %c0_i32, %c0_i32_0 : i32, i32
  }
  func.func @transform_15(%arg0: i32) -> (i32, i32) {
    %c0_i32 = arith.constant 0 : i32
    %c0_i32_0 = arith.constant 0 : i32
    %c0_i32_1 = arith.constant 0 : i32
    return %c0_i32, %c0_i32_0 : i32, i32
  }
  func.func @transform_16(%arg0: i32) -> (i32, i32, i32) {
    %c0_i32 = arith.constant 0 : i32
    %c0_i32_0 = arith.constant 0 : i32
    %c0_i32_1 = arith.constant 0 : i32
    %c0_i32_2 = arith.constant 0 : i32
    return %c0_i32, %c0_i32_0, %c0_i32_1 : i32, i32, i32
  }
  func.func @transform_17(%arg0: i32) -> (i32, i32, i32) {
    %c0_i32 = arith.constant 0 : i32
    %c0_i32_0 = arith.constant 0 : i32
    %c0_i32_1 = arith.constant 0 : i32
    %c0_i32_2 = arith.constant 0 : i32
    return %c0_i32, %c0_i32_0, %c0_i32_1 : i32, i32, i32
  }
  func.func @transform_18(%arg0: i32) -> (i32, i32) {
    %c0_i32 = arith.constant 0 : i32
    %c0_i32_0 = arith.constant 0 : i32
    %c0_i32_1 = arith.constant 0 : i32
    return %c0_i32, %c0_i32_0 : i32, i32
  }
  func.func @transform_19(%arg0: i32) -> (i32, i32, i32) {
    %c0_i32 = arith.constant 0 : i32
    %c0_i32_0 = arith.constant 0 : i32
    %c0_i32_1 = arith.constant 0 : i32
    %c0_i32_2 = arith.constant 0 : i32
    return %c0_i32, %c0_i32_0, %c0_i32_1 : i32, i32, i32
  }
  func.func @transform_20(%arg0: i32) -> (i32, i32) {
    %c0_i32 = arith.constant 0 : i32
    %c0_i32_0 = arith.constant 0 : i32
    %c0_i32_1 = arith.constant 0 : i32
    return %c0_i32, %c0_i32_0 : i32, i32
  }
  func.func @transform_21(%arg0: i32) -> (i32, i32) {
    %c0_i32 = arith.constant 0 : i32
    %c0_i32_0 = arith.constant 0 : i32
    %c0_i32_1 = arith.constant 0 : i32
    return %c0_i32, %c0_i32_0 : i32, i32
  }
  func.func @transform_22(%arg0: i32) -> (i32, i32, i32) {
    %c0_i32 = arith.constant 0 : i32
    %c0_i32_0 = arith.constant 0 : i32
    %c0_i32_1 = arith.constant 0 : i32
    %c0_i32_2 = arith.constant 0 : i32
    return %c0_i32, %c0_i32_0, %c0_i32_1 : i32, i32, i32
  }
  func.func @transform_23(%arg0: i32) -> (i32, i32, i32) {
    %c0_i32 = arith.constant 0 : i32
    %c0_i32_0 = arith.constant 0 : i32
    %c0_i32_1 = arith.constant 0 : i32
    %c0_i32_2 = arith.constant 0 : i32
    return %c0_i32, %c0_i32_0, %c0_i32_1 : i32, i32, i32
  }
  func.func @transform_24(%arg0: i32) -> (i32, i32) {
    %c0_i32 = arith.constant 0 : i32
    %c0_i32_0 = arith.constant 0 : i32
    %c0_i32_1 = arith.constant 0 : i32
    return %c0_i32, %c0_i32_0 : i32, i32
  }
  func.func @transform_25(%arg0: i32) -> (i32, i32) {
    %c0_i32 = arith.constant 0 : i32
    %c0_i32_0 = arith.constant 0 : i32
    %c0_i32_1 = arith.constant 0 : i32
    return %c0_i32, %c0_i32_0 : i32, i32
  }
  func.func @transform_26(%arg0: i32) -> (i32, i32, i32) {
    %c0_i32 = arith.constant 0 : i32
    %c0_i32_0 = arith.constant 0 : i32
    %c0_i32_1 = arith.constant 0 : i32
    %c0_i32_2 = arith.constant 0 : i32
    return %c0_i32, %c0_i32_0, %c0_i32_1 : i32, i32, i32
  }
  func.func @transform_27(%arg0: i32) -> (i32, i32, i32) {
    %c0_i32 = arith.constant 0 : i32
    %c0_i32_0 = arith.constant 0 : i32
    %c0_i32_1 = arith.constant 0 : i32
    %c0_i32_2 = arith.constant 0 : i32
    return %c0_i32, %c0_i32_0, %c0_i32_1 : i32, i32, i32
  }
  func.func @transform_28(%arg0: i32) -> (i32, i32) {
    %c0_i32 = arith.constant 0 : i32
    %c0_i32_0 = arith.constant 0 : i32
    %c0_i32_1 = arith.constant 0 : i32
    return %c0_i32, %c0_i32_0 : i32, i32
  }
  func.func @transform_29(%arg0: i32) -> (i32, i32, i32) {
    %c0_i32 = arith.constant 0 : i32
    %c0_i32_0 = arith.constant 0 : i32
    %c0_i32_1 = arith.constant 0 : i32
    %c0_i32_2 = arith.constant 0 : i32
    return %c0_i32, %c0_i32_0, %c0_i32_1 : i32, i32, i32
  }
  func.func @transform_30(%arg0: i32) -> (i32, i32) {
    %c0_i32 = arith.constant 0 : i32
    %c0_i32_0 = arith.constant 0 : i32
    %c0_i32_1 = arith.constant 0 : i32
    return %c0_i32, %c0_i32_0 : i32, i32
  }
  func.func @transform_31(%arg0: i32) -> (i32, i32, i32) {
    %c0_i32 = arith.constant 0 : i32
    %c0_i32_0 = arith.constant 0 : i32
    %c0_i32_1 = arith.constant 0 : i32
    %c0_i32_2 = arith.constant 0 : i32
    return %c0_i32, %c0_i32_0, %c0_i32_1 : i32, i32, i32
  }
  func.func @transform_32(%arg0: i32) -> (i32, i32) {
    %c0_i32 = arith.constant 0 : i32
    %c0_i32_0 = arith.constant 0 : i32
    %c0_i32_1 = arith.constant 0 : i32
    return %c0_i32, %c0_i32_0 : i32, i32
  }
  func.func @transform_33(%arg0: i32) -> (i32, i32) {
    %c0_i32 = arith.constant 0 : i32
    %c0_i32_0 = arith.constant 0 : i32
    %c0_i32_1 = arith.constant 0 : i32
    return %c0_i32, %c0_i32_0 : i32, i32
  }
  func.func @transform_34(%arg0: i32) -> (i32, i32, i32) {
    %c0_i32 = arith.constant 0 : i32
    %c0_i32_0 = arith.constant 0 : i32
    %c0_i32_1 = arith.constant 0 : i32
    %c0_i32_2 = arith.constant 0 : i32
    return %c0_i32, %c0_i32_0, %c0_i32_1 : i32, i32, i32
  }
  func.func @transform_35(%arg0: i32) -> (i32, i32, i32) {
    %c0_i32 = arith.constant 0 : i32
    %c0_i32_0 = arith.constant 0 : i32
    %c0_i32_1 = arith.constant 0 : i32
    %c0_i32_2 = arith.constant 0 : i32
    return %c0_i32, %c0_i32_0, %c0_i32_1 : i32, i32, i32
  }
  func.func @transform_36(%arg0: i32) -> (i32, i32) {
    %c0_i32 = arith.constant 0 : i32
    %c0_i32_0 = arith.constant 0 : i32
    %c0_i32_1 = arith.constant 0 : i32
    return %c0_i32, %c0_i32_0 : i32, i32
  }
  func.func @transform_37(%arg0: i32) -> (i32, i32) {
    %c0_i32 = arith.constant 0 : i32
    %c0_i32_0 = arith.constant 0 : i32
    %c0_i32_1 = arith.constant 0 : i32
    return %c0_i32, %c0_i32_0 : i32, i32
  }
  func.func @transform_38(%arg0: i32) -> (i32, i32, i32) {
    %c0_i32 = arith.constant 0 : i32
    %c0_i32_0 = arith.constant 0 : i32
    %c0_i32_1 = arith.constant 0 : i32
    %c0_i32_2 = arith.constant 0 : i32
    return %c0_i32, %c0_i32_0, %c0_i32_1 : i32, i32, i32
  }
  func.func @transform_39(%arg0: i32) -> (i32, i32, i32) {
    %c0_i32 = arith.constant 0 : i32
    %c0_i32_0 = arith.constant 0 : i32
    %c0_i32_1 = arith.constant 0 : i32
    %c0_i32_2 = arith.constant 0 : i32
    return %c0_i32, %c0_i32_0, %c0_i32_1 : i32, i32, i32
  }
  func.func @transform_40(%arg0: i32) -> (i32, i32) {
    %c0_i32 = arith.constant 0 : i32
    %c0_i32_0 = arith.constant 0 : i32
    %c0_i32_1 = arith.constant 0 : i32
    return %c0_i32, %c0_i32_0 : i32, i32
  }
  func.func @transform_41(%arg0: i32) -> (i32, i32, i32) {
    %c0_i32 = arith.constant 0 : i32
    %c0_i32_0 = arith.constant 0 : i32
    %c0_i32_1 = arith.constant 0 : i32
    %c0_i32_2 = arith.constant 0 : i32
    return %c0_i32, %c0_i32_0, %c0_i32_1 : i32, i32, i32
  }
  func.func @transform_42(%arg0: i32) -> (i32, i32) {
    %c0_i32 = arith.constant 0 : i32
    %c0_i32_0 = arith.constant 0 : i32
    %c0_i32_1 = arith.constant 0 : i32
    return %c0_i32, %c0_i32_0 : i32, i32
  }
  func.func @transform_43(%arg0: i32) -> (i32, i32) {
    %c0_i32 = arith.constant 0 : i32
    %c0_i32_0 = arith.constant 0 : i32
    %c0_i32_1 = arith.constant 0 : i32
    return %c0_i32, %c0_i32_0 : i32, i32
  }
  func.func @transform_44(%arg0: i32) -> (i32, i32, i32) {
    %c0_i32 = arith.constant 0 : i32
    %c0_i32_0 = arith.constant 0 : i32
    %c0_i32_1 = arith.constant 0 : i32
    %c0_i32_2 = arith.constant 0 : i32
    return %c0_i32, %c0_i32_0, %c0_i32_1 : i32, i32, i32
  }
  func.func @transform_45(%arg0: i32) -> (i32, i32, i32) {
    %c0_i32 = arith.constant 0 : i32
    %c0_i32_0 = arith.constant 0 : i32
    %c0_i32_1 = arith.constant 0 : i32
    %c0_i32_2 = arith.constant 0 : i32
    return %c0_i32, %c0_i32_0, %c0_i32_1 : i32, i32, i32
  }
  func.func @transform_46(%arg0: i32) -> (i32, i32) {
    %c0_i32 = arith.constant 0 : i32
    %c0_i32_0 = arith.constant 0 : i32
    %c0_i32_1 = arith.constant 0 : i32
    return %c0_i32, %c0_i32_0 : i32, i32
  }
  func.func @transform_47(%arg0: i32) -> (i32, i32) {
    %c0_i32 = arith.constant 0 : i32
    %c0_i32_0 = arith.constant 0 : i32
    %c0_i32_1 = arith.constant 0 : i32
    return %c0_i32, %c0_i32_0 : i32, i32
  }
  func.func @transform_48(%arg0: i32) -> (i32, i32, i32) {
    %c0_i32 = arith.constant 0 : i32
    %c0_i32_0 = arith.constant 0 : i32
    %c0_i32_1 = arith.constant 0 : i32
    %c0_i32_2 = arith.constant 0 : i32
    return %c0_i32, %c0_i32_0, %c0_i32_1 : i32, i32, i32
  }
  func.func @transform_49(%arg0: i32) -> (i32, i32, i32) {
    %c0_i32 = arith.constant 0 : i32
    %c0_i32_0 = arith.constant 0 : i32
    %c0_i32_1 = arith.constant 0 : i32
    %c0_i32_2 = arith.constant 0 : i32
    return %c0_i32, %c0_i32_0, %c0_i32_1 : i32, i32, i32
  }
  func.func @transform_50(%arg0: i32) -> (i32, i32) {
    %c0_i32 = arith.constant 0 : i32
    %c0_i32_0 = arith.constant 0 : i32
    %c0_i32_1 = arith.constant 0 : i32
    return %c0_i32, %c0_i32_0 : i32, i32
  }
  func.func @transform_51(%arg0: i32) -> (i32, i32, i32) {
    %c0_i32 = arith.constant 0 : i32
    %c0_i32_0 = arith.constant 0 : i32
    %c0_i32_1 = arith.constant 0 : i32
    %c0_i32_2 = arith.constant 0 : i32
    return %c0_i32, %c0_i32_0, %c0_i32_1 : i32, i32, i32
  }
  func.func @transform_52(%arg0: i32) -> (i32, i32) {
    %c0_i32 = arith.constant 0 : i32
    %c0_i32_0 = arith.constant 0 : i32
    %c0_i32_1 = arith.constant 0 : i32
    return %c0_i32, %c0_i32_0 : i32, i32
  }
  func.func @transform_53(%arg0: i32) -> (i32, i32, i32) {
    %c0_i32 = arith.constant 0 : i32
    %c0_i32_0 = arith.constant 0 : i32
    %c0_i32_1 = arith.constant 0 : i32
    %c0_i32_2 = arith.constant 0 : i32
    return %c0_i32, %c0_i32_0, %c0_i32_1 : i32, i32, i32
  }
  func.func @transform_54(%arg0: i32) -> (i32, i32, i32) {
    %c0_i32 = arith.constant 0 : i32
    %c0_i32_0 = arith.constant 0 : i32
    %c0_i32_1 = arith.constant 0 : i32
    return %arg0, %c0_i32, %c0_i32_0 : i32, i32, i32
  }
  func.func @transform_55(%arg0: i32) -> (i32, i32, i32) {
    %c0_i32 = arith.constant 0 : i32
    %c0_i32_0 = arith.constant 0 : i32
    %c0_i32_1 = arith.constant 0 : i32
    return %arg0, %c0_i32, %c0_i32_0 : i32, i32, i32
  }
  func.func @transform_56(%arg0: i32) -> (i32, i32, i32) {
    %c0_i32 = arith.constant 0 : i32
    %c0_i32_0 = arith.constant 0 : i32
    %c0_i32_1 = arith.constant 0 : i32
    return %arg0, %c0_i32, %c0_i32_0 : i32, i32, i32
  }
}

</mosaic_0001>

<bundles_post_ra>
// kernel: vqvae_forward.1
= control target key start
LH: loop header
LB: loop body
LE: loop exit
PB: predicated region body
PF: predicated region fallthrough
CT: control target
= control target key end

     0   :  { %s7917_s6 = smov 1   ;;  %s7918_s10 = smov 2   ;;  %s8879_s0 = inlined_call_operand.smem [shape: u32[57], index: -1, kind: input, shape index: {}] }
   0x1   :  { %s7984_s5 = sld [smem:[%s8879_s0]]   ;;  %s7919_s14 = smov 3  }
   0x2   :  { %s7989_s9 = sld [smem:[%s8879_s0 + %s7917_s6]]   ;;  %s7920_s18 = smov 4  }
   0x3   :  { %s7994_s13 = sld [smem:[%s8879_s0 + %s7918_s10]]   ;;  %s7921_s22 = smov 5  }
   0x4   :  { %s7999_s17 = sld [smem:[%s8879_s0 + %s7919_s14]]   ;;  %s7922_s26 = smov 6  }
   0x5   :  { %s8004_s21 = sld [smem:[%s8879_s0 + %s7920_s18]]   ;;  %s7923_s30 = smov 7  }
   0x6   :  { %s8009_s25 = sld [smem:[%s8879_s0 + %s7921_s22]]   ;;  %s7924_s4 = smov 8  }
   0x7   :  { %s8014_s29 = sld [smem:[%s8879_s0 + %s7922_s26]]   ;;  %s7925_s10 = smov 9  }
   0x8   :  { %8909 = sst [smem:[#allocation3_spill]] %s7989_s9  ;;  %s7926_s15 = smov 10  }
   0x9   :  { %8910 = sst [smem:[#allocation4_spill]] %s7994_s13  ;;  %s7927_s20 = smov 11  }
   0xa   :  { %8911 = sst [smem:[#allocation5_spill]] %s7999_s17  ;;  %s7928_s26 = smov 12  }
   0xb   :  { %8912 = sst [smem:[#allocation6_spill]] %s8004_s21  ;;  %s7929_s1 = smov 13  }
   0xc   :  { %8913 = sst [smem:[#allocation7_spill]] %s8009_s25  ;;  %s7930_s7 = smov 14  }
   0xd   :  { %8914 = sst [smem:[#allocation8_spill]] %s8014_s29  ;;  %s7932_s22 = smov 16  }
   0xe   :  { %s8019_s3 = sld [smem:[%s8879_s0 + %s7923_s30]]   ;;  %s7933_s28 = smov 17  }
   0xf   :  { %s8024_s8 = sld [smem:[%s8879_s0 + %s7924_s4]]  }
  0x10   :  { %s8029_s14 = sld [smem:[%s8879_s0 + %s7925_s10]]  }
  0x11   :  { %s8034_s19 = sld [smem:[%s8879_s0 + %s7926_s15]]   ;;  %s7931_s15 = smov 15  }
  0x12   :  { %s8039_s24 = sld [smem:[%s8879_s0 + %s7927_s20]]  }
  0x13   :  { %s8044_s30 = sld [smem:[%s8879_s0 + %s7928_s26]]  }
  0x14   :  { %8915 = sst [smem:[#allocation9_spill]] %s8019_s3 }
  0x15   :  { %8916 = sst [smem:[#allocation10_spill]] %s8024_s8 }
  0x16   :  { %8917 = sst [smem:[#allocation11_spill]] %s8029_s14 }
  0x17   :  { %8918 = sst [smem:[#allocation12_spill]] %s8034_s19 }
  0x18   :  { %8919 = sst [smem:[#allocation13_spill]] %s8039_s24 }
  0x19   :  { %8920 = sst [smem:[#allocation14_spill]] %s8044_s30 }
  0x1a   :  { %s8049_s6 = sld [smem:[%s8879_s0 + %s7929_s1]]  }
  0x1b   :  { %s8054_s12 = sld [smem:[%s8879_s0 + %s7930_s7]]   ;;  %s7934_s7 = smov 18  }
  0x1c   :  { %s8059_s20 = sld [smem:[%s8879_s0 + %s7931_s15]]   ;;  %s7935_s15 = smov 19  }
  0x1d   :  { %s8064_s27 = sld [smem:[%s8879_s0 + %s7932_s22]]   ;;  %s7936_s22 = smov 20  }
  0x1e   :  { %s8069_s4 = sld [smem:[%s8879_s0 + %s7933_s28]]   ;;  %s7937_s28 = smov 21  }
  0x1f   :  { %s8074_s8 = sld [smem:[%s8879_s0 + %s7934_s7]]   ;;  %s7938_s7 = smov 22  }
  0x20   :  { %8921 = sst [smem:[#allocation15_spill]] %s8049_s6 }
  0x21   :  { %8922 = sst [smem:[#allocation16_spill]] %s8054_s12 }
  0x22   :  { %8923 = sst [smem:[#allocation17_spill]] %s8059_s20 }
  0x23   :  { %8924 = sst [smem:[#allocation18_spill]] %s8064_s27 }
  0x24   :  { %8925 = sst [smem:[#allocation19_spill]] %s8069_s4 }
  0x25   :  { %8926 = sst [smem:[#allocation20_spill]] %s8074_s8 }
  0x26   :  { %s8079_s29 = sld [smem:[%s8879_s0 + %s7935_s15]]   ;;  %s7939_s15 = smov 23  }
  0x27   :  { %s8084_s14 = sld [smem:[%s8879_s0 + %s7936_s22]]   ;;  %s7940_s22 = smov 24  }
  0x28   :  { %s8089_s3 = sld [smem:[%s8879_s0 + %s7937_s28]]   ;;  %s7941_s28 = smov 25  }
  0x29   :  { %s8094_s8 = sld [smem:[%s8879_s0 + %s7938_s7]]   ;;  %s7942_s7 = smov 26  }
  0x2a   :  { %s8099_s20 = sld [smem:[%s8879_s0 + %s7939_s15]]   ;;  %s7943_s15 = smov 27  }
  0x2c   :  { %8927 = sst [smem:[#allocation21_spill]] %s8079_s29 }
  0x2d   :  { %8928 = sst [smem:[#allocation22_spill]] %s8084_s14 }
  0x2e   :  { %8929 = sst [smem:[#allocation23_spill]] %s8089_s3 }
  0x2f   :  { %8930 = sst [smem:[#allocation24_spill]] %s8094_s8 }
  0x30   :  { %8931 = sst [smem:[#allocation25_spill]] %s8099_s20 }
  0x31   :  { %s8104_s14 = sld [smem:[%s8879_s0 + %s7940_s22]]   ;;  %s7944_s22 = smov 28  }
  0x32   :  { %s8109_s3 = sld [smem:[%s8879_s0 + %s7941_s28]]   ;;  %s7945_s28 = smov 29  }
  0x33   :  { %s8114_s8 = sld [smem:[%s8879_s0 + %s7942_s7]]   ;;  %s7946_s7 = smov 30  }
  0x34   :  { %s8119_s20 = sld [smem:[%s8879_s0 + %s7943_s15]]   ;;  %s7947_s15 = smov 31  }
  0x37   :  { %8932 = sst [smem:[#allocation26_spill]] %s8104_s14 }
  0x38   :  { %8933 = sst [smem:[#allocation27_spill]] %s8109_s3 }
  0x39   :  { %8934 = sst [smem:[#allocation28_spill]] %s8114_s8 }
  0x3a   :  { %8935 = sst [smem:[#allocation29_spill]] %s8119_s20 }
  0x3b   :  { %s8124_s14 = sld [smem:[%s8879_s0 + %s7944_s22]]   ;;  %s7948_s22 = smov 32  }
  0x3c   :  { %s8129_s3 = sld [smem:[%s8879_s0 + %s7945_s28]]   ;;  %s7949_s28 = smov 33  }
  0x3d   :  { %s8134_s8 = sld [smem:[%s8879_s0 + %s7946_s7]]   ;;  %s7950_s7 = smov 34  }
  0x3e   :  { %s8139_s20 = sld [smem:[%s8879_s0 + %s7947_s15]]   ;;  %s7951_s15 = smov 35  }
  0x3f   :  { %s8154_s29 = sld [smem:[%s8879_s0 + %s7950_s7]]   ;;  %s7954_s7 = smov 38  }
  0x40   :  { %s8159_s12 = sld [smem:[%s8879_s0 + %s7951_s15]]   ;;  %s7955_s15 = smov 39  }
  0x41   :  { %8936 = sst [smem:[#allocation30_spill]] %s8124_s14 }
  0x42   :  { %8937 = sst [smem:[#allocation31_spill]] %s8129_s3 }
  0x43   :  { %s8144_s14 = sld [smem:[%s8879_s0 + %s7948_s22]]   ;;  %s7952_s22 = smov 36  }
  0x44   :  { %s8149_s3 = sld [smem:[%s8879_s0 + %s7949_s28]]   ;;  %s7953_s28 = smov 37  }
  0x45   :  { %s8164_s4 = sld [smem:[%s8879_s0 + %s7952_s22]]   ;;  %s7956_s22 = smov 40  }
  0x46   :  { %s8169_s24 = sld [smem:[%s8879_s0 + %s7953_s28]]   ;;  %s7957_s28 = smov 41  }
  0x47   :  { %s8174_s27 = sld [smem:[%s8879_s0 + %s7954_s7]]   ;;  %s7958_s7 = smov 42  }
  0x48   :  { %s8179_s19 = sld [smem:[%s8879_s0 + %s7955_s15]]   ;;  %s7959_s15 = smov 43  }
  0x49   :  { %s8184_s6 = sld [smem:[%s8879_s0 + %s7956_s22]]   ;;  %s7960_s22 = smov 44  }
  0x4a   :  { %8938 = sst [smem:[#allocation32_spill]] %s8149_s3 }
  0x4b   :  { %8939 = sst [smem:[#allocation33_spill]] %s8164_s4 }
  0x4c   :  { %s8189_s21 = sld [smem:[%s8879_s0 + %s7957_s28]]   ;;  %s7961_s28 = smov 45  }
  0x4d   :  { %s8194_s30 = sld [smem:[%s8879_s0 + %s7958_s7]]   ;;  %s7962_s7 = smov 46  }
  0x4e   :  { %s8199_s25 = sld [smem:[%s8879_s0 + %s7959_s15]]   ;;  %s7963_s15 = smov 47  }
  0x4f   :  { %8940 = sst [smem:[#allocation34_spill]] %s8184_s6 }
  0x50   :  { %s8204_s13 = sld [smem:[%s8879_s0 + %s7960_s22]]   ;;  %s7964_s22 = smov 48  }
  0x51   :  { %s8209_s9 = sld [smem:[%s8879_s0 + %s7961_s28]]   ;;  %s7965_s28 = smov 49  }
  0x52   :  { %s8214_s17 = sld [smem:[%s8879_s0 + %s7962_s7]]   ;;  %s7966_s7 = smov 50  }
  0x53   :  { %8941 = sst [smem:[#allocation35_spill]] %s8194_s30 }
  0x54   :  { %8942 = sst [smem:[#allocation36_spill]] %s8199_s25 }
  0x55   :  { %s8219_s25 = sld [smem:[%s8879_s0 + %s7963_s15]]   ;;  %s7967_s15 = smov 51  }
  0x56   :  { %8943 = sst [smem:[#allocation37_spill]] %s8204_s13 }
  0x57   :  { %8944 = sst [smem:[#allocation38_spill]] %s8209_s9 }
  0x58   :  { %8945 = sst [smem:[#allocation39_spill]] %s8214_s17 }
  0x59   :  { %s8224_s30 = sld [smem:[%s8879_s0 + %s7964_s22]]   ;;  %s7968_s22 = smov 52  }
  0x5a   :  { %s8229_s9 = sld [smem:[%s8879_s0 + %s7965_s28]]   ;;  %s7969_s28 = smov 53  }
  0x5b   :  { %8946 = sst [smem:[#allocation40_spill]] %s8219_s25 }
  0x5c   :  { %s8234_s17 = sld [smem:[%s8879_s0 + %s7966_s7]]   ;;  %s7970_s7 = smov 54  }
  0x5d   :  { %s8239_s25 = sld [smem:[%s8879_s0 + %s7967_s15]]   ;;  %s7971_s15 = smov 55  }
  0x5e   :  { %s8254_s6 = sld [smem:[%s8879_s0 + %s7970_s7]]  }
  0x5f   :  { %8947 = sst [smem:[#allocation41_spill]] %s8224_s30 }
  0x60   :  { %8948 = sst [smem:[#allocation42_spill]] %s8229_s9 }
  0x61   :  { %s8244_s30 = sld [smem:[%s8879_s0 + %s7968_s22]]   ;;  %s7972_s22 = smov 56  }
  0x62   :  { %s8249_s9 = sld [smem:[%s8879_s0 + %s7969_s28]]   ;;  %s8266_s28 = smov 0  }
  0x63   :  { %s8259_s13 = sld [smem:[%s8879_s0 + %s7971_s15]]  }
  0x67   :  { %8949 = sst [smem:[#allocation43_spill]] %s8244_s30 }
  0x68   :  { %s8264_s30 = sld [smem:[%s8879_s0 + %s7972_s22]]  }
  0x69 LB: > { %s6593_s1 = sadd.s32 4294967295, %s7915_s28   ;;  %p6597_p0 = scmp.ge.s32.totalorder %s7915_s28, 1  ;;  %s7915_s28 = sphi %s8266_s28, %s124_s28  }
  0x6a   : > { %p1524_p1 = scmp.lt.s32.totalorder %s7915_s28, 3 }
  0x6c   : > { %p1525_p2 = pnand %p6597_p0, %p1524_p1 }
  0x6d   : > { %v6602_v0 = vld [vmem:[%s8239_s25 + $0x4] sm:$0x7] (!%p1525_p2)  ;;  %vm1747_vm0 = vcmask (!%p1525_p2), 1042432   ;;  %p1660_p3 = scmp.lt.s32.totalorder (!%p1525_p2), %s6593_s1, 1  ;;  %v1715_v2 = vld [vmem:[%s8239_s25] sm:$0x7] (!%p1525_p2) }
  0x6e   : > { %1528 = sbr.rel (%p1525_p2) target bundleno = 6594 (0x19c2), region = 236  ;;  %7721 = vmatprep.subr.msk.bf16.mxu0 (!%p1525_p2), %vm1747_vm0, %v6602_v0  ;;  %v1749_v1 = vsel (!%p1525_p2), %vm1747_vm0, %v6602_v0, 0  ;;  %vm1698_vm1 = vcmask (!%p1525_p2), 1040384   ;;  %vm1719_vm2 = vsmask.f32 (!%p1525_p2), 7424  ;;  %vm1740_vm3 = vcmask (!%p1525_p2), 48128  }
  0x6f   : > { %7169 = vmatpush3.bf16.msra.mxu0 (!%p1525_p2), %v1749_v1  ;;  %v6607_v10 = vld [vmem:[%s8239_s25 + $0x8] sm:$0x7] (!%p1525_p2)  ;;  %v1805_v18 = vsel (!%p1525_p2), %vm1747_vm0, %v1715_v2, 0  ;;  %vm1861_vm4 = vcmask (!%p1525_p2), 1046528   ;;  %vm1944_vm5 = vcmask (!%p1525_p2), 253952   ;;  %v7973_v39 = vmov (!%p1525_p2), 0.0  }
  0x70   : > { %7722 = vmatprep.subr.msk.bf16.mxu0 (!%p1525_p2), %vm1747_vm0, %v1715_v2  ;;  %v1874_v23 = vsel (!%p1525_p2), %vm1747_vm0, %v6607_v10, 0  ;;  %7194 = vmatprep.subr.bf16.mxu1 (!%p1525_p2), %v7973_v39  ;;  %1951 = vst.msk [vmem:[#allocation2 + $0x21] sm:$0x1] (!%p1525_p2), %vm1944_vm5, %v7973_v39  ;;  %1945 = vst.msk [vmem:[#allocation2] sm:$0x1] (!%p1525_p2), %vm1944_vm5, %v7973_v39  ;;  %v7791_v40 = vld [vmem:[%s8139_s20] sm:$0xff] (!%p1525_p2)  }
  0x71   : > { %v7792_v41 = vld [vmem:[%s8139_s20 + $0x10] sm:$0xff] (!%p1525_p2)   ;;  %vm7974_vm6 = vmmov (!%p1525_p2), 0   ;;  %7195 = vmatpush3.bf16.msra.mxu1 (!%p1525_p2), %v7791_v40  ;;  %v7793_v42 = vld [vmem:[%s8139_s20 + $0x8] sm:$0xff] (!%p1525_p2)   ;;  %v7794_v43 = vld [vmem:[%s8139_s20 + $0x18] sm:$0xff] (!%p1525_p2)   ;;  %vm1946_vm7 = vcmask (!%p1525_p2), 261120   ;;  %s8950_s3 = sld [smem:[#allocation32_spill]] (!%p1525_p2) }
  0x72   : > { %7198 = vmatprep.mubr.msk.bf16.mxu1 (!%p1525_p2), %vm7974_vm6, %v7973_v39  ;;  %7196 = vmatprep.subr.bf16.mxu1 (!%p1525_p2), %v7973_v39  ;;  %v6610_v44 = vld [vmem:[%s8234_s17] ss:$0 sm:$0xff] (!%p1525_p2)  ;;  %v7796_v58 = vld [vmem:[%s8139_s20 + $0x30] sm:$0xff] (!%p1525_p2)   ;;  %v7798_v2 = vld [vmem:[%s8139_s20 + $0x38] sm:$0xff] (!%p1525_p2)   ;;  %vm2545_vm8 = vsmask.f32 (!%p1525_p2), 6400 }
  0x73   : > { %v7795_v0 = vld [vmem:[%s8139_s20 + $0x20] sm:$0xff] (!%p1525_p2)   ;;  %vm2681_vm9 = vcmask (!%p1525_p2), 1044480   ;;  %s8951_s4 = sld [smem:[#allocation33_spill]] (!%p1525_p2)  ;;  %s8952_s7 = sld [smem:[#allocation37_spill]] (!%p1525_p2)  ;;  %vm3907_vm10 = vcmask (!%p1525_p2), 523264   ;;  %vm3996_vm12 = vcmask (!%p1525_p2), 516096  }
  0x74   : > { %s8953_s10 = sld [smem:[#allocation34_spill]] (!%p1525_p2)  ;;  %s8954_s11 = sld [smem:[#allocation38_spill]] (!%p1525_p2)  ;;  %vm4009_vm13 = vcmask (!%p1525_p2), 0  }
  0x75   : > { %s8993_s1 = smov (!%p1660_p3, %s6593_s1), 1  ;;  %7197 = vmatpush3.bf16.msra.mxu1 %v7793_v42  ;;  %s8955_s15 = sld [smem:[#allocation35_spill]] }
  0x76   : > { %s8899_s0 = sshll.u32 %s8993_s1, 5  ;;  %7202 = vmatprep.subr.bf16.mxu1 %v7973_v39  ;;  %s8956_s16 = sld [smem:[#allocation41_spill]] }
  0x77   : > { %s1664_s2 = scalar_lea.vmem %s7984_s5, %s8899_s0  ;;  %s8957_s18 = sld [smem:[#allocation36_spill]] }
  0x78   : > { %v1690_v3 = vld [vmem:[%s1664_s2] sm:$0xff]  ;;  %v1691_v4 = vld [vmem:[%s1664_s2 + $0x8] sm:$0xff]  ;;  %v1692_v5 = vld [vmem:[%s1664_s2 + $0x10] sm:$0xff]  ;;  %s8958_s22 = sld [smem:[#allocation42_spill]]  ;;  %s8959_s23 = sld [smem:[#allocation39_spill]] }
  0x79   : > { %v1693_v6 = vld [vmem:[%s1664_s2 + $0x18] sm:$0xff]  ;;  %v1699_v7 = vrot.slane %v1690_v3, 7  ;;  %v1700_v8 = vrot.slane %v1691_v4, 7  ;;  %v1702_v9 = vrot.slane %v1692_v5, 7  ;;  %v7797_v3 = vld [vmem:[%s8139_s20 + $0x28] sm:$0xff]   ;;  %s8960_s26 = sld [smem:[#allocation40_spill]] }
  0x7a   : > { %v1704_v11 = vrot.slane %v1693_v6, 7  ;;  %s8961_s2 = sld [smem:[#allocation5_spill]]  ;;  %s8970_s0 = sld [smem:[#allocation18_spill]] }
  0x7b   : > { %v1701_v12 = vsel %vm1698_vm1, %v1699_v7, %v1700_v8  ;;  %v1703_v13 = vsel %vm1698_vm1, %v1700_v8, %v1702_v9  ;;  %v1711_v14 = vsel %vm1698_vm1, 0.0, %v1699_v7 }
  0x7c   : > { %v1705_v15 = vsel %vm1698_vm1, %v1702_v9, %v1704_v11  ;;  %v1713_v16 = vpack.c.bf16 %v1701_v12, %v1711_v14  ;;  %v1712_v17 = vsel %vm1698_vm1, %v1704_v11, 0.0  ;;  %v7799_v9 = vld [vmem:[%s8154_s29] sm:$0xff]   ;;  %v7801_v11 = vld [vmem:[%s8154_s29 + $0x10] sm:$0xff]   ;;  %v7802_v12 = vld [vmem:[%s8154_s29 + $0x18] sm:$0xff]  }
  0x7d   : > { %v1714_v19 = vpack.c.bf16 %v1705_v15, %v1703_v13  ;;  %v1716_v20 = vpack.c.bf16 %v1712_v17, %v1712_v17 }
  0x7e   : > { %v1721_v21 = vshrl.u32 %v1713_v16, 16  ;;  %v1723_v22 = vshll.u32 %v1713_v16, 16  ;;  %v1862_v24 = vrot.slane %v1713_v16, 1 }
  0x7f   : > { %v1728_v25 = vshll.u32 %v1714_v19, 16  ;;  %v1732_v26 = vshrl.u32 %v1714_v19, 16  ;;  %v1736_v27 = vshll.u32 %v1716_v20, 16  ;;  %v1863_v28 = vrot.slane %v1714_v19, 1 }
  0x80   : > { %v1725_v29 = vrot.slane %v1723_v22, 1  ;;  %v1865_v30 = vrot.slane %v1716_v20, 1 }
  0x81   : > { %v1730_v31 = vrot.slane %v1728_v25, 1  ;;  %v1738_v32 = vrot.slane %v1736_v27, 1  ;;  %v1864_v37 = vsel %vm1861_vm4, %v1862_v24, %v1863_v28 }
  0x82   : > { %v1726_v33 = vor.u32 %v1725_v29, %v1721_v21  ;;  %v1866_v38 = vsel %vm1861_vm4, %v1863_v28, %v1865_v30  ;;  %v6635_v29 = vld [vmem:[%s8134_s8] ss:$0 sm:$0xff] }
  0x83   : > { %v1734_v34 = vor.u32 %v1732_v26, %v1730_v31 }
  0x84   : > { %v1731_v35 = vsel %vm1719_vm2, %v1726_v33, %v1730_v31 }
  0x85   : > { %7170 = vmatprep.mubr.msk.bf16.mxu0 %vm1740_vm3, %v1731_v35  ;;  %v1739_v36 = vsel %vm1719_vm2, %v1734_v34, %v1738_v32 }
  0x86   : > { %7171 = vmatmul.mubr.msk.bf16.vlgmr.msra.gmra.mrb[0].mxu0 %vm1740_vm3, %v1739_v36 }
  0x87   : > { %7175 = vmatpush3.bf16.msra.mxu0 %v1805_v18  ;;  %7176 = vmatprep.mubr.msk.bf16.mxu0 %vm1740_vm3, %v1713_v16 }
  0x88   : > { %7723 = vmatprep.subr.msk.bf16.mxu0 %vm1747_vm0, %v6607_v10  ;;  %v7800_v10 = vld [vmem:[%s8154_s29 + $0x8] sm:$0xff]  }
  0x92   : > { %7177 = vmatmul.mubr.msk.bf16.vlgmr.msra.gmra.mrb[0].mxu0 %vm1740_vm3, %v1714_v19 }
  0x93   : > { %7181 = vmatpush3.bf16.msra.mxu0 %v1874_v23  ;;  %7182 = vmatprep.mubr.msk.bf16.mxu0 %vm1740_vm3, %v1864_v37 }
  0x94   : > { %7186 = vmatprep.subr.bf16.mxu0 %v7973_v39 }
  0x9e   : > { %7183 = vmatmul.mubr.msk.bf16.vlgmr.msra.gmra.mrb[0].mxu0 %vm1740_vm3, %v1866_v38 }
  0x9f   : > { %7190 = vmatprep.mubr.msk.bf16.mxu0 %vm7974_vm6, %v7973_v39  ;;  %7187 = vmatpush3.bf16.msra.mxu0 %v7792_v41 }
  0xa0   : > { %7188 = vmatprep.subr.bf16.mxu0 %v7973_v39 }
  0xa3   : > { %7189 = vmatpush3.bf16.msra.mxu0 %v7794_v43 }
  0xa4   : > { %7210 = vmatprep.subr.bf16.mxu0 %v7973_v39 }
 0x171   : > { %v7184_v45 = vpop.f32.mrb[0].mxu0 }
 0x172   : > { %v1938_v46 = vadd.f32 %v7184_v45, %v6610_v44  ;;  %v1910_v47 = vpop.f32.mrb[1].mxu0 }
 0x173   : > { %v1936_v48 = vadd.f32 %v6610_v44, %v1910_v47  ;;  %v7185_v49 = vpop.f32.mrb[2].mxu0 }
 0x174   : > { %v1942_v50 = vmax.f32 %v1938_v46, 0.0  ;;  %v1939_v51 = vadd.f32 %v7185_v49, %v6610_v44  ;;  %v1913_v52 = vpop.f32.mrb[3].mxu0 }
 0x175   : > { %v1940_v53 = vmax.f32 %v1936_v48, 0.0  ;;  %v1937_v54 = vadd.f32 %v6610_v44, %v1913_v52 }
 0x176   : > { %1949 = vst.msk [vmem:[#allocation2 + $0x11] sm:$0xff] %vm1946_vm7, %v1942_v50  ;;  %v1943_v55 = vmax.f32 %v1939_v51, 0.0 }
 0x177   : > { %1947 = vst.msk [vmem:[#allocation2 + $0x1] sm:$0xff] %vm1946_vm7, %v1940_v53  ;;  %v1941_v56 = vmax.f32 %v1937_v54, 0.0  ;;  %v7803_v54 = vld [vmem:[%s8154_s29 + $0x20] sm:$0xff]  }
 0x178   : > { %1950 = vst.msk [vmem:[#allocation2 + $0x19] sm:$0xff] %vm1946_vm7, %v1943_v55 }
 0x179   : > { %1948 = vst.msk [vmem:[#allocation2 + $0x9] sm:$0xff] %vm1946_vm7, %v1941_v56  ;;  %v7804_v56 = vld [vmem:[%s8154_s29 + $0x28] sm:$0xff]  }
 0x17f   : > { %v1963_v57 = vld [vmem:[#allocation2 + $0x11] ss:$2 sm:$0xff]  ;;  %v2085_v6 = vld [vmem:[#allocation2 + $0x12] ss:$2 sm:$0xff] }
 0x180   : > { %v1961_v59 = vld [vmem:[#allocation2 + $0x1] ss:$2 sm:$0xff]  ;;  %v1952_v61 = vld [vmem:[#allocation2] ss:$2 sm:$0xff]  ;;  %v1954_v63 = vld [vmem:[#allocation2 + $0x10] ss:$2 sm:$0xff] }
 0x181   : > { %v2151_v60 = vld [vmem:[#allocation2 + $0x3] ss:$2 sm:$0xff]  ;;  %v1964_v62 = vpack.c.bf16 %v1963_v57, %v1961_v59  ;;  %2824 = vst.msk [vmem:[#allocation2] sm:$0x1] %vm1944_vm5, %v7973_v39  ;;  %v1955_v1 = vpack.c.bf16 %v1954_v63, %v1952_v61  ;;  %v2153_v4 = vld [vmem:[#allocation2 + $0x13] ss:$2 sm:$0xff] }
 0x182   : > { %2827 = vst.msk [vmem:[#allocation2 + $0x11] sm:$0x1] %vm1944_vm5, %v7973_v39  ;;  %v2083_v5 = vld [vmem:[#allocation2 + $0x2] ss:$2 sm:$0xff]  ;;  %v2154_v7 = vpack.c.bf16 %v2153_v4, %v2151_v60 }
 0x183   : > { %7191 = vmatmul.mubr.msk.bf16.vlgmr.msra.gmra.mrb[4].mxu0 %vm1946_vm7, %v1964_v62  ;;  %7199 = vmatmul.mubr.msk.bf16.vlgmr.msra.gmra.mrb[0].mxu1 %vm1946_vm7, %v1955_v1  ;;  %v2086_v8 = vpack.c.bf16 %v2085_v6, %v2083_v5  ;;  %v7805_v60 = vld [vmem:[%s8159_s12] sm:$0xff]   ;;  %v7806_v61 = vld [vmem:[%s8159_s12 + $0x8] sm:$0xff]  }
 0x184   : > { %7211 = vmatpush3.bf16.msra.mxu0 %v7796_v58  ;;  %7203 = vmatpush3.bf16.msra.mxu1 %v7795_v0 }
 0x185   : > { %7212 = vmatprep.subr.bf16.mxu0 %v7973_v39  ;;  %7204 = vmatprep.subr.bf16.mxu1 %v7973_v39 }
 0x186   : > { %7206 = vmatprep.mubr.msk.bf16.mxu1 %vm7974_vm6, %v7973_v39  ;;  %7214 = vmatprep.mubr.msk.bf16.mxu0 %vm7974_vm6, %v7973_v39 }
 0x188   : > { %7213 = vmatpush3.bf16.msra.mxu0 %v7798_v2  ;;  %7205 = vmatpush3.bf16.msra.mxu1 %v7797_v3 }
 0x189   : > { %7226 = vmatprep.subr.bf16.mxu0 %v7973_v39  ;;  %7218 = vmatprep.subr.bf16.mxu1 %v7973_v39 }
 0x18b   : > { %7215 = vmatmul.mubr.msk.bf16.vlgmr.msra.gmra.mrb[8].mxu0 %vm1946_vm7, %v2154_v7  ;;  %7207 = vmatmul.mubr.msk.bf16.vlgmr.msra.gmra.mrb[4].mxu1 %vm1946_vm7, %v2086_v8 }
 0x18c   : > { %7230 = vmatprep.mubr.msk.bf16.mxu0 %vm7974_vm6, %v7973_v39  ;;  %7222 = vmatprep.mubr.msk.bf16.mxu1 %vm7974_vm6, %v7973_v39 }
 0x18d   : > { %7227 = vmatpush3.bf16.msra.mxu0 %v7799_v9  ;;  %7219 = vmatpush3.bf16.msra.mxu1 %v7801_v11  ;;  %v6653_v9 = vld [vmem:[%s8144_s14] ss:$0 sm:$0xff] }
 0x18e   : > { %7228 = vmatprep.subr.bf16.mxu0 %v7973_v39  ;;  %7220 = vmatprep.subr.bf16.mxu1 %v7973_v39 }
 0x191   : > { %7229 = vmatpush3.bf16.msra.mxu0 %v7800_v10  ;;  %7221 = vmatpush3.bf16.msra.mxu1 %v7802_v12 }
 0x192   : > { %7242 = vmatprep.subr.bf16.mxu0 %v7973_v39  ;;  %7234 = vmatprep.subr.bf16.mxu1 %v7973_v39 }
 0x256   : > { %v2019_v13 = vpop.f32.mrb[4].mxu0  ;;  %v2075_v14 = vpop.f32.mrb[0].mxu1 }
 0x257   : > { %v7192_v15 = vpop.f32.mrb[5].mxu0  ;;  %v2076_v16 = vadd.f32 %v2075_v14, %v2019_v13  ;;  %v7200_v17 = vpop.f32.mrb[1].mxu1 }
 0x258   : > { %v2022_v18 = vpop.f32.mrb[6].mxu0  ;;  %v2078_v19 = vpop.f32.mrb[2].mxu1 }
 0x259   : > { %v7193_v20 = vpop.f32.mrb[7].mxu0  ;;  %v2079_v21 = vadd.f32 %v2078_v19, %v2022_v18  ;;  %v7201_v22 = vpop.f32.mrb[3].mxu1 }
 0x25a   : > { %v7807_v20 = vld [vmem:[%s8174_s27] sm:$0xff]   ;;  %v7809_v22 = vld [vmem:[%s8174_s27 + $0x10] sm:$0xff]  }
 0x25e   : > { %v2209_v23 = vpop.f32.mrb[8].mxu0  ;;  %v2141_v24 = vpop.f32.mrb[4].mxu1 }
 0x25f   : > { %v7216_v25 = vpop.f32.mrb[9].mxu0  ;;  %v2148_v26 = vadd.f32 %v2141_v24, %v2076_v16  ;;  %v7208_v27 = vpop.f32.mrb[5].mxu1  ;;  %v6654_v24 = vld [vmem:[%s8950_s3] ss:$0 sm:$0xff]  ;;  %s8981_s3 = sld [smem:[#allocation23_spill]] }
 0x260   : > { %v2212_v28 = vpop.f32.mrb[10].mxu0  ;;  %v2144_v30 = vpop.f32.mrb[6].mxu1 }
 0x261   : > { %v7217_v31 = vpop.f32.mrb[11].mxu0  ;;  %v2216_v32 = vadd.f32 %v2209_v23, %v2148_v26  ;;  %v2149_v33 = vadd.f32 %v2144_v30, %v2079_v21  ;;  %v7209_v34 = vpop.f32.mrb[7].mxu1  ;;  %v7808_v21 = vld [vmem:[%s8174_s27 + $0x8] sm:$0xff]   ;;  %v7810_v23 = vld [vmem:[%s8174_s27 + $0x18] sm:$0xff]  }
 0x263   : > { %v8360_v35 = vadd.f32 %v6635_v29, %v2216_v32  ;;  %v2217_v36 = vadd.f32 %v2212_v28, %v2149_v33 }
 0x265   : > { %v2227_v37 = vmax.f32 %v8360_v35, 0.0  ;;  %v8363_v38 = vadd.f32 %v6635_v29, %v2217_v36 }
 0x267   : > { %v2231_v40 = vrot.slane %v2227_v37, 7  ;;  %v2228_v41 = vmax.f32 %v8363_v38, 0.0 }
 0x269   : > { %v2232_v42 = vrot.slane %v2228_v41, 7  ;;  %v2237_v43 = vsel %vm1698_vm1, 0.0, %v2231_v40 }
 0x26b   : > { %v2233_v44 = vsel %vm1698_vm1, %v2231_v40, %v2232_v42  ;;  %v2238_v45 = vsel %vm1698_vm1, %v2232_v42, 0.0 }
 0x26c   : > { %v2239_v46 = vpack.c.bf16 %v2233_v44, %v2237_v43  ;;  %v2244_v47 = vpack.c.bf16 %v2238_v45, %v2238_v45 }
 0x26e   : > { %v2258_v48 = vshll.u32 %v2244_v47, 16  ;;  %7231 = vmatmul.mubr.msk.bf16.vlgmr.msra.gmra.mrb[12].mxu0 %vm1946_vm7, %v2239_v46  ;;  %v2253_v49 = vshll.u32 %v2239_v46, 16  ;;  %v2251_v50 = vshrl.u32 %v2239_v46, 16  ;;  %v2381_v57 = vrot.slane %v2244_v47, 1 }
 0x26f   : > { %7246 = vmatprep.mubr.msk.bf16.mxu0 %vm7974_vm6, %v7973_v39  ;;  %v2380_v58 = vrot.slane %v2239_v46, 1  ;;  %7243 = vmatpush3.bf16.msra.mxu0 %v7805_v60  ;;  %v7814_v60 = vld [vmem:[%s8179_s19 + $0x8] sm:$0xff]  }
 0x270   : > { %v2255_v51 = vrot.slane %v2253_v49, 1  ;;  %v2260_v52 = vrot.slane %v2258_v48, 1  ;;  %7244 = vmatprep.subr.bf16.mxu0 %v7973_v39 }
 0x271   : > { %v2382_v59 = vsel %vm1861_vm4, %v2380_v58, %v2381_v57 }
 0x272   : > { %v2256_v53 = vor.u32 %v2255_v51, %v2251_v50 }
 0x273   : > { %7245 = vmatpush3.bf16.msra.mxu0 %v7806_v61 }
 0x274   : > { %v2261_v55 = vsel %vm1719_vm2, %v2256_v53, %v2260_v52  ;;  %7258 = vmatprep.subr.bf16.mxu0 %v7973_v39  ;;  %v7811_v53 = vld [vmem:[%s8174_s27 + $0x20] sm:$0xff]  }
 0x275   : > { %7223 = vmatmul.mubr.msk.bf16.vlgmr.msra.gmra.mrb[8].mxu1 %vm1946_vm7, %v2261_v55  ;;  %v7812_v55 = vld [vmem:[%s8174_s27 + $0x28] sm:$0xff]  }
 0x276   : > { %7235 = vmatpush3.bf16.msra.mxu1 %v7803_v54  ;;  %7238 = vmatprep.mubr.msk.bf16.mxu1 %vm7974_vm6, %v7973_v39 }
 0x277   : > { %7236 = vmatprep.subr.bf16.mxu1 %v7973_v39 }
 0x27a   : > { %7237 = vmatpush3.bf16.msra.mxu1 %v7804_v56 }
 0x27b   : > { %7250 = vmatprep.subr.bf16.mxu1 %v7973_v39 }
 0x27d   : > { %7239 = vmatmul.mubr.msk.bf16.vlgmr.msra.gmra.mrb[12].mxu1 %vm1946_vm7, %v2382_v59  ;;  %v7813_v59 = vld [vmem:[%s8179_s19] sm:$0xff]  }
 0x27e   : > { %7254 = vmatprep.mubr.msk.bf16.mxu1 %vm7974_vm6, %v7973_v39  ;;  %7251 = vmatpush3.bf16.msra.mxu1 %v7809_v22  ;;  %v7818_v22 = vld [vmem:[%s8189_s21 + $0x8] sm:$0xff]  }
 0x27f   : > { %7252 = vmatprep.subr.bf16.mxu1 %v7973_v39 }
 0x282   : > { %7253 = vmatpush3.bf16.msra.mxu1 %v7810_v23  ;;  %v6676_v23 = vld [vmem:[%s8169_s24] ss:$0 sm:$0xff] }
 0x283   : > { %7266 = vmatprep.subr.bf16.mxu1 %v7973_v39 }
 0x341   : > { %v2366_v62 = vpop.f32.mrb[12].mxu0 }
 0x342   : > { %v7232_v63 = vpop.f32.mrb[13].mxu0 }
 0x343   : > { %v2369_v0 = vpop.f32.mrb[14].mxu0 }
 0x344   : > { %v7233_v1 = vpop.f32.mrb[15].mxu0 }
 0x348   : > { %v2311_v2 = vpop.f32.mrb[8].mxu1 }
 0x349   : > { %v2367_v3 = vadd.f32 %v2366_v62, %v2311_v2  ;;  %v7224_v4 = vpop.f32.mrb[9].mxu1 }
 0x34a   : > { %v2314_v5 = vpop.f32.mrb[10].mxu1 }
 0x34b   : > { %v2370_v6 = vadd.f32 %v2369_v0, %v2314_v5  ;;  %v7225_v7 = vpop.f32.mrb[11].mxu1 }
 0x350   : > { %v2432_v8 = vpop.f32.mrb[12].mxu1 }
 0x351   : > { %v2439_v10 = vadd.f32 %v2432_v8, %v2367_v3  ;;  %v7240_v11 = vpop.f32.mrb[13].mxu1  ;;  %v6675_v8 = vld [vmem:[%s8951_s4] ss:$0 sm:$0xff] }
 0x352   : > { %v2435_v12 = vpop.f32.mrb[14].mxu1 }
 0x353   : > { %v2448_v13 = vadd.f32 %v6653_v9, %v2439_v10  ;;  %v2440_v14 = vadd.f32 %v2435_v12, %v2370_v6  ;;  %v7241_v15 = vpop.f32.mrb[15].mxu1 }
 0x355   : > { %v2449_v16 = vadd.f32 %v6653_v9, %v2440_v14  ;;  %v2450_v17 = vmax.f32 %v2448_v13, 0.0 }
 0x357   : > { %v2451_v18 = vmax.f32 %v2449_v16, 0.0 }
 0x359   : > { %v2452_v19 = vpack.c.bf16 %v2451_v18, %v2450_v17 }
 0x35b   : > { %7247 = vmatmul.mubr.msk.bf16.vlgmr.msra.gmra.mrb[16].mxu0 %vm1946_vm7, %v2452_v19  ;;  %v7815_v19 = vld [vmem:[%s8189_s21 + $0x10] sm:$0xff]  }
 0x35c   : > { %7262 = vmatprep.mubr.msk.bf16.mxu0 %vm7974_vm6, %v7973_v39  ;;  %7259 = vmatpush3.bf16.msra.mxu0 %v7807_v20  ;;  %v7816_v20 = vld [vmem:[%s8189_s21] sm:$0xff]  }
 0x35d   : > { %7260 = vmatprep.subr.bf16.mxu0 %v7973_v39 }
 0x360   : > { %7261 = vmatpush3.bf16.msra.mxu0 %v7808_v21  ;;  %v7817_v21 = vld [vmem:[%s8189_s21 + $0x18] sm:$0xff]  }
 0x361   : > { %7274 = vmatprep.subr.bf16.mxu0 %v7973_v39 }
 0x42e   : > { %v2513_v25 = vpop.f32.mrb[16].mxu0 }
 0x42f   : > { %v2514_v26 = vadd.f32 %v6654_v24, %v2513_v25  ;;  %v7248_v27 = vpop.f32.mrb[17].mxu0 }
 0x430   : > { %v2516_v28 = vpop.f32.mrb[18].mxu0 }
 0x431   : > { %v8402_v29 = vadd.f32 %v2514_v26, %v8360_v35  ;;  %v2517_v30 = vadd.f32 %v6654_v24, %v2516_v28  ;;  %v7249_v31 = vpop.f32.mrb[19].mxu0 }
 0x433   : > { %v2522_v32 = vmax.f32 %v8402_v29, 0.0  ;;  %v8406_v33 = vadd.f32 %v2517_v30, %v8363_v38 }
 0x435   : > { %v2526_v34 = vrot.slane %v2522_v32, 5  ;;  %v2523_v36 = vmax.f32 %v8406_v33, 0.0 }
 0x437   : > { %v2527_v37 = vrot.slane %v2523_v36, 5  ;;  %v2532_v40 = vsel %vm1747_vm0, 0.0, %v2526_v34 }
 0x439   : > { %v2528_v41 = vsel %vm1747_vm0, %v2526_v34, %v2527_v37  ;;  %v2533_v42 = vsel %vm1747_vm0, %v2527_v37, 0.0  ;;  %v7819_v34 = vld [vmem:[%s8189_s21 + $0x20] sm:$0xff]  }
 0x43a   : > { %v2534_v35 = vpack.c.bf16 %v2528_v41, %v2532_v40  ;;  %v2539_v43 = vpack.c.bf16 %v2533_v42, %v2533_v42  ;;  %v7820_v40 = vld [vmem:[%s8189_s21 + $0x30] sm:$0xff]  }
 0x43c   : > { %v2555_v44 = vshrl.u32 %v2539_v43, 16  ;;  %v2558_v45 = vshll.u32 %v2539_v43, 16  ;;  %7263 = vmatmul.mubr.msk.bf16.vlgmr.msra.gmra.mrb[20].mxu0 %vm1946_vm7, %v2534_v35  ;;  %v2547_v38 = vshrl.u32 %v2534_v35, 16  ;;  %v2550_v46 = vshll.u32 %v2534_v35, 16 }
 0x43d   : > { %7278 = vmatprep.mubr.msk.bf16.mxu0 %vm7974_vm6, %v7973_v39  ;;  %v2682_v56 = vrot.slane %v2534_v35, 3  ;;  %v2683_v57 = vrot.slane %v2539_v43, 3  ;;  %7275 = vmatpush3.bf16.msra.mxu0 %v7813_v59  ;;  %v7822_v35 = vld [vmem:[%s8189_s21 + $0x38] sm:$0xff]  }
 0x43e   : > { %v2549_v47 = vrot.slane %v2547_v38, 1  ;;  %v2552_v48 = vrot.slane %v2550_v46, 2  ;;  %v2557_v49 = vrot.slane %v2555_v44, 1  ;;  %v2560_v50 = vrot.slane %v2558_v45, 2  ;;  %7276 = vmatprep.subr.bf16.mxu0 %v7973_v39  ;;  %v7823_v38 = vld [vmem:[%s8952_s7] sm:$0xff]   ;;  %v7824_v46 = vld [vmem:[%s8952_s7 + $0x8] sm:$0xff]  }
 0x43f   : > { %v2684_v58 = vsel %vm2681_vm9, %v2682_v56, %v2683_v57 }
 0x440   : > { %v2553_v51 = vor.u32 %v2552_v48, %v2549_v47  ;;  %v2561_v52 = vor.u32 %v2560_v50, %v2557_v49  ;;  %v7825_v47 = vld [vmem:[%s8952_s7 + $0x10] sm:$0xff]   ;;  %v7826_v48 = vld [vmem:[%s8952_s7 + $0x18] sm:$0xff]  }
 0x441   : > { %7277 = vmatpush3.bf16.msra.mxu0 %v7814_v60 }
 0x442   : > { %v2562_v54 = vsel %vm2545_vm8, %v2553_v51, %v2561_v52  ;;  %7290 = vmatprep.subr.bf16.mxu0 %v7973_v39 }
 0x443   : > { %7255 = vmatmul.mubr.msk.bf16.vlgmr.msra.gmra.mrb[16].mxu1 %vm1946_vm7, %v2562_v54 }
 0x444   : > { %7267 = vmatpush3.bf16.msra.mxu1 %v7811_v53  ;;  %7270 = vmatprep.mubr.msk.bf16.mxu1 %vm7974_vm6, %v7973_v39 }
 0x445   : > { %7268 = vmatprep.subr.bf16.mxu1 %v7973_v39 }
 0x448   : > { %7269 = vmatpush3.bf16.msra.mxu1 %v7812_v55 }
 0x449   : > { %7282 = vmatprep.subr.bf16.mxu1 %v7973_v39 }
 0x44b   : > { %7271 = vmatmul.mubr.msk.bf16.vlgmr.msra.gmra.mrb[20].mxu1 %vm1946_vm7, %v2684_v58 }
 0x44c   : > { %7286 = vmatprep.mubr.msk.bf16.mxu1 %vm7974_vm6, %v7973_v39  ;;  %7283 = vmatpush3.bf16.msra.mxu1 %v7815_v19  ;;  %v7829_v19 = vld [vmem:[%s8954_s11] sm:$0xff]  }
 0x44d   : > { %7284 = vmatprep.subr.bf16.mxu1 %v7973_v39 }
 0x450   : > { %7285 = vmatpush3.bf16.msra.mxu1 %v7817_v21 }
 0x451   : > { %7298 = vmatprep.subr.bf16.mxu1 %v7973_v39 }
 0x50f   : > { %v2667_v61 = vpop.f32.mrb[20].mxu0 }
 0x510   : > { %v7264_v62 = vpop.f32.mrb[21].mxu0 }
 0x511   : > { %v2670_v63 = vpop.f32.mrb[22].mxu0 }
 0x512   : > { %v7265_v0 = vpop.f32.mrb[23].mxu0 }
 0x516   : > { %v2612_v1 = vpop.f32.mrb[16].mxu1 }
 0x517   : > { %v2668_v2 = vadd.f32 %v2667_v61, %v2612_v1  ;;  %v7256_v3 = vpop.f32.mrb[17].mxu1 }
 0x518   : > { %v2615_v4 = vpop.f32.mrb[18].mxu1 }
 0x519   : > { %v2671_v5 = vadd.f32 %v2670_v63, %v2615_v4  ;;  %v7257_v6 = vpop.f32.mrb[19].mxu1  ;;  %v6704_v63 = vld [vmem:[%s8953_s10] ss:$0 sm:$0xff]  ;;  %s8962_s10 = sld [smem:[#allocation43_spill]] }
 0x51e   : > { %v2734_v7 = vpop.f32.mrb[20].mxu1 }
 0x51f   : > { %v2741_v9 = vadd.f32 %v2734_v7, %v2668_v2  ;;  %v7272_v10 = vpop.f32.mrb[21].mxu1 }
 0x520   : > { %v2737_v11 = vpop.f32.mrb[22].mxu1 }
 0x521   : > { %v2750_v12 = vadd.f32 %v6675_v8, %v2741_v9  ;;  %v2742_v13 = vadd.f32 %v2737_v11, %v2671_v5  ;;  %v7273_v14 = vpop.f32.mrb[23].mxu1 }
 0x523   : > { %v2751_v15 = vadd.f32 %v6675_v8, %v2742_v13  ;;  %v2752_v16 = vmax.f32 %v2750_v12, 0.0 }
 0x525   : > { %v2753_v17 = vmax.f32 %v2751_v15, 0.0  ;;  %v7827_v15 = vld [vmem:[%s8952_s7 + $0x20] sm:$0xff]  }
 0x527   : > { %v2754_v18 = vpack.c.bf16 %v2753_v17, %v2752_v16  ;;  %v7828_v17 = vld [vmem:[%s8952_s7 + $0x28] sm:$0xff]  }
 0x529   : > { %7279 = vmatmul.mubr.msk.bf16.vlgmr.msra.gmra.mrb[24].mxu0 %vm1946_vm7, %v2754_v18 }
 0x52a   : > { %7294 = vmatprep.mubr.msk.bf16.mxu0 %vm7974_vm6, %v7973_v39  ;;  %7291 = vmatpush3.bf16.msra.mxu0 %v7816_v20  ;;  %v7830_v20 = vld [vmem:[%s8954_s11 + $0x8] sm:$0xff]  }
 0x52b   : > { %7292 = vmatprep.subr.bf16.mxu0 %v7973_v39 }
 0x52e   : > { %7293 = vmatpush3.bf16.msra.mxu0 %v7818_v22 }
 0x52f   : > { %7306 = vmatprep.subr.bf16.mxu0 %v7973_v39 }
 0x5fc   : > { %v2815_v24 = vpop.f32.mrb[24].mxu0 }
 0x5fd   : > { %v2816_v25 = vadd.f32 %v6676_v23, %v2815_v24  ;;  %v7280_v26 = vpop.f32.mrb[25].mxu0 }
 0x5fe   : > { %v2818_v27 = vpop.f32.mrb[26].mxu0 }
 0x5ff   : > { %v2822_v28 = vadd.f32 %v2816_v25, %v8402_v29  ;;  %v2819_v30 = vadd.f32 %v6676_v23, %v2818_v27  ;;  %v7281_v31 = vpop.f32.mrb[27].mxu0  ;;  %v7821_v29 = vld [vmem:[%s8189_s21 + $0x28] sm:$0xff]  }
 0x601   : > { %2825 = vst.msk [vmem:[#allocation2 + $0x1] sm:$0xff] %vm1946_vm7, %v2822_v28  ;;  %v2823_v32 = vadd.f32 %v2819_v30, %v8406_v33 }
 0x603   : > { %2826 = vst.msk [vmem:[#allocation2 + $0x9] sm:$0xff] %vm1946_vm7, %v2823_v32  ;;  %v6722_v32 = vld [vmem:[%s8955_s15] ss:$0 sm:$0xff]  ;;  %s8963_s15 = sld [smem:[#allocation3_spill]] }
 0x60a   : > { %v2834_v36 = vld [vmem:[#allocation2 + $0x1] ss:$2 sm:$0xff]  ;;  %v2828_v37 = vld [vmem:[#allocation2] ss:$2 sm:$0xff] }
 0x60b   : > { %v2835_v41 = vpack.c.bf16 %v2834_v36, %v2834_v36  ;;  %v2829_v42 = vpack.c.bf16 %v2828_v37, %v2828_v37  ;;  %v2951_v33 = vld [vmem:[#allocation2 + $0x2] ss:$2 sm:$0xff]  ;;  %v3014_v43 = vld [vmem:[#allocation2 + $0x3] ss:$2 sm:$0xff] }
 0x60c   : > { %v2952_v44 = vpack.c.bf16 %v2951_v33, %v2951_v33  ;;  %v3015_v45 = vpack.c.bf16 %v3014_v43, %v3014_v43  ;;  %v7832_v33 = vld [vmem:[%s8956_s16 + $0x8] sm:$0xff]   ;;  %v7833_v43 = vld [vmem:[%s8956_s16 + $0x10] sm:$0xff]  }
 0x60d   : > { %7287 = vmatmul.mubr.msk.bf16.vlgmr.msra.gmra.mrb[24].mxu1 %vm1946_vm7, %v2835_v41  ;;  %7295 = vmatmul.mubr.msk.bf16.vlgmr.msra.gmra.mrb[28].mxu0 %vm1946_vm7, %v2829_v42 }
 0x60e   : > { %7299 = vmatpush3.bf16.msra.mxu1 %v7819_v34  ;;  %7307 = vmatpush3.bf16.msra.mxu0 %v7820_v40 }
 0x60f   : > { %7300 = vmatprep.subr.bf16.mxu1 %v7973_v39  ;;  %7308 = vmatprep.subr.bf16.mxu0 %v7973_v39 }
 0x610   : > { %7302 = vmatprep.mubr.msk.bf16.mxu1 %vm7974_vm6, %v7973_v39  ;;  %7310 = vmatprep.mubr.msk.bf16.mxu0 %vm7974_vm6, %v7973_v39 }
 0x612   : > { %7301 = vmatpush3.bf16.msra.mxu1 %v7821_v29  ;;  %7309 = vmatpush3.bf16.msra.mxu0 %v7822_v35  ;;  %v7831_v35 = vld [vmem:[%s8956_s16] sm:$0xff]  }
 0x613   : > { %7322 = vmatprep.subr.bf16.mxu0 %v7973_v39  ;;  %7314 = vmatprep.subr.bf16.mxu1 %v7973_v39 }
 0x615   : > { %7303 = vmatmul.mubr.msk.bf16.vlgmr.msra.gmra.mrb[28].mxu1 %vm1946_vm7, %v2952_v44  ;;  %7311 = vmatmul.mubr.msk.bf16.vlgmr.msra.gmra.mrb[32].mxu0 %vm1946_vm7, %v3015_v45  ;;  %v7834_v44 = vld [vmem:[%s8956_s16 + $0x18] sm:$0xff]   ;;  %v6723_v45 = vld [vmem:[%s8957_s18] ss:$0 sm:$0xff]  ;;  %s8964_s18 = sld [smem:[#allocation4_spill]] }
 0x616   : > { %7326 = vmatprep.mubr.msk.bf16.mxu0 %vm7974_vm6, %v7973_v39  ;;  %7318 = vmatprep.mubr.msk.bf16.mxu1 %vm7974_vm6, %v7973_v39 }
 0x617   : > { %7323 = vmatpush3.bf16.msra.mxu0 %v7823_v38  ;;  %7315 = vmatpush3.bf16.msra.mxu1 %v7825_v47 }
 0x618   : > { %7324 = vmatprep.subr.bf16.mxu0 %v7973_v39  ;;  %7316 = vmatprep.subr.bf16.mxu1 %v7973_v39 }
 0x61b   : > { %7325 = vmatpush3.bf16.msra.mxu0 %v7824_v46  ;;  %7317 = vmatpush3.bf16.msra.mxu1 %v7826_v48 }
 0x61c   : > { %7338 = vmatprep.subr.bf16.mxu0 %v7973_v39  ;;  %7330 = vmatprep.subr.bf16.mxu1 %v7973_v39 }
 0x6e0   : > { %v2890_v49 = vpop.f32.mrb[24].mxu1  ;;  %v2945_v50 = vpop.f32.mrb[28].mxu0 }
 0x6e1   : > { %v2946_v51 = vadd.f32 %v2945_v50, %v2890_v49  ;;  %v7288_v52 = vpop.f32.mrb[25].mxu1  ;;  %v7296_v53 = vpop.f32.mrb[29].mxu0 }
 0x6e2   : > { %v2893_v54 = vpop.f32.mrb[26].mxu1  ;;  %v2948_v55 = vpop.f32.mrb[30].mxu0 }
 0x6e3   : > { %v7289_v56 = vpop.f32.mrb[27].mxu1  ;;  %v7297_v57 = vpop.f32.mrb[31].mxu0 }
 0x6e8   : > { %v3007_v58 = vpop.f32.mrb[28].mxu1  ;;  %v3070_v59 = vpop.f32.mrb[32].mxu0 }
 0x6e9   : > { %v3013_v60 = vadd.f32 %v3007_v58, %v2946_v51  ;;  %v7304_v61 = vpop.f32.mrb[29].mxu1  ;;  %v7312_v62 = vpop.f32.mrb[33].mxu0 }
 0x6ea   : > { %v3010_v0 = vpop.f32.mrb[30].mxu1  ;;  %v3073_v1 = vpop.f32.mrb[34].mxu0  ;;  %v7835_v61 = vld [vmem:[%s8956_s16 + $0x20] sm:$0xff]  }
 0x6eb   : > { %v3076_v2 = vadd.f32 %v3070_v59, %v3013_v60  ;;  %v7305_v3 = vpop.f32.mrb[31].mxu1  ;;  %v7313_v4 = vpop.f32.mrb[35].mxu0  ;;  %v7837_v1 = vld [vmem:[%s8958_s22] sm:$0xff]  }
 0x6ed   : > { %v8477_v5 = vadd.f32 %v6704_v63, %v3076_v2  ;;  %v7836_v63 = vld [vmem:[%s8956_s16 + $0x28] sm:$0xff]  }
 0x6ee   : > { %v7838_v2 = vld [vmem:[%s8958_s22 + $0x8] sm:$0xff]  }
 0x6ef   : > { %v3085_v6 = vmax.f32 %v8477_v5, 0.0 }
 0x6f1   : > { %v3087_v7 = vrot.slane %v3085_v6, 7 }
 0x6f3   : > { %v3089_v8 = vsel %vm1698_vm1, 0.0, %v3087_v7  ;;  %v3090_v9 = vsel %vm1698_vm1, %v3087_v7, 0.0 }
 0x6f4   : > { %v3091_v10 = vpack.c.bf16 %v3089_v8, %v3089_v8  ;;  %v3096_v11 = vpack.c.bf16 %v3090_v9, %v3089_v8 }
 0x6f6   : > { %v3105_v12 = vshll.u32 %v3096_v11, 16  ;;  %7327 = vmatmul.mubr.msk.bf16.vlgmr.msra.gmra.mrb[36].mxu0 %vm1946_vm7, %v3091_v10  ;;  %v3103_v13 = vshrl.u32 %v3096_v11, 16  ;;  %v3225_v18 = vrot.slane %v3096_v11, 1 }
 0x6f7   : > { %7342 = vmatprep.mubr.msk.bf16.mxu0 %vm7974_vm6, %v7973_v39  ;;  %7339 = vmatpush3.bf16.msra.mxu0 %v7829_v19 }
 0x6f8   : > { %v3107_v14 = vrot.slane %v3105_v12, 1  ;;  %7340 = vmatprep.subr.bf16.mxu0 %v7973_v39 }
 0x6fa   : > { %v3108_v16 = vor.u32 %v3107_v14, %v3103_v13  ;;  %v6744_v13 = vld [vmem:[%s8959_s23] ss:$0 sm:$0xff]  ;;  %s8965_s23 = sld [smem:[#allocation7_spill]] }
 0x6fb   : > { %7341 = vmatpush3.bf16.msra.mxu0 %v7830_v20 }
 0x6fc   : > { %7319 = vmatmul.mubr.msk.bf16.vlgmr.msra.gmra.mrb[32].mxu1 %vm1946_vm7, %v3108_v16  ;;  %7354 = vmatprep.subr.bf16.mxu0 %v7973_v39 }
 0x6fd   : > { %7331 = vmatpush3.bf16.msra.mxu1 %v7827_v15  ;;  %7334 = vmatprep.mubr.msk.bf16.mxu1 %vm7974_vm6, %v7973_v39 }
 0x6fe   : > { %7332 = vmatprep.subr.bf16.mxu1 %v7973_v39 }
 0x701   : > { %7333 = vmatpush3.bf16.msra.mxu1 %v7828_v17 }
 0x702   : > { %7346 = vmatprep.subr.bf16.mxu1 %v7973_v39 }
 0x704   : > { %7335 = vmatmul.mubr.msk.bf16.vlgmr.msra.gmra.mrb[36].mxu1 %vm1946_vm7, %v3225_v18 }
 0x705   : > { %7350 = vmatprep.mubr.msk.bf16.mxu1 %vm7974_vm6, %v7973_v39  ;;  %7347 = vmatpush3.bf16.msra.mxu1 %v7833_v43 }
 0x706   : > { %7348 = vmatprep.subr.bf16.mxu1 %v7973_v39 }
 0x709   : > { %7349 = vmatpush3.bf16.msra.mxu1 %v7834_v44  ;;  %v7844_v44 = vld [vmem:[%s8249_s9 + $0x28] sm:$0xff]  }
 0x70a   : > { %7362 = vmatprep.subr.bf16.mxu1 %v7973_v39 }
 0x7c9   : > { %v3213_v21 = vpop.f32.mrb[36].mxu0 }
 0x7ca   : > { %v7328_v22 = vpop.f32.mrb[37].mxu0 }
 0x7cb   : > { %v3216_v23 = vpop.f32.mrb[38].mxu0  ;;  %v7840_v22 = vld [vmem:[%s8249_s9 + $0x8] sm:$0xff]  }
 0x7cc   : > { %v7329_v24 = vpop.f32.mrb[39].mxu0  ;;  %v7841_v23 = vld [vmem:[%s8249_s9 + $0x10] sm:$0xff]  }
 0x7cd   : > { %v7842_v24 = vld [vmem:[%s8249_s9 + $0x18] sm:$0xff]  }
 0x7cf   : > { %v3158_v25 = vpop.f32.mrb[32].mxu1 }
 0x7d0   : > { %v3214_v26 = vadd.f32 %v3213_v21, %v3158_v25  ;;  %v7320_v27 = vpop.f32.mrb[33].mxu1  ;;  %v7839_v21 = vld [vmem:[%s8249_s9] sm:$0xff]  }
 0x7d1   : > { %v3161_v28 = vpop.f32.mrb[34].mxu1  ;;  %v6745_v25 = vld [vmem:[%s8960_s26] ss:$0 sm:$0xff]  ;;  %s1672_s26 = scalar_lea.vmem %s8259_s13, %s8993_s1 }
 0x7d2   : > { %v7321_v30 = vpop.f32.mrb[35].mxu1 }
 0x7d7   : > { %v3275_v31 = vpop.f32.mrb[36].mxu1 }
 0x7d8   : > { %v3281_v34 = vadd.f32 %v3275_v31, %v3214_v26  ;;  %v7336_v36 = vpop.f32.mrb[37].mxu1 }
 0x7d9   : > { %v3278_v37 = vpop.f32.mrb[38].mxu1 }
 0x7da   : > { %v3289_v40 = vadd.f32 %v6722_v32, %v3281_v34  ;;  %v7337_v41 = vpop.f32.mrb[39].mxu1 }
 0x7dc   : > { %v3290_v42 = vmax.f32 %v3289_v40, 0.0 }
 0x7de   : > { %v3291_v29 = vpack.c.bf16 %v3290_v42, %v3290_v42 }
 0x7e0   : > { %7343 = vmatmul.mubr.msk.bf16.vlgmr.msra.gmra.mrb[40].mxu0 %vm1946_vm7, %v3291_v29 }
 0x7e1   : > { %7358 = vmatprep.mubr.msk.bf16.mxu0 %vm7974_vm6, %v7973_v39  ;;  %7355 = vmatpush3.bf16.msra.mxu0 %v7831_v35 }
 0x7e2   : > { %7356 = vmatprep.subr.bf16.mxu0 %v7973_v39 }
 0x7e5   : > { %7357 = vmatpush3.bf16.msra.mxu0 %v7832_v33  ;;  %v7843_v33 = vld [vmem:[%s8249_s9 + $0x20] sm:$0xff]  }
 0x7e6   : > { %7370 = vmatprep.subr.bf16.mxu0 %v7973_v39 }
 0x8b3   : > { %v3352_v38 = vpop.f32.mrb[40].mxu0 }
 0x8b4   : > { %v3353_v46 = vadd.f32 %v6723_v45, %v3352_v38  ;;  %v7344_v47 = vpop.f32.mrb[41].mxu0  ;;  %v7845_v38 = vld [vmem:[%s8961_s2] sm:$0xff]  }
 0x8b5   : > { %v3355_v48 = vpop.f32.mrb[42].mxu0 }
 0x8b6   : > { %v8513_v49 = vadd.f32 %v3353_v46, %v8477_v5  ;;  %v7345_v50 = vpop.f32.mrb[43].mxu0  ;;  %v7846_v46 = vld [vmem:[%s8961_s2 + $0x8] sm:$0xff]   ;;  %s8971_s2 = sld [smem:[#allocation13_spill]] }
 0x8b8   : > { %v3359_v51 = vmax.f32 %v8513_v49, 0.0 }
 0x8ba   : > { %v3361_v52 = vrot.slane %v3359_v51, 5 }
 0x8bc   : > { %v3363_v53 = vsel %vm1747_vm0, 0.0, %v3361_v52  ;;  %v3364_v54 = vsel %vm1747_vm0, %v3361_v52, 0.0 }
 0x8bd   : > { %v3365_v55 = vpack.c.bf16 %v3363_v53, %v3363_v53  ;;  %v3370_v56 = vpack.c.bf16 %v3364_v54, %v3363_v53 }
 0x8bf   : > { %v3377_v57 = vshrl.u32 %v3370_v56, 16  ;;  %v3380_v58 = vshll.u32 %v3370_v56, 16  ;;  %7359 = vmatmul.mubr.msk.bf16.vlgmr.msra.gmra.mrb[44].mxu0 %vm1946_vm7, %v3365_v55  ;;  %v3500_v0 = vrot.slane %v3370_v56, 3 }
 0x8c0   : > { %7374 = vmatprep.mubr.msk.bf16.mxu0 %vm7974_vm6, %v7973_v39  ;;  %7371 = vmatpush3.bf16.msra.mxu0 %v7837_v1 }
 0x8c1   : > { %v3379_v59 = vrot.slane %v3377_v57, 1  ;;  %v3382_v60 = vrot.slane %v3380_v58, 2  ;;  %7372 = vmatprep.subr.bf16.mxu0 %v7973_v39  ;;  %v6766_v57 = vld [vmem:[%s8962_s10] ss:$0 sm:$0xff]  ;;  %s8966_s10 = sld [smem:[#allocation14_spill]] }
 0x8c3   : > { %v3383_v62 = vor.u32 %v3382_v60, %v3379_v59 }
 0x8c4   : > { %7373 = vmatpush3.bf16.msra.mxu0 %v7838_v2  ;;  %v1677_v2 = vld [vmem:[%s8963_s15] sm:$0xff] }
 0x8c5   : > { %7351 = vmatmul.mubr.msk.bf16.vlgmr.msra.gmra.mrb[40].mxu1 %vm1946_vm7, %v3383_v62  ;;  %7386 = vmatprep.subr.bf16.mxu0 %v7973_v39 }
 0x8c6   : > { %7363 = vmatpush3.bf16.msra.mxu1 %v7835_v61  ;;  %7366 = vmatprep.mubr.msk.bf16.mxu1 %vm7974_vm6, %v7973_v39 }
 0x8c7   : > { %7364 = vmatprep.subr.bf16.mxu1 %v7973_v39 }
 0x8ca   : > { %7365 = vmatpush3.bf16.msra.mxu1 %v7836_v63 }
 0x8cb   : > { %7378 = vmatprep.subr.bf16.mxu1 %v7973_v39 }
 0x8cd   : > { %7367 = vmatmul.mubr.msk.bf16.vlgmr.msra.gmra.mrb[44].mxu1 %vm1946_vm7, %v3500_v0 }
 0x8ce   : > { %7382 = vmatprep.mubr.msk.bf16.mxu1 %vm7974_vm6, %v7973_v39  ;;  %7379 = vmatpush3.bf16.msra.mxu1 %v7841_v23 }
 0x8cf   : > { %7380 = vmatprep.subr.bf16.mxu1 %v7973_v39 }
 0x8d2   : > { %7381 = vmatpush3.bf16.msra.mxu1 %v7842_v24 }
 0x8d3   : > { %7394 = vmatprep.subr.bf16.mxu1 %v7973_v39 }
 0x992   : > { %v3488_v3 = vpop.f32.mrb[44].mxu0 }
 0x993   : > { %v7360_v4 = vpop.f32.mrb[45].mxu0 }
 0x994   : > { %v3491_v5 = vpop.f32.mrb[46].mxu0  ;;  %v1679_v4 = vld [vmem:[%s8963_s15 + $0x10] sm:$0xff] }
 0x995   : > { %v7361_v6 = vpop.f32.mrb[47].mxu0  ;;  %v7975_v5 = vmov 0.0|0.0  }
 0x998   : > { %v3433_v7 = vpop.f32.mrb[40].mxu1 }
 0x999   : > { %v3489_v8 = vadd.f32 %v3488_v3, %v3433_v7  ;;  %v7352_v9 = vpop.f32.mrb[41].mxu1  ;;  %v1678_v3 = vld [vmem:[%s8963_s15 + $0x8] sm:$0xff]  ;;  %v1680_v7 = vld [vmem:[%s8963_s15 + $0x18] sm:$0xff] }
 0x99a   : > { %v3436_v10 = vpop.f32.mrb[42].mxu1  ;;  %v7678_v6 = vpack.c.bf16 %v1678_v3, %v1677_v2  ;;  %v1681_v9 = vld [vmem:[%s8963_s15 + $0x20] sm:$0xff] }
 0x99b   : > { %v7353_v11 = vpop.f32.mrb[43].mxu1  ;;  %v1682_v10 = vld [vmem:[%s8963_s15 + $0x28] sm:$0xff] }
 0x99c   : > { %v7684_v11 = vpack.c.bf16 %v1682_v10, %v1681_v9 }
 0x9a0   : > { %v3550_v12 = vpop.f32.mrb[44].mxu1 }
 0x9a1   : > { %v3556_v14 = vadd.f32 %v3550_v12, %v3489_v8  ;;  %v7368_v15 = vpop.f32.mrb[45].mxu1  ;;  %v7681_v8 = vpack.c.bf16 %v1680_v7, %v1679_v4  ;;  %v1683_v12 = vld [vmem:[%s8963_s15 + $0x30] sm:$0xff] }
 0x9a2   : > { %v3553_v16 = vpop.f32.mrb[46].mxu1  ;;  %v6770_v15 = vld [vmem:[%s8964_s18] ss:$0 sm:$0xff]  ;;  %s8967_s18 = sld [smem:[#allocation6_spill]] }
 0x9a3   : > { %v3564_v17 = vadd.f32 %v6744_v13, %v3556_v14  ;;  %v7369_v18 = vpop.f32.mrb[47].mxu1  ;;  %v1684_v13 = vld [vmem:[%s8963_s15 + $0x38] sm:$0xff] }
 0x9a4   : > { %v7687_v14 = vpack.c.bf16 %v1684_v13, %v1683_v12 }
 0x9a5   : > { %v3565_v19 = vmax.f32 %v3564_v17, 0.0 }
 0x9a7   : > { %v3566_v20 = vpack.c.bf16 %v3565_v19, %v3565_v19 }
 0x9a9   : > { %7375 = vmatmul.mubr.msk.bf16.vlgmr.msra.gmra.mrb[48].mxu0 %vm1946_vm7, %v3566_v20 }
 0x9aa   : > { %7390 = vmatprep.mubr.msk.bf16.mxu0 %vm7974_vm6, %v7973_v39  ;;  %7387 = vmatpush3.bf16.msra.mxu0 %v7839_v21 }
 0x9ab   : > { %7388 = vmatprep.subr.bf16.mxu0 %v7973_v39 }
 0x9ae   : > { %7389 = vmatpush3.bf16.msra.mxu0 %v7840_v22 }
 0x9af   : > { %7402 = vmatprep.subr.bf16.mxu0 %v7973_v39 }
 0xa7c   : > { %v3627_v26 = vpop.f32.mrb[48].mxu0 }
 0xa7d   : > { %v3628_v27 = vadd.f32 %v6745_v25, %v3627_v26  ;;  %v7376_v28 = vpop.f32.mrb[49].mxu0  ;;  %v3911_v25 = vlaneseq }
 0xa7e   : > { %v3630_v30 = vpop.f32.mrb[50].mxu0 }
 0xa7f   : > { %v3633_v31 = vadd.f32 %v3628_v27, %v8513_v49  ;;  %v7377_v32 = vpop.f32.mrb[51].mxu0  ;;  %v3912_v26 = vand.u32 127, %v3911_v25 }
 0xa81   : > { %v3635_v34 = vrot.slane %v3633_v31, 7 }
 0xa83   : > { %v3637_v36 = vsel %vm1698_vm1, 0.0, %v3635_v34  ;;  %v3638_v37 = vsel %vm1698_vm1, %v3635_v34, 0.0 }
 0xa84   : > { %v3639_v40 = vpack.c.bf16 %v3637_v36, %v3637_v36  ;;  %v3644_v41 = vpack.c.bf16 %v3638_v37, %v3637_v36 }
 0xa86   : > { %v3653_v42 = vshll.u32 %v3644_v41, 16  ;;  %7391 = vmatmul.mubr.msk.bf16.vlgmr.msra.gmra.mrb[52].mxu0 %vm1946_vm7, %v3639_v40  ;;  %v3651_v29 = vshrl.u32 %v3644_v41, 16  ;;  %v3773_v45 = vrot.slane %v3644_v41, 1  ;;  %v7847_v41 = vld [vmem:[%s8965_s23 + $0x20] sm:$0xff]  }
 0xa87   : > { %7406 = vmatprep.mubr.msk.bf16.mxu0 %vm7974_vm6, %v7973_v39  ;;  %7403 = vmatpush3.bf16.msra.mxu0 %v7845_v38 }
 0xa88   : > { %v3655_v35 = vrot.slane %v3653_v42, 1  ;;  %7404 = vmatprep.subr.bf16.mxu0 %v7973_v39  ;;  %v7848_v42 = vld [vmem:[%s8965_s23 + $0x10] sm:$0xff]  }
 0xa8a   : > { %v3656_v43 = vor.u32 %v3655_v35, %v3651_v29  ;;  %v7849_v29 = vld [vmem:[%s8965_s23 + $0x28] sm:$0xff]   ;;  %v7850_v35 = vld [vmem:[%s8965_s23 + $0x18] sm:$0xff]  }
 0xa8b   : > { %7405 = vmatpush3.bf16.msra.mxu0 %v7846_v46 }
 0xa8c   : > { %7383 = vmatmul.mubr.msk.bf16.vlgmr.msra.gmra.mrb[48].mxu1 %vm1946_vm7, %v3656_v43  ;;  %7429 = vmatprep.subr.bf16.mxu0 %v7973_v39 }
 0xa8d   : > { %7395 = vmatpush3.bf16.msra.mxu1 %v7843_v33  ;;  %7398 = vmatprep.mubr.msk.bf16.mxu1 %vm7974_vm6, %v7973_v39 }
 0xa8e   : > { %7396 = vmatprep.subr.bf16.mxu1 %v7973_v39 }
 0xa91   : > { %7397 = vmatpush3.bf16.msra.mxu1 %v7844_v44 }
 0xa92   : > { %7677 = vmatprep.subr.bf16.mxu1 %v7975_v5 }
 0xa94   : > { %7399 = vmatmul.mubr.msk.bf16.vlgmr.msra.gmra.mrb[52].mxu1 %vm1946_vm7, %v3773_v45 }
 0xa95   : > { %7426 = vmatprep.mubr.msk.f32.mxu1 %vm7974_vm6, %v7973_v39  ;;  %7679 = vmatpush3.bf16.msra.mxu1 %v7678_v6 }
 0xa96   : > { %7680 = vmatprep.subr.bf16.mxu1 %v7975_v5 }
 0xa99   : > { %7682 = vmatpush3.bf16.msra.mxu1 %v7681_v8 }
 0xa9a   : > { %7683 = vmatprep.subr.bf16.mxu1 %v7975_v5 }
 0xa9d   : > { %7685 = vmatpush3.bf16.msra.mxu1 %v7684_v11 }
 0xa9e   : > { %7686 = vmatprep.subr.bf16.mxu1 %v7975_v5 }
 0xaa1   : > { %7688 = vmatpush3.bf16.msra.mxu1 %v7687_v14 }
 0xaa2   : > { %7445 = vmatprep.subr.bf16.mxu1 %v7973_v39 }
 0xb59   : > { %v3761_v47 = vpop.f32.mrb[52].mxu0 }
 0xb5a   : > { %v7392_v48 = vpop.f32.mrb[53].mxu0 }
 0xb5b   : > { %v3764_v49 = vpop.f32.mrb[54].mxu0 }
 0xb5c   : > { %v7393_v50 = vpop.f32.mrb[55].mxu0 }
 0xb5f   : > { %v3706_v51 = vpop.f32.mrb[48].mxu1 }
 0xb60   : > { %v3762_v52 = vadd.f32 %v3761_v47, %v3706_v51  ;;  %v7384_v53 = vpop.f32.mrb[49].mxu1 }
 0xb61   : > { %v3709_v54 = vpop.f32.mrb[50].mxu1 }
 0xb62   : > { %v7385_v55 = vpop.f32.mrb[51].mxu1  ;;  %v7851_v54 = vld [vmem:[%s8965_s23] sm:$0xff]  }
 0xb67   : > { %v3823_v56 = vpop.f32.mrb[52].mxu1 }
 0xb68   : > { %v3829_v58 = vadd.f32 %v3823_v56, %v3762_v52  ;;  %v7400_v59 = vpop.f32.mrb[53].mxu1  ;;  %v7852_v56 = vld [vmem:[%s8965_s23 + $0x8] sm:$0xff]  }
 0xb69   : > { %v3826_v60 = vpop.f32.mrb[54].mxu1  ;;  %v7854_v59 = vld [vmem:[%s8966_s10 + $0x8] sm:$0xff]  }
 0xb6a   : > { %v8568_v61 = vadd.f32 %v6766_v57, %v3829_v58  ;;  %v7401_v62 = vpop.f32.mrb[55].mxu1  ;;  %v7853_v58 = vld [vmem:[%s8966_s10] sm:$0xff]   ;;  %v7855_v60 = vld [vmem:[%s8966_s10 + $0x10] sm:$0xff]  }
 0xb6c   : > { %v3842_v63 = vpack.c.bf16 %v8568_v61, %v8568_v61  ;;  %v3838_v0 = vmul.f32 %v8568_v61, %v8568_v61 }
 0xb6e   : > { %7407 = vmatmul.mubr.msk.bf16.vlgmr.msra.gmra.mrb[56].mxu0 %vm1946_vm7, %v3842_v63  ;;  %v3839_v1 = vsel %vm1946_vm7, %v3838_v0, 0.0 }
 0xb6f   : > { %3840 = vadd.xlane.f32.xlu0 %v3839_v1  ;;  %7433 = vmatprep.mubr.msk.bf16.mxu0 %vm7974_vm6, %v7973_v39 }
 0xb70   : > { %7430 = vmatpush3.bf16.msra.mxu0 %v7848_v42 }
 0xb71   : > { %7431 = vmatprep.subr.bf16.mxu0 %v7973_v39 }
 0xb74   : > { %7432 = vmatpush3.bf16.msra.mxu0 %v7850_v35 }
 0xb75   : > { %7437 = vmatprep.subr.bf16.mxu0 %v7973_v39 }
 0xbfc   : > { %v3841_v16 = vpop.xlane.xlu0 %3840 }
 0xbfd   : > { %v3904_v18 = vadd.f32 %v6770_v15, %v3841_v16  ;;  %v6790_v16 = vld [vmem:[%s8967_s18] ss:$0 sm:$0xff]  ;;  %s8968_s18 = sld [smem:[#allocation15_spill]] }
 0xc03   : > { %v7860_v42 = vld [vmem:[%s8968_s18 + $0x8] sm:$0xff]  }
 0xc41   : > { %v3892_v17 = vpop.f32.mrb[56].mxu0 }
 0xc42   : > { %v3905_v19 = vmul.f32 2.0, %v3892_v17  ;;  %v7408_v20 = vpop.f32.mrb[57].mxu0 }
 0xc43   : > { %v3895_v21 = vpop.f32.mrb[58].mxu0 }
 0xc44   : > { %v7409_v22 = vpop.f32.mrb[59].mxu0  ;;  %v3906_v23 = vsub.f32 %v3904_v18, %v3905_v19 }
 0xc46   : > { %v3908_v24 = vsel %vm3907_vm10, %v3906_v23, inf }
 0xc47   : > { %3909 = vmin.index.xlane.f32.xlu0 %v3908_v24 }
 0xcd4   : > { %v3910_v27 = vpop.xlane.xlu0 %3909 }
 0xcd5   : > { %vm3913_vm11 = vcmp.eq.s32.totalorder %v3912_v26, %v3910_v27 }
 0xcd6   : > { %v6771_v28 = vsel %vm3913_vm11, 1.0, %v7973_v39 }
 0xcd7   : > { %v3989_v30 = vsel %vm3907_vm10, %v6771_v28, 0.0  ;;  %7427 = vmatmul.mubr.msk.f32.vlgmr.msra.gmra.mrb[56].mxu1 %vm3907_vm10, %v6771_v28 }
 0xcd8   : > { %v3990_v31 = vrot.slane %v3989_v30, 4  ;;  %7449 = vmatprep.mubr.msk.bf16.mxu1 %vm7974_vm6, %v7973_v39  ;;  %7446 = vmatpush3.bf16.msra.mxu1 %v7847_v41  ;;  %v7859_v41 = vld [vmem:[%s8968_s18] sm:$0xff]  }
 0xcd9   : > { %7447 = vmatprep.subr.bf16.mxu1 %v7973_v39 }
 0xcda   : > { %v3991_v32 = vadd.f32 %v3990_v31, %v3989_v30 }
 0xcdc   : > { %v3992_v34 = vrot.slane %v3991_v32, 2  ;;  %7448 = vmatpush3.bf16.msra.mxu1 %v7849_v29 }
 0xcdd   : > { %7461 = vmatprep.subr.bf16.mxu1 %v7973_v39 }
 0xcde   : > { %v3993_v36 = vadd.f32 %v3992_v34, %v3991_v32  ;;  %v7857_v34 = vld [vmem:[%s8966_s10 + $0x20] sm:$0xff]  }
 0xce0   : > { %v3994_v37 = vrot.slane %v3993_v36, 1 }
 0xce2   : > { %v3995_v40 = vadd.f32 %v3994_v37, %v3993_v36  ;;  %v7858_v37 = vld [vmem:[%s8966_s10 + $0x28] sm:$0xff]  }
 0xce4   : > { %3997 = vst.msk [vmem:[%s1672_s26] sm:$0x1] %vm3996_vm12, %v3995_v40  ;;  %s1675_s26 = scalar_lea.vmem %s8264_s30, %s8993_s1 }
 0xdaa   : > { %v3985_v33 = vpop.f32.mrb[56].mxu1 }
 0xdab   : > { %v3998_v43 = vsub.f32 %v3985_v33, %v8568_v61  ;;  %v4012_v44 = vrot.slane %v3985_v33, 7  ;;  %v7428_v45 = vpop.f32.mrb[57].mxu1  ;;  %v7856_v61 = vld [vmem:[%s8966_s10 + $0x18] sm:$0xff]  }
 0xdad   : > { %v4014_v38 = vsel %vm1698_vm1, 0.0, %v4012_v44  ;;  %v4015_v46 = vsel %vm1698_vm1, %v4012_v44, 0.0  ;;  %v3999_v47 = vmul.f32 %v3998_v43, %v3998_v43 }
 0xdae   : > { %v4021_v48 = vpack.c.bf16 %v4015_v46, %v4014_v38  ;;  %v4016_v57 = vpack.c.bf16 %v4014_v38, %v4014_v38 }
 0xdaf   : > { %v4000_v49 = vsel %vm1946_vm7, %v3999_v47, 0.0 }
 0xdb0   : > { %v4030_v50 = vshll.u32 %v4021_v48, 16  ;;  %v4150_v51 = vrot.slane %v4021_v48, 1  ;;  %4001 = vadd.xlane.f32.xlu1 %v4000_v49  ;;  %v4028_v52 = vshrl.u32 %v4021_v48, 16 }
 0xdb2   : > { %v4032_v53 = vrot.slane %v4030_v50, 1  ;;  %7450 = vmatmul.mubr.msk.bf16.vlgmr.msra.gmra.mrb[60].mxu1 %vm1946_vm7, %v4150_v51 }
 0xdb3   : > { %7465 = vmatprep.mubr.msk.bf16.mxu1 %vm7974_vm6, %v7973_v39  ;;  %7462 = vmatpush3.bf16.msra.mxu1 %v7853_v58  ;;  %v7862_v58 = vld [vmem:[%s8970_s0 + $0x8] sm:$0xff]  }
 0xdb4   : > { %v4033_v55 = vor.u32 %v4032_v53, %v4028_v52  ;;  %7463 = vmatprep.subr.bf16.mxu1 %v7973_v39 }
 0xdb6   : > { %7434 = vmatmul.mubr.msk.bf16.vlgmr.msra.gmra.mrb[60].mxu0 %vm1946_vm7, %v4033_v55 }
 0xdb7   : > { %7438 = vmatpush3.bf16.msra.mxu0 %v7851_v54  ;;  %7441 = vmatprep.mubr.msk.bf16.mxu0 %vm7974_vm6, %v7973_v39 }
 0xdb8   : > { %7439 = vmatprep.subr.bf16.mxu0 %v7973_v39  ;;  %7464 = vmatpush3.bf16.msra.mxu1 %v7854_v59  ;;  %v7863_v59 = vld [vmem:[%s8970_s0 + $0x10] sm:$0xff]  }
 0xdb9   : > { %7477 = vmatprep.subr.bf16.mxu1 %v7973_v39 }
 0xdbb   : > { %7440 = vmatpush3.bf16.msra.mxu0 %v7852_v56 }
 0xdbc   : > { %7453 = vmatprep.subr.bf16.mxu0 %v7973_v39 }
 0xdbe   : > { %7442 = vmatmul.mubr.msk.bf16.vlgmr.msra.gmra.mrb[64].mxu0 %vm1946_vm7, %v4016_v57  ;;  %v7861_v57 = vld [vmem:[%s8970_s0] sm:$0xff]  }
 0xdbf   : > { %7457 = vmatprep.mubr.msk.bf16.mxu0 %vm7974_vm6, %v7973_v39  ;;  %7454 = vmatpush3.bf16.msra.mxu0 %v7855_v60  ;;  %v7864_v60 = vld [vmem:[%s8970_s0 + $0x18] sm:$0xff]  }
 0xdc0   : > { %7455 = vmatprep.subr.bf16.mxu0 %v7973_v39 }
 0xdc3   : > { %7456 = vmatpush3.bf16.msra.mxu0 %v7856_v61  ;;  %v6809_v61 = vld [vmem:[%s8971_s2] ss:$0 sm:$0xff]  ;;  %s8972_s2 = sld [smem:[#allocation19_spill]] }
 0xdc4   : > { %7469 = vmatprep.subr.bf16.mxu0 %v7973_v39 }
 0xe3d   : > { %v4002_v62 = vpop.xlane.xlu1 %4001 }
 0xe3e   : > { %v4003_v63 = vrot.slane %v4002_v62, 4 }
 0xe40   : > { %v4004_v0 = vadd.f32 %v4003_v63, %v4002_v62 }
 0xe42   : > { %v4005_v1 = vrot.slane %v4004_v0, 2 }
 0xe44   : > { %v4006_v2 = vadd.f32 %v4005_v1, %v4004_v0 }
 0xe46   : > { %v4007_v3 = vrot.slane %v4006_v2, 1 }
 0xe48   : > { %v4008_v4 = vadd.f32 %v4007_v3, %v4006_v2 }
 0xe4a   : > { %4010 = vst.msk [vmem:[%s1675_s26] sm:$0x1] %vm4009_vm13, %v4008_v4  ;;  %s8969_s26 = sld [smem:[#allocation12_spill]] }
 0xe50   : > { %v6808_v49 = vld [vmem:[%s8969_s26] ss:$0 sm:$0xff]  ;;  %s8973_s26 = sld [smem:[#allocation16_spill]] }
 0xe85   : > { %v4200_v5 = vpop.f32.mrb[60].mxu1 }
 0xe86   : > { %v7451_v6 = vpop.f32.mrb[61].mxu1 }
 0xe87   : > { %v4203_v7 = vpop.f32.mrb[62].mxu1 }
 0xe88   : > { %v7452_v8 = vpop.f32.mrb[63].mxu1 }
 0xe89   : > { %v4083_v9 = vpop.f32.mrb[60].mxu0 }
 0xe8a   : > { %v7435_v10 = vpop.f32.mrb[61].mxu0 }
 0xe8b   : > { %v4086_v11 = vpop.f32.mrb[62].mxu0 }
 0xe8c   : > { %v7436_v12 = vpop.f32.mrb[63].mxu0 }
 0xe91   : > { %v4138_v13 = vpop.f32.mrb[64].mxu0 }
 0xe92   : > { %v4139_v14 = vadd.f32 %v4138_v13, %v4083_v9  ;;  %v7443_v15 = vpop.f32.mrb[65].mxu0  ;;  %v7865_v13 = vld [vmem:[%s8970_s0 + $0x20] sm:$0xff]  }
 0xe93   : > { %v4141_v17 = vpop.f32.mrb[66].mxu0  ;;  %v7866_v15 = vld [vmem:[%s8970_s0 + $0x28] sm:$0xff]   ;;  %s8974_s0 = sld [smem:[#allocation21_spill]] }
 0xe94   : > { %v4206_v18 = vadd.f32 %v4200_v5, %v4139_v14  ;;  %v7444_v19 = vpop.f32.mrb[67].mxu0  ;;  %v7867_v17 = vld [vmem:[%s8972_s2] sm:$0xff]  }
 0xe96   : > { %v8629_v20 = vadd.f32 %v6790_v16, %v4206_v18  ;;  %v7868_v18 = vld [vmem:[%s8972_s2 + $0x8] sm:$0xff]   ;;  %s8975_s2 = sld [smem:[#allocation17_spill]] }
 0xe98   : > { %v4215_v21 = vmax.f32 %v8629_v20, 0.0 }
 0xe9a   : > { %v4216_v22 = vmax.f32 %v4215_v21, 0.0 }
 0xe9c   : > { %v4218_v23 = vrot.slane %v4216_v22, 5 }
 0xe9e   : > { %v4220_v24 = vsel %vm1747_vm0, 0.0, %v4218_v23  ;;  %v4221_v25 = vsel %vm1747_vm0, %v4218_v23, 0.0 }
 0xe9f   : > { %v4222_v26 = vpack.c.bf16 %v4220_v24, %v4220_v24  ;;  %v4227_v27 = vpack.c.bf16 %v4221_v25, %v4220_v24 }
 0xea1   : > { %7466 = vmatmul.mubr.msk.bf16.vlgmr.msra.gmra.mrb[64].mxu1 %vm1946_vm7, %v4222_v26  ;;  %v4234_v28 = vshrl.u32 %v4227_v27, 16  ;;  %v4237_v30 = vshll.u32 %v4227_v27, 16  ;;  %v4357_v40 = vrot.slane %v4227_v27, 3 }
 0xea2   : > { %7481 = vmatprep.mubr.msk.bf16.mxu1 %vm7974_vm6, %v7973_v39  ;;  %7478 = vmatpush3.bf16.msra.mxu1 %v7859_v41 }
 0xea3   : > { %v4236_v31 = vrot.slane %v4234_v28, 1  ;;  %v4239_v32 = vrot.slane %v4237_v30, 2  ;;  %7479 = vmatprep.subr.bf16.mxu1 %v7973_v39  ;;  %v6830_v30 = vld [vmem:[%s8973_s26] ss:$0 sm:$0xff]  ;;  %s8977_s26 = sld [smem:[#allocation20_spill]] }
 0xea5   : > { %v4240_v36 = vor.u32 %v4239_v32, %v4236_v31 }
 0xea6   : > { %7480 = vmatpush3.bf16.msra.mxu1 %v7860_v42  ;;  %v7869_v42 = vld [vmem:[%s8974_s0] sm:$0xff]  }
 0xea7   : > { %7458 = vmatmul.mubr.msk.bf16.vlgmr.msra.gmra.mrb[68].mxu0 %vm1946_vm7, %v4240_v36  ;;  %7493 = vmatprep.subr.bf16.mxu1 %v7973_v39 }
 0xea8   : > { %7470 = vmatpush3.bf16.msra.mxu0 %v7857_v34  ;;  %7473 = vmatprep.mubr.msk.bf16.mxu0 %vm7974_vm6, %v7973_v39 }
 0xea9   : > { %7471 = vmatprep.subr.bf16.mxu0 %v7973_v39 }
 0xeac   : > { %7472 = vmatpush3.bf16.msra.mxu0 %v7858_v37 }
 0xead   : > { %7485 = vmatprep.subr.bf16.mxu0 %v7973_v39 }
 0xeaf   : > { %7474 = vmatmul.mubr.msk.bf16.vlgmr.msra.gmra.mrb[72].mxu0 %vm1946_vm7, %v4357_v40 }
 0xeb0   : > { %7489 = vmatprep.mubr.msk.bf16.mxu0 %vm7974_vm6, %v7973_v39  ;;  %7486 = vmatpush3.bf16.msra.mxu0 %v7863_v59 }
 0xeb1   : > { %7487 = vmatprep.subr.bf16.mxu0 %v7973_v39 }
 0xeb4   : > { %7488 = vmatpush3.bf16.msra.mxu0 %v7864_v60 }
 0xeb5   : > { %7501 = vmatprep.subr.bf16.mxu0 %v7973_v39 }
 0xf74   : > { %v4345_v29 = vpop.f32.mrb[64].mxu1 }
 0xf75   : > { %v7467_v35 = vpop.f32.mrb[65].mxu1 }
 0xf76   : > { %v4348_v33 = vpop.f32.mrb[66].mxu1  ;;  %v7870_v35 = vld [vmem:[%s8974_s0 + $0x8] sm:$0xff]  }
 0xf77   : > { %v7468_v43 = vpop.f32.mrb[67].mxu1  ;;  %v7872_v33 = vld [vmem:[%s8974_s0 + $0x18] sm:$0xff]  }
 0xf78   : > { %v6831_v43 = vld [vmem:[%s8975_s2] ss:$0 sm:$0xff]  ;;  %s8976_s2 = sld [smem:[#allocation24_spill]] }
 0xf7a   : > { %v4290_v44 = vpop.f32.mrb[68].mxu0 }
 0xf7b   : > { %v4346_v45 = vadd.f32 %v4345_v29, %v4290_v44  ;;  %v7459_v38 = vpop.f32.mrb[69].mxu0  ;;  %v7871_v29 = vld [vmem:[%s8974_s0 + $0x10] sm:$0xff]  }
 0xf7c   : > { %v4293_v46 = vpop.f32.mrb[70].mxu0 }
 0xf7d   : > { %v7460_v47 = vpop.f32.mrb[71].mxu0 }
 0xf82   : > { %v4407_v48 = vpop.f32.mrb[72].mxu0 }
 0xf83   : > { %v4413_v50 = vadd.f32 %v4407_v48, %v4346_v45  ;;  %v7475_v51 = vpop.f32.mrb[73].mxu0 }
 0xf84   : > { %v4410_v52 = vpop.f32.mrb[74].mxu0 }
 0xf85   : > { %v4421_v53 = vadd.f32 %v6808_v49, %v4413_v50  ;;  %v7476_v54 = vpop.f32.mrb[75].mxu0 }
 0xf87   : > { %v4422_v55 = vmax.f32 %v4421_v53, 0.0 }
 0xf89   : > { %v4423_v56 = vpack.c.bf16 %v4422_v55, %v4422_v55 }
 0xf8b   : > { %7482 = vmatmul.mubr.msk.bf16.vlgmr.msra.gmra.mrb[68].mxu1 %vm1946_vm7, %v4423_v56 }
 0xf8c   : > { %7497 = vmatprep.mubr.msk.bf16.mxu1 %vm7974_vm6, %v7973_v39  ;;  %7494 = vmatpush3.bf16.msra.mxu1 %v7861_v57 }
 0xf8d   : > { %7495 = vmatprep.subr.bf16.mxu1 %v7973_v39 }
 0xf90   : > { %7496 = vmatpush3.bf16.msra.mxu1 %v7862_v58 }
 0xf91   : > { %7509 = vmatprep.subr.bf16.mxu1 %v7973_v39 }
0x105e   : > { %v4484_v62 = vpop.f32.mrb[68].mxu1 }
0x105f   : > { %v4485_v63 = vadd.f32 %v6809_v61, %v4484_v62  ;;  %v7483_v0 = vpop.f32.mrb[69].mxu1 }
0x1060   : > { %v4487_v1 = vpop.f32.mrb[70].mxu1  ;;  %v7873_v0 = vld [vmem:[%s8974_s0 + $0x20] sm:$0xff]  }
0x1061   : > { %v8668_v2 = vadd.f32 %v4485_v63, %v4215_v21  ;;  %v7484_v3 = vpop.f32.mrb[71].mxu1 }
0x1063   : > { %v4491_v4 = vmax.f32 %v8668_v2, 0.0 }
0x1065   : > { %v4493_v5 = vrot.slane %v4491_v4, 7 }
0x1067   : > { %v4495_v6 = vsel %vm1698_vm1, 0.0, %v4493_v5  ;;  %v4496_v7 = vsel %vm1698_vm1, %v4493_v5, 0.0 }
0x1068   : > { %v4497_v8 = vpack.c.bf16 %v4495_v6, %v4495_v6  ;;  %v4502_v9 = vpack.c.bf16 %v4496_v7, %v4495_v6  ;;  %v7875_v6 = vld [vmem:[%s8976_s2] sm:$0xff]   ;;  %v7876_v7 = vld [vmem:[%s8976_s2 + $0x8] sm:$0xff]  }
0x106a   : > { %v4511_v10 = vshll.u32 %v4502_v9, 16  ;;  %7498 = vmatmul.mubr.msk.bf16.vlgmr.msra.gmra.mrb[72].mxu1 %vm1946_vm7, %v4497_v8  ;;  %v4509_v11 = vshrl.u32 %v4502_v9, 16  ;;  %v4631_v16 = vrot.slane %v4502_v9, 1  ;;  %v7877_v8 = vld [vmem:[%s8976_s2 + $0x10] sm:$0xff]   ;;  %v7878_v9 = vld [vmem:[%s8976_s2 + $0x18] sm:$0xff]  }
0x106b   : > { %7513 = vmatprep.mubr.msk.bf16.mxu1 %vm7974_vm6, %v7973_v39  ;;  %7510 = vmatpush3.bf16.msra.mxu1 %v7867_v17 }
0x106c   : > { %v4513_v12 = vrot.slane %v4511_v10, 1  ;;  %7511 = vmatprep.subr.bf16.mxu1 %v7973_v39 }
0x106e   : > { %v4514_v14 = vor.u32 %v4513_v12, %v4509_v11 }
0x106f   : > { %7512 = vmatpush3.bf16.msra.mxu1 %v7868_v18 }
0x1070   : > { %7490 = vmatmul.mubr.msk.bf16.vlgmr.msra.gmra.mrb[76].mxu0 %vm1946_vm7, %v4514_v14  ;;  %7525 = vmatprep.subr.bf16.mxu1 %v7973_v39 }
0x1071   : > { %7502 = vmatpush3.bf16.msra.mxu0 %v7865_v13  ;;  %7505 = vmatprep.mubr.msk.bf16.mxu0 %vm7974_vm6, %v7973_v39 }
0x1072   : > { %7503 = vmatprep.subr.bf16.mxu0 %v7973_v39 }
0x1075   : > { %7504 = vmatpush3.bf16.msra.mxu0 %v7866_v15 }
0x1076   : > { %7517 = vmatprep.subr.bf16.mxu0 %v7973_v39 }
0x1078   : > { %7506 = vmatmul.mubr.msk.bf16.vlgmr.msra.gmra.mrb[80].mxu0 %vm1946_vm7, %v4631_v16 }
0x1079   : > { %7521 = vmatprep.mubr.msk.bf16.mxu0 %vm7974_vm6, %v7973_v39  ;;  %7518 = vmatpush3.bf16.msra.mxu0 %v7871_v29 }
0x107a   : > { %7519 = vmatprep.subr.bf16.mxu0 %v7973_v39 }
0x107d   : > { %7520 = vmatpush3.bf16.msra.mxu0 %v7872_v33 }
0x107e   : > { %7533 = vmatprep.subr.bf16.mxu0 %v7973_v39 }
0x113d   : > { %v4619_v19 = vpop.f32.mrb[72].mxu1 }
0x113e   : > { %v7499_v20 = vpop.f32.mrb[73].mxu1 }
0x113f   : > { %v4622_v21 = vpop.f32.mrb[74].mxu1 }
0x1140   : > { %v7500_v22 = vpop.f32.mrb[75].mxu1  ;;  %v6852_v21 = vld [vmem:[%s8977_s26] ss:$0 sm:$0xff]  ;;  %s8978_s26 = sld [smem:[#allocation25_spill]] }
0x1143   : > { %v4564_v23 = vpop.f32.mrb[76].mxu0 }
0x1144   : > { %v4620_v24 = vadd.f32 %v4619_v19, %v4564_v23  ;;  %v7491_v25 = vpop.f32.mrb[77].mxu0 }
0x1145   : > { %v4567_v26 = vpop.f32.mrb[78].mxu0 }
0x1146   : > { %v7492_v27 = vpop.f32.mrb[79].mxu0 }
0x114b   : > { %v4681_v28 = vpop.f32.mrb[80].mxu0 }
0x114c   : > { %v4687_v31 = vadd.f32 %v4681_v28, %v4620_v24  ;;  %v7507_v32 = vpop.f32.mrb[81].mxu0 }
0x114d   : > { %v4684_v34 = vpop.f32.mrb[82].mxu0 }
0x114e   : > { %v4695_v36 = vadd.f32 %v6830_v30, %v4687_v31  ;;  %v7508_v37 = vpop.f32.mrb[83].mxu0 }
0x1150   : > { %v4696_v40 = vmax.f32 %v4695_v36, 0.0 }
0x1152   : > { %v4697_v41 = vpack.c.bf16 %v4696_v40, %v4696_v40 }
0x1154   : > { %7514 = vmatmul.mubr.msk.bf16.vlgmr.msra.gmra.mrb[76].mxu1 %vm1946_vm7, %v4697_v41 }
0x1155   : > { %7529 = vmatprep.mubr.msk.bf16.mxu1 %vm7974_vm6, %v7973_v39  ;;  %7526 = vmatpush3.bf16.msra.mxu1 %v7869_v42 }
0x1156   : > { %7527 = vmatprep.subr.bf16.mxu1 %v7973_v39 }
0x1159   : > { %7528 = vmatpush3.bf16.msra.mxu1 %v7870_v35 }
0x115a   : > { %7541 = vmatprep.subr.bf16.mxu1 %v7973_v39 }
0x1227   : > { %v4758_v44 = vpop.f32.mrb[76].mxu1 }
0x1228   : > { %v4759_v45 = vadd.f32 %v6831_v43, %v4758_v44  ;;  %v7515_v38 = vpop.f32.mrb[77].mxu1 }
0x1229   : > { %v4761_v46 = vpop.f32.mrb[78].mxu1 }
0x122a   : > { %v4764_v47 = vadd.f32 %v4759_v45, %v8668_v2  ;;  %v7516_v48 = vpop.f32.mrb[79].mxu1  ;;  %v7874_v2 = vld [vmem:[%s8974_s0 + $0x28] sm:$0xff]   ;;  %s8979_s0 = sld [smem:[#allocation22_spill]] }
0x122c   : > { %4765 = vst [vmem:[#allocation2] ss:$2 sm:$0xff] %v4764_v47  ;;  %4766 = vst [vmem:[#allocation2 + $0x1] ss:$2 sm:$0xff] %v4764_v47 }
0x1233   : > { %v4767_v49 = vld [vmem:[#allocation2] sm:$0xff]  ;;  %v4768_v50 = vld [vmem:[#allocation2 + $0x8] sm:$0xff] }
0x1234   : > { %v4771_v51 = vrot.slane %v4767_v49, 7  ;;  %v4772_v52 = vrot.slane %v4768_v50, 7  ;;  %v7879_v49 = vld [vmem:[%s8976_s2 + $0x20] sm:$0xff]  }
0x1236   : > { %v4773_v53 = vsel %vm1698_vm1, %v4771_v51, %v4772_v52  ;;  %v4777_v54 = vsel %vm1698_vm1, 0.0, %v4771_v51  ;;  %v4778_v55 = vsel %vm1698_vm1, %v4772_v52, 0.0  ;;  %v7880_v51 = vld [vmem:[%s8976_s2 + $0x28] sm:$0xff]   ;;  %s8980_s2 = sld [smem:[#allocation28_spill]] }
0x1237   : > { %v4779_v56 = vpack.c.bf16 %v4773_v53, %v4777_v54  ;;  %v4784_v57 = vpack.c.bf16 %v4778_v55, %v4778_v55  ;;  %v7881_v55 = vld [vmem:[%s8978_s26] sm:$0xff]  }
0x1239   : > { %7530 = vmatmul.mubr.msk.bf16.vlgmr.msra.gmra.mrb[80].mxu1 %vm1946_vm7, %v4779_v56  ;;  %v4793_v58 = vshll.u32 %v4779_v56, 16  ;;  %v4798_v59 = vshll.u32 %v4784_v57, 16  ;;  %v4791_v60 = vshrl.u32 %v4779_v56, 16  ;;  %v4920_v3 = vrot.slane %v4779_v56, 1  ;;  %v7882_v56 = vld [vmem:[%s8978_s26 + $0x8] sm:$0xff]  }
0x123a   : > { %7545 = vmatprep.mubr.msk.bf16.mxu1 %vm7974_vm6, %v7973_v39  ;;  %v4921_v4 = vrot.slane %v4784_v57, 1  ;;  %7542 = vmatpush3.bf16.msra.mxu1 %v7877_v8 }
0x123b   : > { %v4795_v61 = vrot.slane %v4793_v58, 1  ;;  %v4800_v63 = vrot.slane %v4798_v59, 1  ;;  %7543 = vmatprep.subr.bf16.mxu1 %v7973_v39 }
0x123c   : > { %v4922_v5 = vsel %vm1861_vm4, %v4920_v3, %v4921_v4  ;;  %v6870_v4 = vld [vmem:[%s8979_s0] ss:$0 sm:$0xff]  ;;  %s8983_s0 = sld [smem:[#allocation26_spill]] }
0x123d   : > { %v4796_v62 = vor.u32 %v4795_v61, %v4791_v60 }
0x123e   : > { %7544 = vmatpush3.bf16.msra.mxu1 %v7878_v9 }
0x123f   : > { %v4801_v1 = vsel %vm1719_vm2, %v4796_v62, %v4800_v63  ;;  %7557 = vmatprep.subr.bf16.mxu1 %v7973_v39 }
0x1240   : > { %7522 = vmatmul.mubr.msk.bf16.vlgmr.msra.gmra.mrb[84].mxu0 %vm1946_vm7, %v4801_v1 }
0x1241   : > { %7534 = vmatpush3.bf16.msra.mxu0 %v7873_v0  ;;  %7537 = vmatprep.mubr.msk.bf16.mxu0 %vm7974_vm6, %v7973_v39 }
0x1242   : > { %7535 = vmatprep.subr.bf16.mxu0 %v7973_v39 }
0x1245   : > { %7536 = vmatpush3.bf16.msra.mxu0 %v7874_v2 }
0x1246   : > { %7549 = vmatprep.subr.bf16.mxu0 %v7973_v39 }
0x1248   : > { %7538 = vmatmul.mubr.msk.bf16.vlgmr.msra.gmra.mrb[88].mxu0 %vm1946_vm7, %v4922_v5 }
0x1249   : > { %7553 = vmatprep.mubr.msk.bf16.mxu0 %vm7974_vm6, %v7973_v39  ;;  %7550 = vmatpush3.bf16.msra.mxu0 %v7875_v6 }
0x124a   : > { %7551 = vmatprep.subr.bf16.mxu0 %v7973_v39 }
0x124d   : > { %7552 = vmatpush3.bf16.msra.mxu0 %v7876_v7 }
0x124e   : > { %7565 = vmatprep.subr.bf16.mxu0 %v7973_v39 }
0x130c   : > { %v4906_v10 = vpop.f32.mrb[80].mxu1 }
0x130d   : > { %v7531_v11 = vpop.f32.mrb[81].mxu1 }
0x130e   : > { %v4909_v12 = vpop.f32.mrb[82].mxu1 }
0x130f   : > { %v7532_v13 = vpop.f32.mrb[83].mxu1 }
0x1313   : > { %v4851_v14 = vpop.f32.mrb[84].mxu0 }
0x1314   : > { %v4907_v15 = vadd.f32 %v4906_v10, %v4851_v14  ;;  %v7523_v16 = vpop.f32.mrb[85].mxu0 }
0x1315   : > { %v4854_v17 = vpop.f32.mrb[86].mxu0  ;;  %v7884_v16 = vld [vmem:[%s8980_s2 + $0x8] sm:$0xff]  }
0x1316   : > { %v4910_v18 = vadd.f32 %v4909_v12, %v4854_v17  ;;  %v7524_v19 = vpop.f32.mrb[87].mxu0  ;;  %v7885_v17 = vld [vmem:[%s8980_s2 + $0x10] sm:$0xff]  }
0x1317   : > { %v6871_v19 = vld [vmem:[%s8981_s3] ss:$0 sm:$0xff]  ;;  %s8982_s3 = sld [smem:[#allocation29_spill]] }
0x131b   : > { %v4972_v20 = vpop.f32.mrb[88].mxu0 }
0x131c   : > { %v4979_v22 = vadd.f32 %v4972_v20, %v4907_v15  ;;  %v7539_v23 = vpop.f32.mrb[89].mxu0  ;;  %v7883_v15 = vld [vmem:[%s8980_s2] sm:$0xff]  }
0x131d   : > { %v4975_v24 = vpop.f32.mrb[90].mxu0 }
0x131e   : > { %v8731_v25 = vadd.f32 %v6852_v21, %v4979_v22  ;;  %v4980_v26 = vadd.f32 %v4975_v24, %v4910_v18  ;;  %v7540_v27 = vpop.f32.mrb[91].mxu0  ;;  %v7886_v18 = vld [vmem:[%s8980_s2 + $0x18] sm:$0xff]  }
0x1320   : > { %v4990_v28 = vmax.f32 %v8731_v25, 0.0  ;;  %v8734_v30 = vadd.f32 %v6852_v21, %v4980_v26 }
0x1322   : > { %v4994_v31 = vrot.slane %v4990_v28, 5  ;;  %v4991_v32 = vmax.f32 %v8734_v30, 0.0 }
0x1324   : > { %v4995_v34 = vrot.slane %v4991_v32, 5  ;;  %v5000_v36 = vsel %vm1747_vm0, 0.0, %v4994_v31 }
0x1326   : > { %v4996_v37 = vsel %vm1747_vm0, %v4994_v31, %v4995_v34  ;;  %v5001_v40 = vsel %vm1747_vm0, %v4995_v34, 0.0 }
0x1327   : > { %v5002_v41 = vpack.c.bf16 %v4996_v37, %v5000_v36  ;;  %v5007_v42 = vpack.c.bf16 %v5001_v40, %v5001_v40 }
0x1329   : > { %v5022_v29 = vshrl.u32 %v5007_v42, 16  ;;  %v5025_v35 = vshll.u32 %v5007_v42, 16  ;;  %7554 = vmatmul.mubr.msk.bf16.vlgmr.msra.gmra.mrb[92].mxu0 %vm1946_vm7, %v5002_v41  ;;  %v5014_v33 = vshrl.u32 %v5002_v41, 16  ;;  %v5017_v43 = vshll.u32 %v5002_v41, 16 }
0x132a   : > { %7569 = vmatprep.mubr.msk.bf16.mxu0 %vm7974_vm6, %v7973_v39  ;;  %v5148_v52 = vrot.slane %v5002_v41, 3  ;;  %v5149_v53 = vrot.slane %v5007_v42, 3  ;;  %7566 = vmatpush3.bf16.msra.mxu0 %v7881_v55 }
0x132b   : > { %v5016_v44 = vrot.slane %v5014_v33, 1  ;;  %v5019_v45 = vrot.slane %v5017_v43, 2  ;;  %v5024_v38 = vrot.slane %v5022_v29, 1  ;;  %v5027_v46 = vrot.slane %v5025_v35, 2  ;;  %7567 = vmatprep.subr.bf16.mxu0 %v7973_v39 }
0x132c   : > { %v5150_v54 = vsel %vm2681_vm9, %v5148_v52, %v5149_v53 }
0x132d   : > { %v5020_v47 = vor.u32 %v5019_v45, %v5016_v44  ;;  %v5028_v48 = vor.u32 %v5027_v46, %v5024_v38  ;;  %v7887_v45 = vld [vmem:[%s8980_s2 + $0x20] sm:$0xff]   ;;  %v7888_v46 = vld [vmem:[%s8980_s2 + $0x28] sm:$0xff]   ;;  %s8984_s2 = sld [smem:[#allocation31_spill]] }
0x132e   : > { %7568 = vmatpush3.bf16.msra.mxu0 %v7882_v56 }
0x132f   : > { %v5029_v50 = vsel %vm2545_vm8, %v5020_v47, %v5028_v48  ;;  %7581 = vmatprep.subr.bf16.mxu0 %v7973_v39 }
0x1330   : > { %7546 = vmatmul.mubr.msk.bf16.vlgmr.msra.gmra.mrb[84].mxu1 %vm1946_vm7, %v5029_v50  ;;  %v7889_v50 = vld [vmem:[%s8982_s3] sm:$0xff]  }
0x1331   : > { %7558 = vmatpush3.bf16.msra.mxu1 %v7879_v49  ;;  %7561 = vmatprep.mubr.msk.bf16.mxu1 %vm7974_vm6, %v7973_v39 }
0x1332   : > { %7559 = vmatprep.subr.bf16.mxu1 %v7973_v39 }
0x1335   : > { %7560 = vmatpush3.bf16.msra.mxu1 %v7880_v51  ;;  %v7890_v51 = vld [vmem:[%s8982_s3 + $0x8] sm:$0xff]   ;;  %s8985_s3 = sld [smem:[#allocation27_spill]] }
0x1336   : > { %7573 = vmatprep.subr.bf16.mxu1 %v7973_v39 }
0x1338   : > { %7562 = vmatmul.mubr.msk.bf16.vlgmr.msra.gmra.mrb[88].mxu1 %vm1946_vm7, %v5150_v54 }
0x1339   : > { %7577 = vmatprep.mubr.msk.bf16.mxu1 %vm7974_vm6, %v7973_v39  ;;  %7574 = vmatpush3.bf16.msra.mxu1 %v7885_v17 }
0x133a   : > { %7575 = vmatprep.subr.bf16.mxu1 %v7973_v39 }
0x133d   : > { %7576 = vmatpush3.bf16.msra.mxu1 %v7886_v18 }
0x133e   : > { %7589 = vmatprep.subr.bf16.mxu1 %v7973_v39 }
0x13fc   : > { %v5134_v57 = vpop.f32.mrb[92].mxu0 }
0x13fd   : > { %v7555_v58 = vpop.f32.mrb[93].mxu0 }
0x13fe   : > { %v5137_v59 = vpop.f32.mrb[94].mxu0 }
0x13ff   : > { %v7556_v60 = vpop.f32.mrb[95].mxu0 }
0x1403   : > { %v5079_v61 = vpop.f32.mrb[84].mxu1 }
0x1404   : > { %v5135_v62 = vadd.f32 %v5134_v57, %v5079_v61  ;;  %v7547_v63 = vpop.f32.mrb[85].mxu1 }
0x1405   : > { %v5082_v0 = vpop.f32.mrb[86].mxu1  ;;  %v6892_v63 = vld [vmem:[%s8983_s0] ss:$0 sm:$0xff]  ;;  %s8987_s0 = sld [smem:[#allocation30_spill]] }
0x1406   : > { %v5138_v1 = vadd.f32 %v5137_v59, %v5082_v0  ;;  %v7548_v2 = vpop.f32.mrb[87].mxu1 }
0x140b   : > { %v5200_v3 = vpop.f32.mrb[88].mxu1 }
0x140c   : > { %v5207_v5 = vadd.f32 %v5200_v3, %v5135_v62  ;;  %v7563_v6 = vpop.f32.mrb[89].mxu1 }
0x140d   : > { %v5203_v7 = vpop.f32.mrb[90].mxu1 }
0x140e   : > { %v5216_v8 = vadd.f32 %v6870_v4, %v5207_v5  ;;  %v5208_v9 = vadd.f32 %v5203_v7, %v5138_v1  ;;  %v7564_v10 = vpop.f32.mrb[91].mxu1 }
0x140f   : > { %v7892_v10 = vld [vmem:[%s8984_s2 + $0x18] sm:$0xff]  }
0x1410   : > { %v5217_v11 = vadd.f32 %v6870_v4, %v5208_v9  ;;  %v5218_v12 = vmax.f32 %v5216_v8, 0.0  ;;  %v7891_v9 = vld [vmem:[%s8984_s2 + $0x10] sm:$0xff]  }
0x1412   : > { %v5219_v13 = vmax.f32 %v5217_v11, 0.0  ;;  %v7893_v11 = vld [vmem:[%s8984_s2] sm:$0xff]  }
0x1414   : > { %v5220_v14 = vpack.c.bf16 %v5219_v13, %v5218_v12  ;;  %v6893_v12 = vld [vmem:[%s8985_s3] ss:$0 sm:$0xff]  ;;  %s8986_s3 = sld [smem:[#allocation9_spill]] }
0x1416   : > { %7570 = vmatmul.mubr.msk.bf16.vlgmr.msra.gmra.mrb[96].mxu0 %vm1946_vm7, %v5220_v14 }
0x1417   : > { %7585 = vmatprep.mubr.msk.bf16.mxu0 %vm7974_vm6, %v7973_v39  ;;  %7582 = vmatpush3.bf16.msra.mxu0 %v7883_v15 }
0x1418   : > { %7583 = vmatprep.subr.bf16.mxu0 %v7973_v39 }
0x141b   : > { %7584 = vmatpush3.bf16.msra.mxu0 %v7884_v16 }
0x141c   : > { %7597 = vmatprep.subr.bf16.mxu0 %v7973_v39 }
0x14e9   : > { %v5281_v20 = vpop.f32.mrb[96].mxu0 }
0x14ea   : > { %v5282_v21 = vadd.f32 %v6871_v19, %v5281_v20  ;;  %v7571_v22 = vpop.f32.mrb[97].mxu0 }
0x14eb   : > { %v5284_v23 = vpop.f32.mrb[98].mxu0 }
0x14ec   : > { %v8773_v24 = vadd.f32 %v5282_v21, %v8731_v25  ;;  %v5285_v26 = vadd.f32 %v6871_v19, %v5284_v23  ;;  %v7572_v27 = vpop.f32.mrb[99].mxu0 }
0x14ee   : > { %v5290_v28 = vmax.f32 %v8773_v24, 0.0  ;;  %v8777_v31 = vadd.f32 %v5285_v26, %v8734_v30 }
0x14f0   : > { %v5294_v32 = vrot.slane %v5290_v28, 7  ;;  %v5291_v34 = vmax.f32 %v8777_v31, 0.0 }
0x14f2   : > { %v5295_v36 = vrot.slane %v5291_v34, 7  ;;  %v5300_v37 = vsel %vm1698_vm1, 0.0, %v5294_v32 }
0x14f4   : > { %v5296_v40 = vsel %vm1698_vm1, %v5294_v32, %v5295_v36  ;;  %v5301_v25 = vsel %vm1698_vm1, %v5295_v36, 0.0 }
0x14f5   : > { %v5302_v41 = vpack.c.bf16 %v5296_v40, %v5300_v37  ;;  %v5307_v42 = vpack.c.bf16 %v5301_v25, %v5301_v25 }
0x14f7   : > { %v5321_v29 = vshll.u32 %v5307_v42, 16  ;;  %7586 = vmatmul.mubr.msk.bf16.vlgmr.msra.gmra.mrb[100].mxu0 %vm1946_vm7, %v5302_v41  ;;  %v5316_v35 = vshll.u32 %v5302_v41, 16  ;;  %v5314_v30 = vshrl.u32 %v5302_v41, 16  ;;  %v5444_v47 = vrot.slane %v5307_v42, 1 }
0x14f8   : > { %7601 = vmatprep.mubr.msk.bf16.mxu0 %vm7974_vm6, %v7973_v39  ;;  %v5443_v48 = vrot.slane %v5302_v41, 1  ;;  %7598 = vmatpush3.bf16.msra.mxu0 %v7889_v50 }
0x14f9   : > { %v5318_v33 = vrot.slane %v5316_v35, 1  ;;  %v5323_v43 = vrot.slane %v5321_v29, 1  ;;  %7599 = vmatprep.subr.bf16.mxu0 %v7973_v39 }
0x14fa   : > { %v5445_v49 = vsel %vm1861_vm4, %v5443_v48, %v5444_v47 }
0x14fb   : > { %v5319_v44 = vor.u32 %v5318_v33, %v5314_v30 }
0x14fc   : > { %7600 = vmatpush3.bf16.msra.mxu0 %v7890_v51  ;;  %v7895_v51 = vld [vmem:[%s8984_s2 + $0x20] sm:$0xff]  }
0x14fd   : > { %v5324_v38 = vsel %vm1719_vm2, %v5319_v44, %v5323_v43 }
0x14fe   : > { %7578 = vmatmul.mubr.msk.bf16.vlgmr.msra.gmra.mrb[92].mxu1 %vm1946_vm7, %v5324_v38 }
0x14ff   : > { %7590 = vmatpush3.bf16.msra.mxu1 %v7887_v45  ;;  %7593 = vmatprep.mubr.msk.bf16.mxu1 %vm7974_vm6, %v7973_v39 }
0x1500   : > { %7591 = vmatprep.subr.bf16.mxu1 %v7973_v39 }
0x1503   : > { %7592 = vmatpush3.bf16.msra.mxu1 %v7888_v46 }
0x1504   : > { %7605 = vmatprep.subr.bf16.mxu1 %v7891_v9 }
0x1506   : > { %7594 = vmatmul.mubr.msk.bf16.vlgmr.msra.gmra.mrb[96].mxu1 %vm1946_vm7, %v5445_v49  ;;  %v7894_v49 = vld [vmem:[%s8984_s2 + $0x8] sm:$0xff]  }
0x1507   : > { %7606 = vmatpush3.bf16.msra.mxu1 %v7891_v9 }
0x1508   : > { %7607 = vmatprep.subr.bf16.mxu1 %v7892_v10 }
0x150b   : > { %7608 = vmatpush3.bf16.msra.mxu1 %v7892_v10 }
0x150c   : > { %7613 = vmatprep.subr.bf16.mxu1 %v7893_v11 }
0x15ca   : > { %v5429_v52 = vpop.f32.mrb[100].mxu0 }
0x15cb   : > { %v7587_v53 = vpop.f32.mrb[101].mxu0 }
0x15cc   : > { %v5432_v54 = vpop.f32.mrb[102].mxu0 }
0x15cd   : > { %v7588_v55 = vpop.f32.mrb[103].mxu0 }
0x15d1   : > { %v5374_v56 = vpop.f32.mrb[92].mxu1 }
0x15d2   : > { %v5430_v57 = vadd.f32 %v5429_v52, %v5374_v56  ;;  %v7579_v58 = vpop.f32.mrb[93].mxu1 }
0x15d3   : > { %v5377_v59 = vpop.f32.mrb[94].mxu1  ;;  %v7897_v58 = vld [vmem:[%s8986_s3 + $0x10] sm:$0xff]  }
0x15d4   : > { %v5433_v60 = vadd.f32 %v5432_v54, %v5377_v59  ;;  %v7580_v61 = vpop.f32.mrb[95].mxu1  ;;  %v7896_v54 = vld [vmem:[%s8984_s2 + $0x28] sm:$0xff]   ;;  %7629 = vmatprep.subr.bf16.mxu0 %v7897_v58  ;;  %v7898_v59 = vld [vmem:[%s8986_s3 + $0x18] sm:$0xff]   ;;  %s8989_s2 = sld [smem:[#allocation8_spill]] }
0x15d5   : > { %v6917_v61 = vld [vmem:[%s8987_s0] ss:$0 sm:$0xff]  ;;  %s8988_s0 = sld [smem:[#allocation11_spill]] }
0x15d9   : > { %v5495_v62 = vpop.f32.mrb[96].mxu1 }
0x15da   : > { %v5502_v0 = vadd.f32 %v5495_v62, %v5430_v57  ;;  %v7595_v1 = vpop.f32.mrb[97].mxu1 }
0x15db   : > { %v5498_v39 = vpop.f32.mrb[98].mxu1 }
0x15dc   : > { %v5511_v2 = vadd.f32 %v6892_v63, %v5502_v0  ;;  %v5503_v3 = vadd.f32 %v5498_v39, %v5433_v60  ;;  %v7596_v4 = vpop.f32.mrb[99].mxu1  ;;  %v7899_v60 = vld [vmem:[%s8986_s3] sm:$0xff]  }
0x15de   : > { %v5512_v5 = vadd.f32 %v6892_v63, %v5503_v3  ;;  %v5513_v6 = vmax.f32 %v5511_v2, 0.0 }
0x15e0   : > { %v5514_v7 = vmax.f32 %v5512_v5, 0.0 }
0x15e2   : > { %v5515_v8 = vpack.c.bf16 %v5514_v7, %v5513_v6 }
0x15e4   : > { %7602 = vmatmul.mubr.msk.bf16.vlgmr.msra.gmra.mrb[104].mxu0 %vm1946_vm7, %v5515_v8 }
0x15e5   : > { %7630 = vmatpush3.bf16.msra.mxu0 %v7897_v58 }
0x15e6   : > { %7631 = vmatprep.subr.bf16.mxu0 %v7898_v59 }
0x15e9   : > { %7632 = vmatpush3.bf16.msra.mxu0 %v7898_v59 }
0x15ea   : > { %7637 = vmatprep.subr.bf16.mxu0 %v7899_v60 }
0x16b7   : > { %v5576_v13 = vpop.f32.mrb[104].mxu0 }
0x16b8   : > { %v5577_v14 = vadd.f32 %v6893_v12, %v5576_v13  ;;  %v7603_v15 = vpop.f32.mrb[105].mxu0 }
0x16b9   : > { %v5579_v16 = vpop.f32.mrb[106].mxu0 }
0x16ba   : > { %v5583_v17 = vadd.f32 %v5577_v14, %v8773_v24  ;;  %v5580_v18 = vadd.f32 %v6893_v12, %v5579_v16  ;;  %v7604_v19 = vpop.f32.mrb[107].mxu0 }
0x16bc   : > { %5585 = vst [vmem:[#allocation2] ss:$2 sm:$0xff] %v5583_v17  ;;  %5587 = vst [vmem:[#allocation2 + $0x1] ss:$2 sm:$0xff] %v5583_v17  ;;  %v5584_v20 = vadd.f32 %v5580_v18, %v8777_v31 }
0x16be   : > { %5586 = vst [vmem:[#allocation2 + $0x10] ss:$2 sm:$0xff] %v5584_v20  ;;  %5588 = vst [vmem:[#allocation2 + $0x11] ss:$2 sm:$0xff] %v5584_v20 }
0x16c3   : > { %v5589_v21 = vld [vmem:[#allocation2] sm:$0xff]  ;;  %v5590_v22 = vld [vmem:[#allocation2 + $0x8] sm:$0xff] }
0x16c4   : > { %v5597_v23 = vrot.slane %v5589_v21, 7  ;;  %v5598_v26 = vrot.slane %v5590_v22, 7 }
0x16c5   : > { %v5591_v27 = vld [vmem:[#allocation2 + $0x10] sm:$0xff]  ;;  %v5592_v28 = vld [vmem:[#allocation2 + $0x18] sm:$0xff] }
0x16c6   : > { %v5599_v32 = vsel %vm1698_vm1, %v5597_v23, %v5598_v26  ;;  %v5600_v34 = vrot.slane %v5591_v27, 7  ;;  %v5602_v36 = vrot.slane %v5592_v28, 7  ;;  %v5609_v24 = vsel %vm1698_vm1, 0.0, %v5597_v23 }
0x16c7   : > { %v5611_v37 = vpack.c.bf16 %v5599_v32, %v5609_v24 }
0x16c8   : > { %v5601_v40 = vsel %vm1698_vm1, %v5598_v26, %v5600_v34  ;;  %v5603_v25 = vsel %vm1698_vm1, %v5600_v34, %v5602_v36  ;;  %v5610_v31 = vsel %vm1698_vm1, %v5602_v36, 0.0 }
0x16c9   : > { %v5612_v41 = vpack.c.bf16 %v5603_v25, %v5601_v40  ;;  %v5626_v42 = vshll.u32 %v5611_v37, 16  ;;  %v5617_v29 = vpack.c.bf16 %v5610_v31, %v5610_v31  ;;  %v5624_v35 = vshrl.u32 %v5611_v37, 16  ;;  %v7900_v31 = vld [vmem:[%s8986_s3 + $0x8] sm:$0xff]  }
0x16ca   : > { %v5783_v53 = vrot.slane %v5611_v37, 1 }
0x16cb   : > { %v5628_v30 = vrot.slane %v5626_v42, 1  ;;  %v5631_v33 = vshll.u32 %v5612_v41, 16  ;;  %v5639_v43 = vshll.u32 %v5617_v29, 16  ;;  %v5635_v38 = vshrl.u32 %v5612_v41, 16  ;;  %v7902_v42 = vld [vmem:[%s8986_s3 + $0x28] sm:$0xff]  }
0x16cc   : > { %v5784_v52 = vrot.slane %v5612_v41, 1  ;;  %v5786_v56 = vrot.slane %v5617_v29, 1  ;;  %v7903_v29 = vld [vmem:[%s8988_s0 + $0x10] sm:$0xff]  }
0x16cd   : > { %v5629_v44 = vor.u32 %v5628_v30, %v5624_v35  ;;  %v5633_v45 = vrot.slane %v5631_v33, 1  ;;  %v5641_v48 = vrot.slane %v5639_v43, 1  ;;  %v7904_v35 = vld [vmem:[%s8988_s0 + $0x18] sm:$0xff]   ;;  %v7905_v30 = vld [vmem:[%s8988_s0] sm:$0xff]  }
0x16ce   : > { %v5785_v55 = vsel %vm1861_vm4, %v5783_v53, %v5784_v52  ;;  %v5787_v57 = vsel %vm1861_vm4, %v5784_v52, %v5786_v56  ;;  %v6938_v33 = vld [vmem:[%s8989_s2] ss:$0 sm:$0xff]  ;;  %s8990_s2 = sld [smem:[#allocation10_spill]] }
0x16cf   : > { %v5634_v46 = vsel %vm1719_vm2, %v5629_v44, %v5633_v45  ;;  %v5637_v47 = vor.u32 %v5635_v38, %v5633_v45 }
0x16d0   : > { %7609 = vmatprep.mubr.msk.bf16.mxu1 %vm1946_vm7, %v5634_v46 }
0x16d1   : > { %v5642_v50 = vsel %vm1719_vm2, %v5637_v47, %v5641_v48 }
0x16d2   : > { %7610 = vmatmul.mubr.msk.bf16.vlgmr.msra.gmra.mrb[100].mxu1 %vm1946_vm7, %v5642_v50 }
0x16d3   : > { %7614 = vmatpush3.bf16.msra.mxu1 %v7893_v11  ;;  %7617 = vmatprep.mubr.msk.bf16.mxu1 %vm1946_vm7, %v5611_v37 }
0x16d4   : > { %7615 = vmatprep.subr.bf16.mxu1 %v7894_v49 }
0x16d7   : > { %7616 = vmatpush3.bf16.msra.mxu1 %v7894_v49 }
0x16d8   : > { %7621 = vmatprep.subr.bf16.mxu1 %v7895_v51 }
0x16de   : > { %7618 = vmatmul.mubr.msk.bf16.vlgmr.msra.gmra.mrb[100].mxu1 %vm1946_vm7, %v5612_v41  ;;  %v7901_v41 = vld [vmem:[%s8986_s3 + $0x20] sm:$0xff]   ;;  %s8991_s3 = sshll.u32 %s8993_s1, 5 }
0x16df   : > { %7622 = vmatpush3.bf16.msra.mxu1 %v7895_v51  ;;  %7625 = vmatprep.mubr.msk.bf16.mxu1 %vm1946_vm7, %v5785_v55  ;;  %s1669_s4 = scalar_lea.vmem %s8254_s6, %s8991_s3 }
0x16e0   : > { %7623 = vmatprep.subr.bf16.mxu1 %v7896_v54 }
0x16e3   : > { %7624 = vmatpush3.bf16.msra.mxu1 %v7896_v54 }
0x16e4   : > { %7653 = vmatprep.subr.bf16.mxu1 %v7903_v29 }
0x16ea   : > { %7626 = vmatmul.mubr.msk.bf16.vlgmr.msra.gmra.mrb[100].mxu1 %vm1946_vm7, %v5787_v57 }
0x16eb   : > { %7654 = vmatpush3.bf16.msra.mxu1 %v7903_v29 }
0x16ec   : > { %7655 = vmatprep.subr.bf16.mxu1 %v7904_v35 }
0x16ef   : > { %7656 = vmatpush3.bf16.msra.mxu1 %v7904_v35 }
0x16f0   : > { %7661 = vmatprep.subr.bf16.mxu1 %v7905_v30 }
0x17bd   : > { %v7627_v62 = vpop.f32.mrb[100].mxu1 }
0x17be   : > { %v5868_v63 = vadd.f32 %v7627_v62, %v6917_v61  ;;  %v5840_v0 = vpop.f32.mrb[101].mxu1 }
0x17bf   : > { %v5866_v1 = vadd.f32 %v6917_v61, %v5840_v0  ;;  %v7628_v39 = vpop.f32.mrb[102].mxu1 }
0x17c0   : > { %v5869_v2 = vadd.f32 %v7628_v39, %v6917_v61  ;;  %v5843_v3 = vpop.f32.mrb[103].mxu1  ;;  %v5877_v6 = vrot.slane %v5868_v63, 7 }
0x17c1   : > { %v5874_v4 = vrot.slane %v5866_v1, 7  ;;  %v5867_v5 = vadd.f32 %v6917_v61, %v5843_v3 }
0x17c2   : > { %v5879_v7 = vrot.slane %v5869_v2, 7 }
0x17c3   : > { %v5875_v8 = vrot.slane %v5867_v5, 7  ;;  %v5886_v11 = vsel %vm1698_vm1, 0.0, %v5874_v4 }
0x17c4   : > { %v5880_v9 = vsel %vm1698_vm1, %v5877_v6, %v5879_v7  ;;  %v5887_v10 = vsel %vm1698_vm1, %v5879_v7, 0.0 }
0x17c5   : > { %v5894_v12 = vpack.c.bf16 %v5887_v10, %v5887_v10  ;;  %v5876_v13 = vsel %vm1698_vm1, %v5874_v4, %v5875_v8  ;;  %v5878_v14 = vsel %vm1698_vm1, %v5875_v8, %v5877_v6 }
0x17c6   : > { %v5888_v15 = vpack.c.bf16 %v5876_v13, %v5886_v11  ;;  %v5889_v16 = vpack.c.bf16 %v5880_v9, %v5878_v14 }
0x17c7   : > { %v6063_v17 = vrot.slane %v5894_v12, 1  ;;  %v5916_v18 = vshll.u32 %v5894_v12, 16 }
0x17c8   : > { %v5903_v19 = vshll.u32 %v5888_v15, 16  ;;  %v5908_v20 = vshll.u32 %v5889_v16, 16  ;;  %v6060_v21 = vrot.slane %v5888_v15, 1  ;;  %v6061_v22 = vrot.slane %v5889_v16, 1 }
0x17c9   : > { %v5901_v23 = vshrl.u32 %v5888_v15, 16  ;;  %v5912_v28 = vshrl.u32 %v5889_v16, 16  ;;  %v5918_v36 = vrot.slane %v5916_v18, 1  ;;  %v7906_v18 = vld [vmem:[%s8988_s0 + $0x8] sm:$0xff]  }
0x17ca   : > { %v5905_v26 = vrot.slane %v5903_v19, 1  ;;  %v5910_v27 = vrot.slane %v5908_v20, 1  ;;  %v6062_v32 = vsel %vm1861_vm4, %v6060_v21, %v6061_v22  ;;  %v6064_v34 = vsel %vm1861_vm4, %v6061_v22, %v6063_v17  ;;  %v7907_v19 = vld [vmem:[%s8988_s0 + $0x20] sm:$0xff]   ;;  %v7908_v20 = vld [vmem:[%s8988_s0 + $0x28] sm:$0xff]  }
0x17cb   : > { %v6959_v21 = vld [vmem:[%s8990_s2] ss:$0 sm:$0xff] }
0x17cc   : > { %v5906_v24 = vor.u32 %v5905_v26, %v5901_v23  ;;  %v5914_v37 = vor.u32 %v5912_v28, %v5910_v27 }
0x17ce   : > { %v5911_v40 = vsel %vm1719_vm2, %v5906_v24, %v5910_v27  ;;  %v5919_v25 = vsel %vm1719_vm2, %v5914_v37, %v5918_v36 }
0x17cf   : > { %7633 = vmatprep.mubr.msk.bf16.mxu0 %vm1946_vm7, %v5911_v40 }
0x17d0   : > { %7634 = vmatmul.mubr.msk.bf16.vlgmr.msra.gmra.mrb[108].mxu0 %vm1946_vm7, %v5919_v25 }
0x17d1   : > { %7638 = vmatpush3.bf16.msra.mxu0 %v7899_v60  ;;  %7641 = vmatprep.mubr.msk.bf16.mxu0 %vm1946_vm7, %v5888_v15 }
0x17d2   : > { %7639 = vmatprep.subr.bf16.mxu0 %v7900_v31 }
0x17d5   : > { %7640 = vmatpush3.bf16.msra.mxu0 %v7900_v31 }
0x17d6   : > { %7645 = vmatprep.subr.bf16.mxu0 %v7901_v41 }
0x17dc   : > { %7642 = vmatmul.mubr.msk.bf16.vlgmr.msra.gmra.mrb[108].mxu0 %vm1946_vm7, %v5889_v16 }
0x17dd   : > { %7646 = vmatpush3.bf16.msra.mxu0 %v7901_v41  ;;  %7649 = vmatprep.mubr.msk.bf16.mxu0 %vm1946_vm7, %v6062_v32 }
0x17de   : > { %7647 = vmatprep.subr.bf16.mxu0 %v7902_v42 }
0x17e1   : > { %7648 = vmatpush3.bf16.msra.mxu0 %v7902_v42 }
0x17e8   : > { %7650 = vmatmul.mubr.msk.bf16.vlgmr.msra.gmra.mrb[108].mxu0 %vm1946_vm7, %v6064_v34 }
0x18bb   : > { %v7651_v43 = vpop.f32.mrb[108].mxu0 }
0x18bc   : > { %v6145_v44 = vadd.f32 %v7651_v43, %v6938_v33  ;;  %v6117_v45 = vpop.f32.mrb[109].mxu0 }
0x18bd   : > { %v6143_v38 = vadd.f32 %v6938_v33, %v6117_v45  ;;  %v7652_v46 = vpop.f32.mrb[110].mxu0 }
0x18be   : > { %v6149_v47 = vmax.f32 %v6145_v44, 0.0  ;;  %v6146_v48 = vadd.f32 %v7652_v46, %v6938_v33  ;;  %v6120_v49 = vpop.f32.mrb[111].mxu0 }
0x18bf   : > { %v6147_v50 = vmax.f32 %v6143_v38, 0.0  ;;  %v6144_v51 = vadd.f32 %v6938_v33, %v6120_v49 }
0x18c0   : > { %v6150_v52 = vmax.f32 %v6146_v48, 0.0  ;;  %v6158_v55 = vrot.slane %v6149_v47, 7 }
0x18c1   : > { %v6155_v53 = vrot.slane %v6147_v50, 7  ;;  %v6148_v54 = vmax.f32 %v6144_v51, 0.0 }
0x18c2   : > { %v6160_v56 = vrot.slane %v6150_v52, 7 }
0x18c3   : > { %v6156_v57 = vrot.slane %v6148_v54, 7  ;;  %v6167_v60 = vsel %vm1698_vm1, 0.0, %v6155_v53 }
0x18c4   : > { %v6161_v58 = vsel %vm1698_vm1, %v6158_v55, %v6160_v56  ;;  %v6168_v59 = vsel %vm1698_vm1, %v6160_v56, 0.0 }
0x18c5   : > { %v6175_v61 = vpack.c.bf16 %v6168_v59, %v6168_v59  ;;  %v6157_v62 = vsel %vm1698_vm1, %v6155_v53, %v6156_v57  ;;  %v6159_v63 = vsel %vm1698_vm1, %v6156_v57, %v6158_v55 }
0x18c6   : > { %v6169_v0 = vpack.c.bf16 %v6157_v62, %v6167_v60  ;;  %v6170_v1 = vpack.c.bf16 %v6161_v58, %v6159_v63 }
0x18c7   : > { %v6344_v39 = vrot.slane %v6175_v61, 1  ;;  %v6197_v2 = vshll.u32 %v6175_v61, 16 }
0x18c8   : > { %v6184_v3 = vshll.u32 %v6169_v0, 16  ;;  %v6189_v4 = vshll.u32 %v6170_v1, 16  ;;  %v6341_v5 = vrot.slane %v6169_v0, 1  ;;  %v6342_v6 = vrot.slane %v6170_v1, 1 }
0x18c9   : > { %v6182_v7 = vshrl.u32 %v6169_v0, 16  ;;  %v6193_v10 = vshrl.u32 %v6170_v1, 16  ;;  %v6199_v13 = vrot.slane %v6197_v2, 1 }
0x18ca   : > { %v6186_v8 = vrot.slane %v6184_v3, 1  ;;  %v6191_v9 = vrot.slane %v6189_v4, 1  ;;  %v6343_v11 = vsel %vm1861_vm4, %v6341_v5, %v6342_v6  ;;  %v6345_v12 = vsel %vm1861_vm4, %v6342_v6, %v6344_v39 }
0x18cc   : > { %v6187_v14 = vor.u32 %v6186_v8, %v6182_v7  ;;  %v6195_v15 = vor.u32 %v6193_v10, %v6191_v9 }
0x18ce   : > { %v6192_v16 = vsel %vm1719_vm2, %v6187_v14, %v6191_v9  ;;  %v6200_v17 = vsel %vm1719_vm2, %v6195_v15, %v6199_v13 }
0x18cf   : > { %7657 = vmatprep.mubr.msk.bf16.mxu1 %vm1946_vm7, %v6192_v16 }
0x18d0   : > { %7658 = vmatmul.mubr.msk.bf16.vlgmr.msra.gmra.mrb[104].mxu1 %vm1946_vm7, %v6200_v17 }
0x18d1   : > { %7662 = vmatpush3.bf16.msra.mxu1 %v7905_v30  ;;  %7665 = vmatprep.mubr.msk.bf16.mxu1 %vm1946_vm7, %v6169_v0 }
0x18d2   : > { %7663 = vmatprep.subr.bf16.mxu1 %v7906_v18 }
0x18d5   : > { %7664 = vmatpush3.bf16.msra.mxu1 %v7906_v18 }
0x18d6   : > { %7669 = vmatprep.subr.bf16.mxu1 %v7907_v19 }
0x18dc   : > { %7666 = vmatmul.mubr.msk.bf16.vlgmr.msra.gmra.mrb[104].mxu1 %vm1946_vm7, %v6170_v1 }
0x18dd   : > { %7670 = vmatpush3.bf16.msra.mxu1 %v7907_v19  ;;  %7673 = vmatprep.mubr.msk.bf16.mxu1 %vm1946_vm7, %v6343_v11 }
0x18de   : > { %7671 = vmatprep.subr.bf16.mxu1 %v7908_v20 }
0x18e1   : > { %7672 = vmatpush3.bf16.msra.mxu1 %v7908_v20 }
0x18e8   : > { %7674 = vmatmul.mubr.msk.bf16.vlgmr.msra.gmra.mrb[104].mxu1 %vm1946_vm7, %v6345_v12 }
0x19bb   : > { %v7675_v22 = vpop.f32.mrb[104].mxu1 }
0x19bc   : > { %v6426_v23 = vadd.f32 %v7675_v22, %v6959_v21  ;;  %v6398_v26 = vpop.f32.mrb[105].mxu1 }
0x19bd   : > { %v6424_v27 = vadd.f32 %v6959_v21, %v6398_v26  ;;  %v7676_v28 = vpop.f32.mrb[106].mxu1 }
0x19be   : > { %6430 = vst.msk [vmem:[%s1669_s4 + $0x10] sm:$0xff] %vm1740_vm3, %v6426_v23  ;;  %v6427_v32 = vadd.f32 %v7676_v28, %v6959_v21  ;;  %v6401_v34 = vpop.f32.mrb[107].mxu1 }
0x19bf   : > { %6428 = vst.msk [vmem:[%s1669_s4] sm:$0xff] %vm1740_vm3, %v6424_v27  ;;  %v6425_v36 = vadd.f32 %v6959_v21, %v6401_v34 }
0x19c0   : > { %6431 = vst.msk [vmem:[%s1669_s4 + $0x18] sm:$0xff] %vm1740_vm3, %v6427_v32 }
0x19c1   : > { %6429 = vst.msk [vmem:[%s1669_s4 + $0x8] sm:$0xff] %vm1740_vm3, %v6425_v36 }
0x19c2 PF: > { %s124_s28 = sadd.s32 1, %s7915_s28  }
0x19c3   : > { %p121_p4 = scmp.ge.s32.totalorder %s124_s28, 4  }
0x19c5   :  { %123 = sbr.rel (!%p121_p4) target bundleno = 105 (0x69), region = 389 }

</bundles_post_ra>
